<compile_context>
chip_gen: v5e
topology: v5e:2x2
jax: 0.10.0
libtpu: 0.0.40
codegen_flags: <defaults>
</compile_context>

<pallas_src>
import functools

import jax
import jax.numpy as jnp
import numpy as np
from jax import lax
from jax.experimental import pallas as pl
from jax.experimental.pallas import tpu as pltpu


def _pick_row_tile(h_out, w_out):
    """Smallest divisor TH of H_out with TH*W_out a multiple of 128 (lane-dense)."""
    for th in range(1, h_out + 1):
        if h_out % th == 0 and (th * w_out) % 128 == 0:
            return th
    return h_out  # fallback: single row tile (output stores become masked)


def _atrous_sep_conv_kernel(x_ref, wf_ref, bf_ref, o_ref, xpad_ref, col_ref, *,
                            kh_size, kw_size, stride, dilation,
                            pad_h, pad_w, h_in, w_in, w_out, th, c_in):
    """Grid = (batch, row_tile).

    x_ref   : (C_in, H, W)            NCHW input for this batch element
    wf_ref  : (C_out, KH*KW*C_in)     fused depthwise*pointwise weights
    bf_ref  : (C_out, 1)              fused bias (f32)
    o_ref   : (C_out, TH*W_out)       lane-dense output tile (NCHW-flattened)
    xpad_ref: (C_in, H_pad, W_pad)    padded image scratch (filled once per batch)
    col_ref : (KH*KW*C_in, TH*W_out)  im2col staging scratch
    """
    r = pl.program_id(1)
    w_pad = w_in + 2 * pad_w

    # ---- fill padded-image scratch once per batch element ------------------
    # (the scratch persists across the sequential row-tile axis; borders are
    #  zeroed and the interior copied only at r == 0, not every step)
    @pl.when(r == 0)
    def _fill():
        if pad_h > 0:
            zrow = jnp.zeros((c_in, pad_h, w_pad), xpad_ref.dtype)
            xpad_ref[:, :pad_h, :] = zrow
            xpad_ref[:, pad_h + h_in:, :] = zrow
        if pad_w > 0:
            zcol = jnp.zeros((c_in, h_in, pad_w), xpad_ref.dtype)
            xpad_ref[:, pad_h:pad_h + h_in, :pad_w] = zcol
            xpad_ref[:, pad_h:pad_h + h_in, pad_w + w_in:] = zcol
        xpad_ref[:, pad_h:pad_h + h_in, pad_w:pad_w + w_in] = (
            x_ref[...].astype(xpad_ref.dtype))

    # ---- im2col staging: col[tap*C_in + ci, j*W_out + oc] ------------------
    # Only per-row (C_in, W_out) ref->ref moves: dynamic offsets live on the
    # sublane (row) axis (pure address arithmetic), lane windows are static.
    row0 = r * (th * stride)  # first padded input row used by this row tile
    tap = 0
    for kh in range(kh_size):
        for kw in range(kw_size):
            h0 = kh * dilation
            w0 = kw * dilation
            for j in range(th):
                row = row0 + h0 + j * stride
                if stride == 1:
                    strip = xpad_ref[:, row, w0:w0 + w_out]
                else:
                    # TODO(synk): strided lane window is untested (module test
                    # only exercises stride=1).
                    strip = xpad_ref[:, row, pl.ds(w0, w_out, stride)]
                col_ref[tap * c_in:(tap + 1) * c_in,
                        j * w_out:(j + 1) * w_out] = strip.astype(col_ref.dtype)
            tap += 1

    # ---- single fused matmul on the MXU, lane-dense (C_out, TH*W_out) ------
    out = jnp.dot(wf_ref[...], col_ref[...],
                  preferred_element_type=jnp.float32) + bf_ref[...]
    o_ref[...] = out.astype(o_ref.dtype)


def atrous_separable_convolution(x_nchw, w_dw, b_dw, w_pw, b_pw, *,
                                 stride=1, padding=0, dilation=1,
                                 use_bf16_mxu=False):
    """x_nchw: (N, C_in, H, W); w_dw: (C_in, 1, KH, KW); b_dw: (C_in,);
    w_pw: (C_out, C_in, 1, 1); b_pw: (C_out,). Returns NCHW output."""
    n, c_in, h, w = x_nchw.shape
    kh_size, kw_size = int(w_dw.shape[2]), int(w_dw.shape[3])
    c_out = int(w_pw.shape[0])

    h_out = (h + 2 * padding - dilation * (kh_size - 1) - 1) // stride + 1
    w_out = (w + 2 * padding - dilation * (kw_size - 1) - 1) // stride + 1
    h_pad = h + 2 * padding
    w_pad = w + 2 * padding
    t_k = kh_size * kw_size * c_in

    th = _pick_row_tile(h_out, w_out)      # row-tile height (lane-dense output)
    n_rt = h_out // th                     # row tiles per image

    # Fuse depthwise and pointwise weights/biases once in the wrapper,
    # already oriented (C_out, K) so the kernel never transposes anything.
    compute_dtype = jnp.bfloat16 if use_bf16_mxu else jnp.float32
    wdw = jnp.transpose(w_dw[:, 0, :, :], (1, 2, 0)).reshape(
        kh_size * kw_size, c_in).astype(jnp.float32)            # [tap, ci]
    wpw = w_pw[:, :, 0, 0].astype(jnp.float32)                  # [co, ci]
    wf = (wpw[:, None, :] * wdw[None, :, :]).reshape(
        c_out, t_k).astype(compute_dtype)                       # [co, tap*ci]
    bf = (wpw @ b_dw.astype(jnp.float32)
          + b_pw.astype(jnp.float32)).reshape(c_out, 1)         # f32 bias

    kernel = functools.partial(
        _atrous_sep_conv_kernel,
        kh_size=kh_size, kw_size=kw_size, stride=stride, dilation=dilation,
        pad_h=padding, pad_w=padding, h_in=h, w_in=w,
        w_out=w_out, th=th, c_in=c_in)

    itemsize = x_nchw.dtype.itemsize
    flops = 2 * n * c_out * t_k * h_out * w_out
    bytes_accessed = (n * c_in * h * w * itemsize
                      + n * c_out * h_out * w_out * itemsize
                      + wf.size * wf.dtype.itemsize
                      + bf.size * 4)

    out_flat = pl.pallas_call(
        kernel,
        out_shape=jax.ShapeDtypeStruct((n, c_out, h_out * w_out), x_nchw.dtype),
        grid_spec=pltpu.PrefetchScalarGridSpec(
            num_scalar_prefetch=0,
            grid=(n, n_rt),
            in_specs=[
                # NCHW input, whole image per batch element (block index does
                # not change along the row-tile axis -> no re-DMA across r).
                pl.BlockSpec((None, c_in, h, w), lambda b, r: (b, 0, 0, 0)),
                pl.BlockSpec((c_out, t_k), lambda b, r: (0, 0)),
                pl.BlockSpec((c_out, 1), lambda b, r: (0, 0)),
            ],
            # lane-dense output tile: minor dim TH*W_out (multiple of 128 here)
            out_specs=pl.BlockSpec((None, c_out, th * w_out),
                                   lambda b, r: (b, 0, r)),
            scratch_shapes=[
                pltpu.VMEM((c_in, h_pad, w_pad), jnp.float32),   # padded image
                pltpu.VMEM((t_k, th * w_out), compute_dtype),    # im2col tile
            ],
        ),
        compiler_params=pltpu.CompilerParams(
            dimension_semantics=("parallel", "arbitrary"),
            vmem_limit_bytes=32 * 1024 * 1024),
        cost_estimate=pl.CostEstimate(flops=flops, transcendentals=0,
                                      bytes_accessed=bytes_accessed),
    )(x_nchw, wf, bf)

    # Free row-major reshape back to NCHW; no extra HBM pass.
    return out_flat.reshape(n, c_out, h_out, w_out)


def _reference(x_nchw, w_dw, b_dw, w_pw, b_pw, *, stride, padding, dilation):
    """Pure-JAX reference using lax.conv_general_dilated (matches nn.Conv2d)."""
    c_in = x_nchw.shape[1]
    y = lax.conv_general_dilated(
        x_nchw, w_dw,
        window_strides=(stride, stride),
        padding=[(padding, padding), (padding, padding)],
        rhs_dilation=(dilation, dilation),
        feature_group_count=c_in,
        dimension_numbers=("NCHW", "OIHW", "NCHW"))
    y = y + b_dw.reshape(1, -1, 1, 1)
    z = lax.conv_general_dilated(
        y, w_pw, window_strides=(1, 1), padding=[(0, 0), (0, 0)],
        dimension_numbers=("NCHW", "OIHW", "NCHW"))
    return z + b_pw.reshape(1, -1, 1, 1)


if __name__ == "__main__":
    # Module config: in_channels=4, out_channels=8, kernel=3, stride=1,
    # padding=2, dilation=2, bias=True.
    N, C_IN, H, W = 2, 4, 16, 16
    C_OUT, K = 8, 3
    STRIDE, PADDING, DILATION = 1, 2, 2

    key = jax.random.PRNGKey(0)
    kx, kw1, kb1, kw2, kb2 = jax.random.split(key, 5)

    x = jax.random.normal(kx, (N, C_IN, H, W), dtype=jnp.float32)

    # Deterministic "kaiming-like" init (scaled normals); biases small normals.
    fan_in_dw = 1 * K * K
    w_dw = jax.random.normal(kw1, (C_IN, 1, K, K), jnp.float32) * np.sqrt(2.0 / fan_in_dw)
    b_dw = jax.random.normal(kb1, (C_IN,), jnp.float32) * 0.1
    fan_in_pw = C_IN
    w_pw = jax.random.normal(kw2, (C_OUT, C_IN, 1, 1), jnp.float32) * np.sqrt(2.0 / fan_in_pw)
    b_pw = jax.random.normal(kb2, (C_OUT,), jnp.float32) * 0.1

    out = atrous_separable_convolution(
        x, w_dw, b_dw, w_pw, b_pw,
        stride=STRIDE, padding=PADDING, dilation=DILATION)
    out = jax.block_until_ready(out)

    ref = _reference(x, w_dw, b_dw, w_pw, b_pw,
                     stride=STRIDE, padding=PADDING, dilation=DILATION)
    np.testing.assert_allclose(np.asarray(out), np.asarray(ref),
                               rtol=1e-4, atol=1e-4)

    print("KERNEL_OK")
</pallas_src>

<mosaic_0001>
module attributes {stable_mosaic.version = 11 : i64} {
  func.func @_atrous_sep_conv_kernel(%arg0: i32, %arg1: i32, %arg2: memref<1x4x16x16xf32, #tpu.memory_space<vmem>>, %arg3: memref<8x36xf32, #tpu.memory_space<vmem>>, %arg4: memref<8x1xf32, #tpu.memory_space<vmem>>, %arg5: memref<1x8x128xf32, #tpu.memory_space<vmem>>, %arg6: memref<4x20x20xf32, #tpu.memory_space<vmem>>, %arg7: memref<36x128xf32, #tpu.memory_space<vmem>>) attributes {dimension_semantics = [#tpu.dimension_semantics<parallel>, #tpu.dimension_semantics<arbitrary>], iteration_bounds = array<i64: 2, 2>, scalar_prefetch = 0 : i64, scratch_operands = 2 : i64, tpu.core_type = #tpu.core_type<tc>, window_params = [{transform_indices = @transform_0, window_bounds = array<i64: 1, 4, 16, 16>}, {pipeline_mode = #tpu.pipeline_mode<synchronous>, transform_indices = @transform_1, window_bounds = array<i64: 8, 36>}, {pipeline_mode = #tpu.pipeline_mode<synchronous>, transform_indices = @transform_2, window_bounds = array<i64: 8, 1>}, {transform_indices = @transform_3, window_bounds = array<i64: 1, 8, 128>}]} {
    %c0_i32 = arith.constant 0 : i32
    %0 = arith.cmpi eq, %arg1, %c0_i32 : i32
    %1 = arith.extui %0 : i1 to i32
    %c0_i32_0 = arith.constant 0 : i32
    %2 = arith.cmpi ne, %1, %c0_i32_0 : i32
    scf.if %2 {
      %cst_420 = arith.constant 0.000000e+00 : f32
      %445 = vector.broadcast %cst_420 : f32 to vector<4x2x20xf32>
      %c0_421 = arith.constant 0 : index
      %c0_422 = arith.constant 0 : index
      %c0_423 = arith.constant 0 : index
      %446 = vector.load %arg6[%c0_421, %c0_422, %c0_423] : memref<4x20x20xf32, #tpu.memory_space<vmem>>, vector<4x2x20xf32>
      tpu.vector_store %arg6[%c0_421, %c0_422, %c0_423], %445 {strides = array<i32>} : memref<4x20x20xf32, #tpu.memory_space<vmem>>, vector<4x2x20xf32>,
      %c0_424 = arith.constant 0 : index
      %c18 = arith.constant 18 : index
      %c0_425 = arith.constant 0 : index
      %447 = vector.load %arg6[%c0_424, %c18, %c0_425] : memref<4x20x20xf32, #tpu.memory_space<vmem>>, vector<4x2x20xf32>
      tpu.vector_store %arg6[%c0_424, %c18, %c0_425], %445 {strides = array<i32>} : memref<4x20x20xf32, #tpu.memory_space<vmem>>, vector<4x2x20xf32>,
      %cst_426 = arith.constant 0.000000e+00 : f32
      %448 = vector.broadcast %cst_426 : f32 to vector<4x16x2xf32>
      %c0_427 = arith.constant 0 : index
      %c2_428 = arith.constant 2 : index
      %c0_429 = arith.constant 0 : index
      %449 = vector.load %arg6[%c0_427, %c2_428, %c0_429] : memref<4x20x20xf32, #tpu.memory_space<vmem>>, vector<4x16x2xf32>
      tpu.vector_store %arg6[%c0_427, %c2_428, %c0_429], %448 {strides = array<i32>} : memref<4x20x20xf32, #tpu.memory_space<vmem>>, vector<4x16x2xf32>,
      %c0_430 = arith.constant 0 : index
      %c2_431 = arith.constant 2 : index
      %c18_432 = arith.constant 18 : index
      %450 = vector.load %arg6[%c0_430, %c2_431, %c18_432] : memref<4x20x20xf32, #tpu.memory_space<vmem>>, vector<4x16x2xf32>
      tpu.vector_store %arg6[%c0_430, %c2_431, %c18_432], %448 {strides = array<i32>} : memref<4x20x20xf32, #tpu.memory_space<vmem>>, vector<4x16x2xf32>,
      %c0_433 = arith.constant 0 : index
      %c0_434 = arith.constant 0 : index
      %c0_435 = arith.constant 0 : index
      %c0_436 = arith.constant 0 : index
      %451 = vector.load %arg2[%c0_433, %c0_434, %c0_435, %c0_436] : memref<1x4x16x16xf32, #tpu.memory_space<vmem>>, vector<1x4x16x16xf32>
      %452 = vector.shape_cast %451 : vector<1x4x16x16xf32> to vector<4x16x16xf32>
      %c0_437 = arith.constant 0 : index
      %c2_438 = arith.constant 2 : index
      %c2_439 = arith.constant 2 : index
      %453 = vector.load %arg6[%c0_437, %c2_438, %c2_439] : memref<4x20x20xf32, #tpu.memory_space<vmem>>, vector<4x16x16xf32>
      tpu.vector_store %arg6[%c0_437, %c2_438, %c2_439], %452 {strides = array<i32>} : memref<4x20x20xf32, #tpu.memory_space<vmem>>, vector<4x16x16xf32>,
    } else {
    }
    %c8_i32 = arith.constant 8 : i32
    %3 = arith.muli %arg1, %c8_i32 : i32
    %c0_i32_1 = arith.constant 0 : i32
    %4 = arith.addi %3, %c0_i32_1 : i32
    %c0_i32_2 = arith.constant 0 : i32
    %5 = arith.addi %4, %c0_i32_2 : i32
    %c0 = arith.constant 0 : index
    %6 = arith.index_cast %5 : i32 to index
    %c0_3 = arith.constant 0 : index
    %7 = vector.load %arg6[%c0, %6, %c0_3] : memref<4x20x20xf32, #tpu.memory_space<vmem>>, vector<4x1x16xf32>
    %8 = vector.shape_cast %7 : vector<4x1x16xf32> to vector<4x16xf32>
    %c0_4 = arith.constant 0 : index
    %c0_5 = arith.constant 0 : index
    %9 = vector.load %arg7[%c0_4, %c0_5] : memref<36x128xf32, #tpu.memory_space<vmem>>, vector<4x16xf32>
    tpu.vector_store %arg7[%c0_4, %c0_5], %8 {strides = array<i32>} : memref<36x128xf32, #tpu.memory_space<vmem>>, vector<4x16xf32>,
    %c0_i32_6 = arith.constant 0 : i32
    %10 = arith.addi %3, %c0_i32_6 : i32
    %c1_i32 = arith.constant 1 : i32
    %11 = arith.addi %10, %c1_i32 : i32
    %c0_7 = arith.constant 0 : index
    %12 = arith.index_cast %11 : i32 to index
    %c0_8 = arith.constant 0 : index
    %13 = vector.load %arg6[%c0_7, %12, %c0_8] : memref<4x20x20xf32, #tpu.memory_space<vmem>>, vector<4x1x16xf32>
    %14 = vector.shape_cast %13 : vector<4x1x16xf32> to vector<4x16xf32>
    %c0_9 = arith.constant 0 : index
    %c16 = arith.constant 16 : index
    %15 = vector.load %arg7[%c0_9, %c16] : memref<36x128xf32, #tpu.memory_space<vmem>>, vector<4x16xf32>
    tpu.vector_store %arg7[%c0_9, %c16], %14 {strides = array<i32>} : memref<36x128xf32, #tpu.memory_space<vmem>>, vector<4x16xf32>,
    %c0_i32_10 = arith.constant 0 : i32
    %16 = arith.addi %3, %c0_i32_10 : i32
    %c2_i32 = arith.constant 2 : i32
    %17 = arith.addi %16, %c2_i32 : i32
    %c0_11 = arith.constant 0 : index
    %18 = arith.index_cast %17 : i32 to index
    %c0_12 = arith.constant 0 : index
    %19 = vector.load %arg6[%c0_11, %18, %c0_12] : memref<4x20x20xf32, #tpu.memory_space<vmem>>, vector<4x1x16xf32>
    %20 = vector.shape_cast %19 : vector<4x1x16xf32> to vector<4x16xf32>
    %c0_13 = arith.constant 0 : index
    %c32 = arith.constant 32 : index
    %21 = vector.load %arg7[%c0_13, %c32] : memref<36x128xf32, #tpu.memory_space<vmem>>, vector<4x16xf32>
    tpu.vector_store %arg7[%c0_13, %c32], %20 {strides = array<i32>} : memref<36x128xf32, #tpu.memory_space<vmem>>, vector<4x16xf32>,
    %c0_i32_14 = arith.constant 0 : i32
    %22 = arith.addi %3, %c0_i32_14 : i32
    %c3_i32 = arith.constant 3 : i32
    %23 = arith.addi %22, %c3_i32 : i32
    %c0_15 = arith.constant 0 : index
    %24 = arith.index_cast %23 : i32 to index
    %c0_16 = arith.constant 0 : index
    %25 = vector.load %arg6[%c0_15, %24, %c0_16] : memref<4x20x20xf32, #tpu.memory_space<vmem>>, vector<4x1x16xf32>
    %26 = vector.shape_cast %25 : vector<4x1x16xf32> to vector<4x16xf32>
    %c0_17 = arith.constant 0 : index
    %c48 = arith.constant 48 : index
    %27 = vector.load %arg7[%c0_17, %c48] : memref<36x128xf32, #tpu.memory_space<vmem>>, vector<4x16xf32>
    tpu.vector_store %arg7[%c0_17, %c48], %26 {strides = array<i32>} : memref<36x128xf32, #tpu.memory_space<vmem>>, vector<4x16xf32>,
    %c0_i32_18 = arith.constant 0 : i32
    %28 = arith.addi %3, %c0_i32_18 : i32
    %c4_i32 = arith.constant 4 : i32
    %29 = arith.addi %28, %c4_i32 : i32
    %c0_19 = arith.constant 0 : index
    %30 = arith.index_cast %29 : i32 to index
    %c0_20 = arith.constant 0 : index
    %31 = vector.load %arg6[%c0_19, %30, %c0_20] : memref<4x20x20xf32, #tpu.memory_space<vmem>>, vector<4x1x16xf32>
    %32 = vector.shape_cast %31 : vector<4x1x16xf32> to vector<4x16xf32>
    %c0_21 = arith.constant 0 : index
    %c64 = arith.constant 64 : index
    %33 = vector.load %arg7[%c0_21, %c64] : memref<36x128xf32, #tpu.memory_space<vmem>>, vector<4x16xf32>
    tpu.vector_store %arg7[%c0_21, %c64], %32 {strides = array<i32>} : memref<36x128xf32, #tpu.memory_space<vmem>>, vector<4x16xf32>,
    %c0_i32_22 = arith.constant 0 : i32
    %34 = arith.addi %3, %c0_i32_22 : i32
    %c5_i32 = arith.constant 5 : i32
    %35 = arith.addi %34, %c5_i32 : i32
    %c0_23 = arith.constant 0 : index
    %36 = arith.index_cast %35 : i32 to index
    %c0_24 = arith.constant 0 : index
    %37 = vector.load %arg6[%c0_23, %36, %c0_24] : memref<4x20x20xf32, #tpu.memory_space<vmem>>, vector<4x1x16xf32>
    %38 = vector.shape_cast %37 : vector<4x1x16xf32> to vector<4x16xf32>
    %c0_25 = arith.constant 0 : index
    %c80 = arith.constant 80 : index
    %39 = vector.load %arg7[%c0_25, %c80] : memref<36x128xf32, #tpu.memory_space<vmem>>, vector<4x16xf32>
    tpu.vector_store %arg7[%c0_25, %c80], %38 {strides = array<i32>} : memref<36x128xf32, #tpu.memory_space<vmem>>, vector<4x16xf32>,
    %c0_i32_26 = arith.constant 0 : i32
    %40 = arith.addi %3, %c0_i32_26 : i32
    %c6_i32 = arith.constant 6 : i32
    %41 = arith.addi %40, %c6_i32 : i32
    %c0_27 = arith.constant 0 : index
    %42 = arith.index_cast %41 : i32 to index
    %c0_28 = arith.constant 0 : index
    %43 = vector.load %arg6[%c0_27, %42, %c0_28] : memref<4x20x20xf32, #tpu.memory_space<vmem>>, vector<4x1x16xf32>
    %44 = vector.shape_cast %43 : vector<4x1x16xf32> to vector<4x16xf32>
    %c0_29 = arith.constant 0 : index
    %c96 = arith.constant 96 : index
    %45 = vector.load %arg7[%c0_29, %c96] : memref<36x128xf32, #tpu.memory_space<vmem>>, vector<4x16xf32>
    tpu.vector_store %arg7[%c0_29, %c96], %44 {strides = array<i32>} : memref<36x128xf32, #tpu.memory_space<vmem>>, vector<4x16xf32>,
    %c0_i32_30 = arith.constant 0 : i32
    %46 = arith.addi %3, %c0_i32_30 : i32
    %c7_i32 = arith.constant 7 : i32
    %47 = arith.addi %46, %c7_i32 : i32
    %c0_31 = arith.constant 0 : index
    %48 = arith.index_cast %47 : i32 to index
    %c0_32 = arith.constant 0 : index
    %49 = vector.load %arg6[%c0_31, %48, %c0_32] : memref<4x20x20xf32, #tpu.memory_space<vmem>>, vector<4x1x16xf32>
    %50 = vector.shape_cast %49 : vector<4x1x16xf32> to vector<4x16xf32>
    %c0_33 = arith.constant 0 : index
    %c112 = arith.constant 112 : index
    %51 = vector.load %arg7[%c0_33, %c112] : memref<36x128xf32, #tpu.memory_space<vmem>>, vector<4x16xf32>
    tpu.vector_store %arg7[%c0_33, %c112], %50 {strides = array<i32>} : memref<36x128xf32, #tpu.memory_space<vmem>>, vector<4x16xf32>,
    %c0_i32_34 = arith.constant 0 : i32
    %52 = arith.addi %3, %c0_i32_34 : i32
    %c0_i32_35 = arith.constant 0 : i32
    %53 = arith.addi %52, %c0_i32_35 : i32
    %c0_36 = arith.constant 0 : index
    %54 = arith.index_cast %53 : i32 to index
    %c2 = arith.constant 2 : index
    %55 = vector.load %arg6[%c0_36, %54, %c2] : memref<4x20x20xf32, #tpu.memory_space<vmem>>, vector<4x1x16xf32>
    %56 = vector.shape_cast %55 : vector<4x1x16xf32> to vector<4x16xf32>
    %c4 = arith.constant 4 : index
    %c0_37 = arith.constant 0 : index
    %57 = vector.load %arg7[%c4, %c0_37] : memref<36x128xf32, #tpu.memory_space<vmem>>, vector<4x16xf32>
    tpu.vector_store %arg7[%c4, %c0_37], %56 {strides = array<i32>} : memref<36x128xf32, #tpu.memory_space<vmem>>, vector<4x16xf32>,
    %c0_i32_38 = arith.constant 0 : i32
    %58 = arith.addi %3, %c0_i32_38 : i32
    %c1_i32_39 = arith.constant 1 : i32
    %59 = arith.addi %58, %c1_i32_39 : i32
    %c0_40 = arith.constant 0 : index
    %60 = arith.index_cast %59 : i32 to index
    %c2_41 = arith.constant 2 : index
    %61 = vector.load %arg6[%c0_40, %60, %c2_41] : memref<4x20x20xf32, #tpu.memory_space<vmem>>, vector<4x1x16xf32>
    %62 = vector.shape_cast %61 : vector<4x1x16xf32> to vector<4x16xf32>
    %c4_42 = arith.constant 4 : index
    %c16_43 = arith.constant 16 : index
    %63 = vector.load %arg7[%c4_42, %c16_43] : memref<36x128xf32, #tpu.memory_space<vmem>>, vector<4x16xf32>
    tpu.vector_store %arg7[%c4_42, %c16_43], %62 {strides = array<i32>} : memref<36x128xf32, #tpu.memory_space<vmem>>, vector<4x16xf32>,
    %c0_i32_44 = arith.constant 0 : i32
    %64 = arith.addi %3, %c0_i32_44 : i32
    %c2_i32_45 = arith.constant 2 : i32
    %65 = arith.addi %64, %c2_i32_45 : i32
    %c0_46 = arith.constant 0 : index
    %66 = arith.index_cast %65 : i32 to index
    %c2_47 = arith.constant 2 : index
    %67 = vector.load %arg6[%c0_46, %66, %c2_47] : memref<4x20x20xf32, #tpu.memory_space<vmem>>, vector<4x1x16xf32>
    %68 = vector.shape_cast %67 : vector<4x1x16xf32> to vector<4x16xf32>
    %c4_48 = arith.constant 4 : index
    %c32_49 = arith.constant 32 : index
    %69 = vector.load %arg7[%c4_48, %c32_49] : memref<36x128xf32, #tpu.memory_space<vmem>>, vector<4x16xf32>
    tpu.vector_store %arg7[%c4_48, %c32_49], %68 {strides = array<i32>} : memref<36x128xf32, #tpu.memory_space<vmem>>, vector<4x16xf32>,
    %c0_i32_50 = arith.constant 0 : i32
    %70 = arith.addi %3, %c0_i32_50 : i32
    %c3_i32_51 = arith.constant 3 : i32
    %71 = arith.addi %70, %c3_i32_51 : i32
    %c0_52 = arith.constant 0 : index
    %72 = arith.index_cast %71 : i32 to index
    %c2_53 = arith.constant 2 : index
    %73 = vector.load %arg6[%c0_52, %72, %c2_53] : memref<4x20x20xf32, #tpu.memory_space<vmem>>, vector<4x1x16xf32>
    %74 = vector.shape_cast %73 : vector<4x1x16xf32> to vector<4x16xf32>
    %c4_54 = arith.constant 4 : index
    %c48_55 = arith.constant 48 : index
    %75 = vector.load %arg7[%c4_54, %c48_55] : memref<36x128xf32, #tpu.memory_space<vmem>>, vector<4x16xf32>
    tpu.vector_store %arg7[%c4_54, %c48_55], %74 {strides = array<i32>} : memref<36x128xf32, #tpu.memory_space<vmem>>, vector<4x16xf32>,
    %c0_i32_56 = arith.constant 0 : i32
    %76 = arith.addi %3, %c0_i32_56 : i32
    %c4_i32_57 = arith.constant 4 : i32
    %77 = arith.addi %76, %c4_i32_57 : i32
    %c0_58 = arith.constant 0 : index
    %78 = arith.index_cast %77 : i32 to index
    %c2_59 = arith.constant 2 : index
    %79 = vector.load %arg6[%c0_58, %78, %c2_59] : memref<4x20x20xf32, #tpu.memory_space<vmem>>, vector<4x1x16xf32>
    %80 = vector.shape_cast %79 : vector<4x1x16xf32> to vector<4x16xf32>
    %c4_60 = arith.constant 4 : index
    %c64_61 = arith.constant 64 : index
    %81 = vector.load %arg7[%c4_60, %c64_61] : memref<36x128xf32, #tpu.memory_space<vmem>>, vector<4x16xf32>
    tpu.vector_store %arg7[%c4_60, %c64_61], %80 {strides = array<i32>} : memref<36x128xf32, #tpu.memory_space<vmem>>, vector<4x16xf32>,
    %c0_i32_62 = arith.constant 0 : i32
    %82 = arith.addi %3, %c0_i32_62 : i32
    %c5_i32_63 = arith.constant 5 : i32
    %83 = arith.addi %82, %c5_i32_63 : i32
    %c0_64 = arith.constant 0 : index
    %84 = arith.index_cast %83 : i32 to index
    %c2_65 = arith.constant 2 : index
    %85 = vector.load %arg6[%c0_64, %84, %c2_65] : memref<4x20x20xf32, #tpu.memory_space<vmem>>, vector<4x1x16xf32>
    %86 = vector.shape_cast %85 : vector<4x1x16xf32> to vector<4x16xf32>
    %c4_66 = arith.constant 4 : index
    %c80_67 = arith.constant 80 : index
    %87 = vector.load %arg7[%c4_66, %c80_67] : memref<36x128xf32, #tpu.memory_space<vmem>>, vector<4x16xf32>
    tpu.vector_store %arg7[%c4_66, %c80_67], %86 {strides = array<i32>} : memref<36x128xf32, #tpu.memory_space<vmem>>, vector<4x16xf32>,
    %c0_i32_68 = arith.constant 0 : i32
    %88 = arith.addi %3, %c0_i32_68 : i32
    %c6_i32_69 = arith.constant 6 : i32
    %89 = arith.addi %88, %c6_i32_69 : i32
    %c0_70 = arith.constant 0 : index
    %90 = arith.index_cast %89 : i32 to index
    %c2_71 = arith.constant 2 : index
    %91 = vector.load %arg6[%c0_70, %90, %c2_71] : memref<4x20x20xf32, #tpu.memory_space<vmem>>, vector<4x1x16xf32>
    %92 = vector.shape_cast %91 : vector<4x1x16xf32> to vector<4x16xf32>
    %c4_72 = arith.constant 4 : index
    %c96_73 = arith.constant 96 : index
    %93 = vector.load %arg7[%c4_72, %c96_73] : memref<36x128xf32, #tpu.memory_space<vmem>>, vector<4x16xf32>
    tpu.vector_store %arg7[%c4_72, %c96_73], %92 {strides = array<i32>} : memref<36x128xf32, #tpu.memory_space<vmem>>, vector<4x16xf32>,
    %c0_i32_74 = arith.constant 0 : i32
    %94 = arith.addi %3, %c0_i32_74 : i32
    %c7_i32_75 = arith.constant 7 : i32
    %95 = arith.addi %94, %c7_i32_75 : i32
    %c0_76 = arith.constant 0 : index
    %96 = arith.index_cast %95 : i32 to index
    %c2_77 = arith.constant 2 : index
    %97 = vector.load %arg6[%c0_76, %96, %c2_77] : memref<4x20x20xf32, #tpu.memory_space<vmem>>, vector<4x1x16xf32>
    %98 = vector.shape_cast %97 : vector<4x1x16xf32> to vector<4x16xf32>
    %c4_78 = arith.constant 4 : index
    %c112_79 = arith.constant 112 : index
    %99 = vector.load %arg7[%c4_78, %c112_79] : memref<36x128xf32, #tpu.memory_space<vmem>>, vector<4x16xf32>
    tpu.vector_store %arg7[%c4_78, %c112_79], %98 {strides = array<i32>} : memref<36x128xf32, #tpu.memory_space<vmem>>, vector<4x16xf32>,
    %c0_i32_80 = arith.constant 0 : i32
    %100 = arith.addi %3, %c0_i32_80 : i32
    %c0_i32_81 = arith.constant 0 : i32
    %101 = arith.addi %100, %c0_i32_81 : i32
    %c0_82 = arith.constant 0 : index
    %102 = arith.index_cast %101 : i32 to index
    %c4_83 = arith.constant 4 : index
    %103 = vector.load %arg6[%c0_82, %102, %c4_83] : memref<4x20x20xf32, #tpu.memory_space<vmem>>, vector<4x1x16xf32>
    %104 = vector.shape_cast %103 : vector<4x1x16xf32> to vector<4x16xf32>
    %c8 = arith.constant 8 : index
    %c0_84 = arith.constant 0 : index
    %105 = vector.load %arg7[%c8, %c0_84] : memref<36x128xf32, #tpu.memory_space<vmem>>, vector<4x16xf32>
    tpu.vector_store %arg7[%c8, %c0_84], %104 {strides = array<i32>} : memref<36x128xf32, #tpu.memory_space<vmem>>, vector<4x16xf32>,
    %c0_i32_85 = arith.constant 0 : i32
    %106 = arith.addi %3, %c0_i32_85 : i32
    %c1_i32_86 = arith.constant 1 : i32
    %107 = arith.addi %106, %c1_i32_86 : i32
    %c0_87 = arith.constant 0 : index
    %108 = arith.index_cast %107 : i32 to index
    %c4_88 = arith.constant 4 : index
    %109 = vector.load %arg6[%c0_87, %108, %c4_88] : memref<4x20x20xf32, #tpu.memory_space<vmem>>, vector<4x1x16xf32>
    %110 = vector.shape_cast %109 : vector<4x1x16xf32> to vector<4x16xf32>
    %c8_89 = arith.constant 8 : index
    %c16_90 = arith.constant 16 : index
    %111 = vector.load %arg7[%c8_89, %c16_90] : memref<36x128xf32, #tpu.memory_space<vmem>>, vector<4x16xf32>
    tpu.vector_store %arg7[%c8_89, %c16_90], %110 {strides = array<i32>} : memref<36x128xf32, #tpu.memory_space<vmem>>, vector<4x16xf32>,
    %c0_i32_91 = arith.constant 0 : i32
    %112 = arith.addi %3, %c0_i32_91 : i32
    %c2_i32_92 = arith.constant 2 : i32
    %113 = arith.addi %112, %c2_i32_92 : i32
    %c0_93 = arith.constant 0 : index
    %114 = arith.index_cast %113 : i32 to index
    %c4_94 = arith.constant 4 : index
    %115 = vector.load %arg6[%c0_93, %114, %c4_94] : memref<4x20x20xf32, #tpu.memory_space<vmem>>, vector<4x1x16xf32>
    %116 = vector.shape_cast %115 : vector<4x1x16xf32> to vector<4x16xf32>
    %c8_95 = arith.constant 8 : index
    %c32_96 = arith.constant 32 : index
    %117 = vector.load %arg7[%c8_95, %c32_96] : memref<36x128xf32, #tpu.memory_space<vmem>>, vector<4x16xf32>
    tpu.vector_store %arg7[%c8_95, %c32_96], %116 {strides = array<i32>} : memref<36x128xf32, #tpu.memory_space<vmem>>, vector<4x16xf32>,
    %c0_i32_97 = arith.constant 0 : i32
    %118 = arith.addi %3, %c0_i32_97 : i32
    %c3_i32_98 = arith.constant 3 : i32
    %119 = arith.addi %118, %c3_i32_98 : i32
    %c0_99 = arith.constant 0 : index
    %120 = arith.index_cast %119 : i32 to index
    %c4_100 = arith.constant 4 : index
    %121 = vector.load %arg6[%c0_99, %120, %c4_100] : memref<4x20x20xf32, #tpu.memory_space<vmem>>, vector<4x1x16xf32>
    %122 = vector.shape_cast %121 : vector<4x1x16xf32> to vector<4x16xf32>
    %c8_101 = arith.constant 8 : index
    %c48_102 = arith.constant 48 : index
    %123 = vector.load %arg7[%c8_101, %c48_102] : memref<36x128xf32, #tpu.memory_space<vmem>>, vector<4x16xf32>
    tpu.vector_store %arg7[%c8_101, %c48_102], %122 {strides = array<i32>} : memref<36x128xf32, #tpu.memory_space<vmem>>, vector<4x16xf32>,
    %c0_i32_103 = arith.constant 0 : i32
    %124 = arith.addi %3, %c0_i32_103 : i32
    %c4_i32_104 = arith.constant 4 : i32
    %125 = arith.addi %124, %c4_i32_104 : i32
    %c0_105 = arith.constant 0 : index
    %126 = arith.index_cast %125 : i32 to index
    %c4_106 = arith.constant 4 : index
    %127 = vector.load %arg6[%c0_105, %126, %c4_106] : memref<4x20x20xf32, #tpu.memory_space<vmem>>, vector<4x1x16xf32>
    %128 = vector.shape_cast %127 : vector<4x1x16xf32> to vector<4x16xf32>
    %c8_107 = arith.constant 8 : index
    %c64_108 = arith.constant 64 : index
    %129 = vector.load %arg7[%c8_107, %c64_108] : memref<36x128xf32, #tpu.memory_space<vmem>>, vector<4x16xf32>
    tpu.vector_store %arg7[%c8_107, %c64_108], %128 {strides = array<i32>} : memref<36x128xf32, #tpu.memory_space<vmem>>, vector<4x16xf32>,
    %c0_i32_109 = arith.constant 0 : i32
    %130 = arith.addi %3, %c0_i32_109 : i32
    %c5_i32_110 = arith.constant 5 : i32
    %131 = arith.addi %130, %c5_i32_110 : i32
    %c0_111 = arith.constant 0 : index
    %132 = arith.index_cast %131 : i32 to index
    %c4_112 = arith.constant 4 : index
    %133 = vector.load %arg6[%c0_111, %132, %c4_112] : memref<4x20x20xf32, #tpu.memory_space<vmem>>, vector<4x1x16xf32>
    %134 = vector.shape_cast %133 : vector<4x1x16xf32> to vector<4x16xf32>
    %c8_113 = arith.constant 8 : index
    %c80_114 = arith.constant 80 : index
    %135 = vector.load %arg7[%c8_113, %c80_114] : memref<36x128xf32, #tpu.memory_space<vmem>>, vector<4x16xf32>
    tpu.vector_store %arg7[%c8_113, %c80_114], %134 {strides = array<i32>} : memref<36x128xf32, #tpu.memory_space<vmem>>, vector<4x16xf32>,
    %c0_i32_115 = arith.constant 0 : i32
    %136 = arith.addi %3, %c0_i32_115 : i32
    %c6_i32_116 = arith.constant 6 : i32
    %137 = arith.addi %136, %c6_i32_116 : i32
    %c0_117 = arith.constant 0 : index
    %138 = arith.index_cast %137 : i32 to index
    %c4_118 = arith.constant 4 : index
    %139 = vector.load %arg6[%c0_117, %138, %c4_118] : memref<4x20x20xf32, #tpu.memory_space<vmem>>, vector<4x1x16xf32>
    %140 = vector.shape_cast %139 : vector<4x1x16xf32> to vector<4x16xf32>
    %c8_119 = arith.constant 8 : index
    %c96_120 = arith.constant 96 : index
    %141 = vector.load %arg7[%c8_119, %c96_120] : memref<36x128xf32, #tpu.memory_space<vmem>>, vector<4x16xf32>
    tpu.vector_store %arg7[%c8_119, %c96_120], %140 {strides = array<i32>} : memref<36x128xf32, #tpu.memory_space<vmem>>, vector<4x16xf32>,
    %c0_i32_121 = arith.constant 0 : i32
    %142 = arith.addi %3, %c0_i32_121 : i32
    %c7_i32_122 = arith.constant 7 : i32
    %143 = arith.addi %142, %c7_i32_122 : i32
    %c0_123 = arith.constant 0 : index
    %144 = arith.index_cast %143 : i32 to index
    %c4_124 = arith.constant 4 : index
    %145 = vector.load %arg6[%c0_123, %144, %c4_124] : memref<4x20x20xf32, #tpu.memory_space<vmem>>, vector<4x1x16xf32>
    %146 = vector.shape_cast %145 : vector<4x1x16xf32> to vector<4x16xf32>
    %c8_125 = arith.constant 8 : index
    %c112_126 = arith.constant 112 : index
    %147 = vector.load %arg7[%c8_125, %c112_126] : memref<36x128xf32, #tpu.memory_space<vmem>>, vector<4x16xf32>
    tpu.vector_store %arg7[%c8_125, %c112_126], %146 {strides = array<i32>} : memref<36x128xf32, #tpu.memory_space<vmem>>, vector<4x16xf32>,
    %c2_i32_127 = arith.constant 2 : i32
    %148 = arith.addi %3, %c2_i32_127 : i32
    %c0_i32_128 = arith.constant 0 : i32
    %149 = arith.addi %148, %c0_i32_128 : i32
    %c0_129 = arith.constant 0 : index
    %150 = arith.index_cast %149 : i32 to index
    %c0_130 = arith.constant 0 : index
    %151 = vector.load %arg6[%c0_129, %150, %c0_130] : memref<4x20x20xf32, #tpu.memory_space<vmem>>, vector<4x1x16xf32>
    %152 = vector.shape_cast %151 : vector<4x1x16xf32> to vector<4x16xf32>
    %c12 = arith.constant 12 : index
    %c0_131 = arith.constant 0 : index
    %153 = vector.load %arg7[%c12, %c0_131] : memref<36x128xf32, #tpu.memory_space<vmem>>, vector<4x16xf32>
    tpu.vector_store %arg7[%c12, %c0_131], %152 {strides = array<i32>} : memref<36x128xf32, #tpu.memory_space<vmem>>, vector<4x16xf32>,
    %c2_i32_132 = arith.constant 2 : i32
    %154 = arith.addi %3, %c2_i32_132 : i32
    %c1_i32_133 = arith.constant 1 : i32
    %155 = arith.addi %154, %c1_i32_133 : i32
    %c0_134 = arith.constant 0 : index
    %156 = arith.index_cast %155 : i32 to index
    %c0_135 = arith.constant 0 : index
    %157 = vector.load %arg6[%c0_134, %156, %c0_135] : memref<4x20x20xf32, #tpu.memory_space<vmem>>, vector<4x1x16xf32>
    %158 = vector.shape_cast %157 : vector<4x1x16xf32> to vector<4x16xf32>
    %c12_136 = arith.constant 12 : index
    %c16_137 = arith.constant 16 : index
    %159 = vector.load %arg7[%c12_136, %c16_137] : memref<36x128xf32, #tpu.memory_space<vmem>>, vector<4x16xf32>
    tpu.vector_store %arg7[%c12_136, %c16_137], %158 {strides = array<i32>} : memref<36x128xf32, #tpu.memory_space<vmem>>, vector<4x16xf32>,
    %c2_i32_138 = arith.constant 2 : i32
    %160 = arith.addi %3, %c2_i32_138 : i32
    %c2_i32_139 = arith.constant 2 : i32
    %161 = arith.addi %160, %c2_i32_139 : i32
    %c0_140 = arith.constant 0 : index
    %162 = arith.index_cast %161 : i32 to index
    %c0_141 = arith.constant 0 : index
    %163 = vector.load %arg6[%c0_140, %162, %c0_141] : memref<4x20x20xf32, #tpu.memory_space<vmem>>, vector<4x1x16xf32>
    %164 = vector.shape_cast %163 : vector<4x1x16xf32> to vector<4x16xf32>
    %c12_142 = arith.constant 12 : index
    %c32_143 = arith.constant 32 : index
    %165 = vector.load %arg7[%c12_142, %c32_143] : memref<36x128xf32, #tpu.memory_space<vmem>>, vector<4x16xf32>
    tpu.vector_store %arg7[%c12_142, %c32_143], %164 {strides = array<i32>} : memref<36x128xf32, #tpu.memory_space<vmem>>, vector<4x16xf32>,
    %c2_i32_144 = arith.constant 2 : i32
    %166 = arith.addi %3, %c2_i32_144 : i32
    %c3_i32_145 = arith.constant 3 : i32
    %167 = arith.addi %166, %c3_i32_145 : i32
    %c0_146 = arith.constant 0 : index
    %168 = arith.index_cast %167 : i32 to index
    %c0_147 = arith.constant 0 : index
    %169 = vector.load %arg6[%c0_146, %168, %c0_147] : memref<4x20x20xf32, #tpu.memory_space<vmem>>, vector<4x1x16xf32>
    %170 = vector.shape_cast %169 : vector<4x1x16xf32> to vector<4x16xf32>
    %c12_148 = arith.constant 12 : index
    %c48_149 = arith.constant 48 : index
    %171 = vector.load %arg7[%c12_148, %c48_149] : memref<36x128xf32, #tpu.memory_space<vmem>>, vector<4x16xf32>
    tpu.vector_store %arg7[%c12_148, %c48_149], %170 {strides = array<i32>} : memref<36x128xf32, #tpu.memory_space<vmem>>, vector<4x16xf32>,
    %c2_i32_150 = arith.constant 2 : i32
    %172 = arith.addi %3, %c2_i32_150 : i32
    %c4_i32_151 = arith.constant 4 : i32
    %173 = arith.addi %172, %c4_i32_151 : i32
    %c0_152 = arith.constant 0 : index
    %174 = arith.index_cast %173 : i32 to index
    %c0_153 = arith.constant 0 : index
    %175 = vector.load %arg6[%c0_152, %174, %c0_153] : memref<4x20x20xf32, #tpu.memory_space<vmem>>, vector<4x1x16xf32>
    %176 = vector.shape_cast %175 : vector<4x1x16xf32> to vector<4x16xf32>
    %c12_154 = arith.constant 12 : index
    %c64_155 = arith.constant 64 : index
    %177 = vector.load %arg7[%c12_154, %c64_155] : memref<36x128xf32, #tpu.memory_space<vmem>>, vector<4x16xf32>
    tpu.vector_store %arg7[%c12_154, %c64_155], %176 {strides = array<i32>} : memref<36x128xf32, #tpu.memory_space<vmem>>, vector<4x16xf32>,
    %c2_i32_156 = arith.constant 2 : i32
    %178 = arith.addi %3, %c2_i32_156 : i32
    %c5_i32_157 = arith.constant 5 : i32
    %179 = arith.addi %178, %c5_i32_157 : i32
    %c0_158 = arith.constant 0 : index
    %180 = arith.index_cast %179 : i32 to index
    %c0_159 = arith.constant 0 : index
    %181 = vector.load %arg6[%c0_158, %180, %c0_159] : memref<4x20x20xf32, #tpu.memory_space<vmem>>, vector<4x1x16xf32>
    %182 = vector.shape_cast %181 : vector<4x1x16xf32> to vector<4x16xf32>
    %c12_160 = arith.constant 12 : index
    %c80_161 = arith.constant 80 : index
    %183 = vector.load %arg7[%c12_160, %c80_161] : memref<36x128xf32, #tpu.memory_space<vmem>>, vector<4x16xf32>
    tpu.vector_store %arg7[%c12_160, %c80_161], %182 {strides = array<i32>} : memref<36x128xf32, #tpu.memory_space<vmem>>, vector<4x16xf32>,
    %c2_i32_162 = arith.constant 2 : i32
    %184 = arith.addi %3, %c2_i32_162 : i32
    %c6_i32_163 = arith.constant 6 : i32
    %185 = arith.addi %184, %c6_i32_163 : i32
    %c0_164 = arith.constant 0 : index
    %186 = arith.index_cast %185 : i32 to index
    %c0_165 = arith.constant 0 : index
    %187 = vector.load %arg6[%c0_164, %186, %c0_165] : memref<4x20x20xf32, #tpu.memory_space<vmem>>, vector<4x1x16xf32>
    %188 = vector.shape_cast %187 : vector<4x1x16xf32> to vector<4x16xf32>
    %c12_166 = arith.constant 12 : index
    %c96_167 = arith.constant 96 : index
    %189 = vector.load %arg7[%c12_166, %c96_167] : memref<36x128xf32, #tpu.memory_space<vmem>>, vector<4x16xf32>
    tpu.vector_store %arg7[%c12_166, %c96_167], %188 {strides = array<i32>} : memref<36x128xf32, #tpu.memory_space<vmem>>, vector<4x16xf32>,
    %c2_i32_168 = arith.constant 2 : i32
    %190 = arith.addi %3, %c2_i32_168 : i32
    %c7_i32_169 = arith.constant 7 : i32
    %191 = arith.addi %190, %c7_i32_169 : i32
    %c0_170 = arith.constant 0 : index
    %192 = arith.index_cast %191 : i32 to index
    %c0_171 = arith.constant 0 : index
    %193 = vector.load %arg6[%c0_170, %192, %c0_171] : memref<4x20x20xf32, #tpu.memory_space<vmem>>, vector<4x1x16xf32>
    %194 = vector.shape_cast %193 : vector<4x1x16xf32> to vector<4x16xf32>
    %c12_172 = arith.constant 12 : index
    %c112_173 = arith.constant 112 : index
    %195 = vector.load %arg7[%c12_172, %c112_173] : memref<36x128xf32, #tpu.memory_space<vmem>>, vector<4x16xf32>
    tpu.vector_store %arg7[%c12_172, %c112_173], %194 {strides = array<i32>} : memref<36x128xf32, #tpu.memory_space<vmem>>, vector<4x16xf32>,
    %c2_i32_174 = arith.constant 2 : i32
    %196 = arith.addi %3, %c2_i32_174 : i32
    %c0_i32_175 = arith.constant 0 : i32
    %197 = arith.addi %196, %c0_i32_175 : i32
    %c0_176 = arith.constant 0 : index
    %198 = arith.index_cast %197 : i32 to index
    %c2_177 = arith.constant 2 : index
    %199 = vector.load %arg6[%c0_176, %198, %c2_177] : memref<4x20x20xf32, #tpu.memory_space<vmem>>, vector<4x1x16xf32>
    %200 = vector.shape_cast %199 : vector<4x1x16xf32> to vector<4x16xf32>
    %c16_178 = arith.constant 16 : index
    %c0_179 = arith.constant 0 : index
    %201 = vector.load %arg7[%c16_178, %c0_179] : memref<36x128xf32, #tpu.memory_space<vmem>>, vector<4x16xf32>
    tpu.vector_store %arg7[%c16_178, %c0_179], %200 {strides = array<i32>} : memref<36x128xf32, #tpu.memory_space<vmem>>, vector<4x16xf32>,
    %c2_i32_180 = arith.constant 2 : i32
    %202 = arith.addi %3, %c2_i32_180 : i32
    %c1_i32_181 = arith.constant 1 : i32
    %203 = arith.addi %202, %c1_i32_181 : i32
    %c0_182 = arith.constant 0 : index
    %204 = arith.index_cast %203 : i32 to index
    %c2_183 = arith.constant 2 : index
    %205 = vector.load %arg6[%c0_182, %204, %c2_183] : memref<4x20x20xf32, #tpu.memory_space<vmem>>, vector<4x1x16xf32>
    %206 = vector.shape_cast %205 : vector<4x1x16xf32> to vector<4x16xf32>
    %c16_184 = arith.constant 16 : index
    %c16_185 = arith.constant 16 : index
    %207 = vector.load %arg7[%c16_184, %c16_185] : memref<36x128xf32, #tpu.memory_space<vmem>>, vector<4x16xf32>
    tpu.vector_store %arg7[%c16_184, %c16_185], %206 {strides = array<i32>} : memref<36x128xf32, #tpu.memory_space<vmem>>, vector<4x16xf32>,
    %c2_i32_186 = arith.constant 2 : i32
    %208 = arith.addi %3, %c2_i32_186 : i32
    %c2_i32_187 = arith.constant 2 : i32
    %209 = arith.addi %208, %c2_i32_187 : i32
    %c0_188 = arith.constant 0 : index
    %210 = arith.index_cast %209 : i32 to index
    %c2_189 = arith.constant 2 : index
    %211 = vector.load %arg6[%c0_188, %210, %c2_189] : memref<4x20x20xf32, #tpu.memory_space<vmem>>, vector<4x1x16xf32>
    %212 = vector.shape_cast %211 : vector<4x1x16xf32> to vector<4x16xf32>
    %c16_190 = arith.constant 16 : index
    %c32_191 = arith.constant 32 : index
    %213 = vector.load %arg7[%c16_190, %c32_191] : memref<36x128xf32, #tpu.memory_space<vmem>>, vector<4x16xf32>
    tpu.vector_store %arg7[%c16_190, %c32_191], %212 {strides = array<i32>} : memref<36x128xf32, #tpu.memory_space<vmem>>, vector<4x16xf32>,
    %c2_i32_192 = arith.constant 2 : i32
    %214 = arith.addi %3, %c2_i32_192 : i32
    %c3_i32_193 = arith.constant 3 : i32
    %215 = arith.addi %214, %c3_i32_193 : i32
    %c0_194 = arith.constant 0 : index
    %216 = arith.index_cast %215 : i32 to index
    %c2_195 = arith.constant 2 : index
    %217 = vector.load %arg6[%c0_194, %216, %c2_195] : memref<4x20x20xf32, #tpu.memory_space<vmem>>, vector<4x1x16xf32>
    %218 = vector.shape_cast %217 : vector<4x1x16xf32> to vector<4x16xf32>
    %c16_196 = arith.constant 16 : index
    %c48_197 = arith.constant 48 : index
    %219 = vector.load %arg7[%c16_196, %c48_197] : memref<36x128xf32, #tpu.memory_space<vmem>>, vector<4x16xf32>
    tpu.vector_store %arg7[%c16_196, %c48_197], %218 {strides = array<i32>} : memref<36x128xf32, #tpu.memory_space<vmem>>, vector<4x16xf32>,
    %c2_i32_198 = arith.constant 2 : i32
    %220 = arith.addi %3, %c2_i32_198 : i32
    %c4_i32_199 = arith.constant 4 : i32
    %221 = arith.addi %220, %c4_i32_199 : i32
    %c0_200 = arith.constant 0 : index
    %222 = arith.index_cast %221 : i32 to index
    %c2_201 = arith.constant 2 : index
    %223 = vector.load %arg6[%c0_200, %222, %c2_201] : memref<4x20x20xf32, #tpu.memory_space<vmem>>, vector<4x1x16xf32>
    %224 = vector.shape_cast %223 : vector<4x1x16xf32> to vector<4x16xf32>
    %c16_202 = arith.constant 16 : index
    %c64_203 = arith.constant 64 : index
    %225 = vector.load %arg7[%c16_202, %c64_203] : memref<36x128xf32, #tpu.memory_space<vmem>>, vector<4x16xf32>
    tpu.vector_store %arg7[%c16_202, %c64_203], %224 {strides = array<i32>} : memref<36x128xf32, #tpu.memory_space<vmem>>, vector<4x16xf32>,
    %c2_i32_204 = arith.constant 2 : i32
    %226 = arith.addi %3, %c2_i32_204 : i32
    %c5_i32_205 = arith.constant 5 : i32
    %227 = arith.addi %226, %c5_i32_205 : i32
    %c0_206 = arith.constant 0 : index
    %228 = arith.index_cast %227 : i32 to index
    %c2_207 = arith.constant 2 : index
    %229 = vector.load %arg6[%c0_206, %228, %c2_207] : memref<4x20x20xf32, #tpu.memory_space<vmem>>, vector<4x1x16xf32>
    %230 = vector.shape_cast %229 : vector<4x1x16xf32> to vector<4x16xf32>
    %c16_208 = arith.constant 16 : index
    %c80_209 = arith.constant 80 : index
    %231 = vector.load %arg7[%c16_208, %c80_209] : memref<36x128xf32, #tpu.memory_space<vmem>>, vector<4x16xf32>
    tpu.vector_store %arg7[%c16_208, %c80_209], %230 {strides = array<i32>} : memref<36x128xf32, #tpu.memory_space<vmem>>, vector<4x16xf32>,
    %c2_i32_210 = arith.constant 2 : i32
    %232 = arith.addi %3, %c2_i32_210 : i32
    %c6_i32_211 = arith.constant 6 : i32
    %233 = arith.addi %232, %c6_i32_211 : i32
    %c0_212 = arith.constant 0 : index
    %234 = arith.index_cast %233 : i32 to index
    %c2_213 = arith.constant 2 : index
    %235 = vector.load %arg6[%c0_212, %234, %c2_213] : memref<4x20x20xf32, #tpu.memory_space<vmem>>, vector<4x1x16xf32>
    %236 = vector.shape_cast %235 : vector<4x1x16xf32> to vector<4x16xf32>
    %c16_214 = arith.constant 16 : index
    %c96_215 = arith.constant 96 : index
    %237 = vector.load %arg7[%c16_214, %c96_215] : memref<36x128xf32, #tpu.memory_space<vmem>>, vector<4x16xf32>
    tpu.vector_store %arg7[%c16_214, %c96_215], %236 {strides = array<i32>} : memref<36x128xf32, #tpu.memory_space<vmem>>, vector<4x16xf32>,
    %c2_i32_216 = arith.constant 2 : i32
    %238 = arith.addi %3, %c2_i32_216 : i32
    %c7_i32_217 = arith.constant 7 : i32
    %239 = arith.addi %238, %c7_i32_217 : i32
    %c0_218 = arith.constant 0 : index
    %240 = arith.index_cast %239 : i32 to index
    %c2_219 = arith.constant 2 : index
    %241 = vector.load %arg6[%c0_218, %240, %c2_219] : memref<4x20x20xf32, #tpu.memory_space<vmem>>, vector<4x1x16xf32>
    %242 = vector.shape_cast %241 : vector<4x1x16xf32> to vector<4x16xf32>
    %c16_220 = arith.constant 16 : index
    %c112_221 = arith.constant 112 : index
    %243 = vector.load %arg7[%c16_220, %c112_221] : memref<36x128xf32, #tpu.memory_space<vmem>>, vector<4x16xf32>
    tpu.vector_store %arg7[%c16_220, %c112_221], %242 {strides = array<i32>} : memref<36x128xf32, #tpu.memory_space<vmem>>, vector<4x16xf32>,
    %c2_i32_222 = arith.constant 2 : i32
    %244 = arith.addi %3, %c2_i32_222 : i32
    %c0_i32_223 = arith.constant 0 : i32
    %245 = arith.addi %244, %c0_i32_223 : i32
    %c0_224 = arith.constant 0 : index
    %246 = arith.index_cast %245 : i32 to index
    %c4_225 = arith.constant 4 : index
    %247 = vector.load %arg6[%c0_224, %246, %c4_225] : memref<4x20x20xf32, #tpu.memory_space<vmem>>, vector<4x1x16xf32>
    %248 = vector.shape_cast %247 : vector<4x1x16xf32> to vector<4x16xf32>
    %c20 = arith.constant 20 : index
    %c0_226 = arith.constant 0 : index
    %249 = vector.load %arg7[%c20, %c0_226] : memref<36x128xf32, #tpu.memory_space<vmem>>, vector<4x16xf32>
    tpu.vector_store %arg7[%c20, %c0_226], %248 {strides = array<i32>} : memref<36x128xf32, #tpu.memory_space<vmem>>, vector<4x16xf32>,
    %c2_i32_227 = arith.constant 2 : i32
    %250 = arith.addi %3, %c2_i32_227 : i32
    %c1_i32_228 = arith.constant 1 : i32
    %251 = arith.addi %250, %c1_i32_228 : i32
    %c0_229 = arith.constant 0 : index
    %252 = arith.index_cast %251 : i32 to index
    %c4_230 = arith.constant 4 : index
    %253 = vector.load %arg6[%c0_229, %252, %c4_230] : memref<4x20x20xf32, #tpu.memory_space<vmem>>, vector<4x1x16xf32>
    %254 = vector.shape_cast %253 : vector<4x1x16xf32> to vector<4x16xf32>
    %c20_231 = arith.constant 20 : index
    %c16_232 = arith.constant 16 : index
    %255 = vector.load %arg7[%c20_231, %c16_232] : memref<36x128xf32, #tpu.memory_space<vmem>>, vector<4x16xf32>
    tpu.vector_store %arg7[%c20_231, %c16_232], %254 {strides = array<i32>} : memref<36x128xf32, #tpu.memory_space<vmem>>, vector<4x16xf32>,
    %c2_i32_233 = arith.constant 2 : i32
    %256 = arith.addi %3, %c2_i32_233 : i32
    %c2_i32_234 = arith.constant 2 : i32
    %257 = arith.addi %256, %c2_i32_234 : i32
    %c0_235 = arith.constant 0 : index
    %258 = arith.index_cast %257 : i32 to index
    %c4_236 = arith.constant 4 : index
    %259 = vector.load %arg6[%c0_235, %258, %c4_236] : memref<4x20x20xf32, #tpu.memory_space<vmem>>, vector<4x1x16xf32>
    %260 = vector.shape_cast %259 : vector<4x1x16xf32> to vector<4x16xf32>
    %c20_237 = arith.constant 20 : index
    %c32_238 = arith.constant 32 : index
    %261 = vector.load %arg7[%c20_237, %c32_238] : memref<36x128xf32, #tpu.memory_space<vmem>>, vector<4x16xf32>
    tpu.vector_store %arg7[%c20_237, %c32_238], %260 {strides = array<i32>} : memref<36x128xf32, #tpu.memory_space<vmem>>, vector<4x16xf32>,
    %c2_i32_239 = arith.constant 2 : i32
    %262 = arith.addi %3, %c2_i32_239 : i32
    %c3_i32_240 = arith.constant 3 : i32
    %263 = arith.addi %262, %c3_i32_240 : i32
    %c0_241 = arith.constant 0 : index
    %264 = arith.index_cast %263 : i32 to index
    %c4_242 = arith.constant 4 : index
    %265 = vector.load %arg6[%c0_241, %264, %c4_242] : memref<4x20x20xf32, #tpu.memory_space<vmem>>, vector<4x1x16xf32>
    %266 = vector.shape_cast %265 : vector<4x1x16xf32> to vector<4x16xf32>
    %c20_243 = arith.constant 20 : index
    %c48_244 = arith.constant 48 : index
    %267 = vector.load %arg7[%c20_243, %c48_244] : memref<36x128xf32, #tpu.memory_space<vmem>>, vector<4x16xf32>
    tpu.vector_store %arg7[%c20_243, %c48_244], %266 {strides = array<i32>} : memref<36x128xf32, #tpu.memory_space<vmem>>, vector<4x16xf32>,
    %c2_i32_245 = arith.constant 2 : i32
    %268 = arith.addi %3, %c2_i32_245 : i32
    %c4_i32_246 = arith.constant 4 : i32
    %269 = arith.addi %268, %c4_i32_246 : i32
    %c0_247 = arith.constant 0 : index
    %270 = arith.index_cast %269 : i32 to index
    %c4_248 = arith.constant 4 : index
    %271 = vector.load %arg6[%c0_247, %270, %c4_248] : memref<4x20x20xf32, #tpu.memory_space<vmem>>, vector<4x1x16xf32>
    %272 = vector.shape_cast %271 : vector<4x1x16xf32> to vector<4x16xf32>
    %c20_249 = arith.constant 20 : index
    %c64_250 = arith.constant 64 : index
    %273 = vector.load %arg7[%c20_249, %c64_250] : memref<36x128xf32, #tpu.memory_space<vmem>>, vector<4x16xf32>
    tpu.vector_store %arg7[%c20_249, %c64_250], %272 {strides = array<i32>} : memref<36x128xf32, #tpu.memory_space<vmem>>, vector<4x16xf32>,
    %c2_i32_251 = arith.constant 2 : i32
    %274 = arith.addi %3, %c2_i32_251 : i32
    %c5_i32_252 = arith.constant 5 : i32
    %275 = arith.addi %274, %c5_i32_252 : i32
    %c0_253 = arith.constant 0 : index
    %276 = arith.index_cast %275 : i32 to index
    %c4_254 = arith.constant 4 : index
    %277 = vector.load %arg6[%c0_253, %276, %c4_254] : memref<4x20x20xf32, #tpu.memory_space<vmem>>, vector<4x1x16xf32>
    %278 = vector.shape_cast %277 : vector<4x1x16xf32> to vector<4x16xf32>
    %c20_255 = arith.constant 20 : index
    %c80_256 = arith.constant 80 : index
    %279 = vector.load %arg7[%c20_255, %c80_256] : memref<36x128xf32, #tpu.memory_space<vmem>>, vector<4x16xf32>
    tpu.vector_store %arg7[%c20_255, %c80_256], %278 {strides = array<i32>} : memref<36x128xf32, #tpu.memory_space<vmem>>, vector<4x16xf32>,
    %c2_i32_257 = arith.constant 2 : i32
    %280 = arith.addi %3, %c2_i32_257 : i32
    %c6_i32_258 = arith.constant 6 : i32
    %281 = arith.addi %280, %c6_i32_258 : i32
    %c0_259 = arith.constant 0 : index
    %282 = arith.index_cast %281 : i32 to index
    %c4_260 = arith.constant 4 : index
    %283 = vector.load %arg6[%c0_259, %282, %c4_260] : memref<4x20x20xf32, #tpu.memory_space<vmem>>, vector<4x1x16xf32>
    %284 = vector.shape_cast %283 : vector<4x1x16xf32> to vector<4x16xf32>
    %c20_261 = arith.constant 20 : index
    %c96_262 = arith.constant 96 : index
    %285 = vector.load %arg7[%c20_261, %c96_262] : memref<36x128xf32, #tpu.memory_space<vmem>>, vector<4x16xf32>
    tpu.vector_store %arg7[%c20_261, %c96_262], %284 {strides = array<i32>} : memref<36x128xf32, #tpu.memory_space<vmem>>, vector<4x16xf32>,
    %c2_i32_263 = arith.constant 2 : i32
    %286 = arith.addi %3, %c2_i32_263 : i32
    %c7_i32_264 = arith.constant 7 : i32
    %287 = arith.addi %286, %c7_i32_264 : i32
    %c0_265 = arith.constant 0 : index
    %288 = arith.index_cast %287 : i32 to index
    %c4_266 = arith.constant 4 : index
    %289 = vector.load %arg6[%c0_265, %288, %c4_266] : memref<4x20x20xf32, #tpu.memory_space<vmem>>, vector<4x1x16xf32>
    %290 = vector.shape_cast %289 : vector<4x1x16xf32> to vector<4x16xf32>
    %c20_267 = arith.constant 20 : index
    %c112_268 = arith.constant 112 : index
    %291 = vector.load %arg7[%c20_267, %c112_268] : memref<36x128xf32, #tpu.memory_space<vmem>>, vector<4x16xf32>
    tpu.vector_store %arg7[%c20_267, %c112_268], %290 {strides = array<i32>} : memref<36x128xf32, #tpu.memory_space<vmem>>, vector<4x16xf32>,
    %c4_i32_269 = arith.constant 4 : i32
    %292 = arith.addi %3, %c4_i32_269 : i32
    %c0_i32_270 = arith.constant 0 : i32
    %293 = arith.addi %292, %c0_i32_270 : i32
    %c0_271 = arith.constant 0 : index
    %294 = arith.index_cast %293 : i32 to index
    %c0_272 = arith.constant 0 : index
    %295 = vector.load %arg6[%c0_271, %294, %c0_272] : memref<4x20x20xf32, #tpu.memory_space<vmem>>, vector<4x1x16xf32>
    %296 = vector.shape_cast %295 : vector<4x1x16xf32> to vector<4x16xf32>
    %c24 = arith.constant 24 : index
    %c0_273 = arith.constant 0 : index
    %297 = vector.load %arg7[%c24, %c0_273] : memref<36x128xf32, #tpu.memory_space<vmem>>, vector<4x16xf32>
    tpu.vector_store %arg7[%c24, %c0_273], %296 {strides = array<i32>} : memref<36x128xf32, #tpu.memory_space<vmem>>, vector<4x16xf32>,
    %c4_i32_274 = arith.constant 4 : i32
    %298 = arith.addi %3, %c4_i32_274 : i32
    %c1_i32_275 = arith.constant 1 : i32
    %299 = arith.addi %298, %c1_i32_275 : i32
    %c0_276 = arith.constant 0 : index
    %300 = arith.index_cast %299 : i32 to index
    %c0_277 = arith.constant 0 : index
    %301 = vector.load %arg6[%c0_276, %300, %c0_277] : memref<4x20x20xf32, #tpu.memory_space<vmem>>, vector<4x1x16xf32>
    %302 = vector.shape_cast %301 : vector<4x1x16xf32> to vector<4x16xf32>
    %c24_278 = arith.constant 24 : index
    %c16_279 = arith.constant 16 : index
    %303 = vector.load %arg7[%c24_278, %c16_279] : memref<36x128xf32, #tpu.memory_space<vmem>>, vector<4x16xf32>
    tpu.vector_store %arg7[%c24_278, %c16_279], %302 {strides = array<i32>} : memref<36x128xf32, #tpu.memory_space<vmem>>, vector<4x16xf32>,
    %c4_i32_280 = arith.constant 4 : i32
    %304 = arith.addi %3, %c4_i32_280 : i32
    %c2_i32_281 = arith.constant 2 : i32
    %305 = arith.addi %304, %c2_i32_281 : i32
    %c0_282 = arith.constant 0 : index
    %306 = arith.index_cast %305 : i32 to index
    %c0_283 = arith.constant 0 : index
    %307 = vector.load %arg6[%c0_282, %306, %c0_283] : memref<4x20x20xf32, #tpu.memory_space<vmem>>, vector<4x1x16xf32>
    %308 = vector.shape_cast %307 : vector<4x1x16xf32> to vector<4x16xf32>
    %c24_284 = arith.constant 24 : index
    %c32_285 = arith.constant 32 : index
    %309 = vector.load %arg7[%c24_284, %c32_285] : memref<36x128xf32, #tpu.memory_space<vmem>>, vector<4x16xf32>
    tpu.vector_store %arg7[%c24_284, %c32_285], %308 {strides = array<i32>} : memref<36x128xf32, #tpu.memory_space<vmem>>, vector<4x16xf32>,
    %c4_i32_286 = arith.constant 4 : i32
    %310 = arith.addi %3, %c4_i32_286 : i32
    %c3_i32_287 = arith.constant 3 : i32
    %311 = arith.addi %310, %c3_i32_287 : i32
    %c0_288 = arith.constant 0 : index
    %312 = arith.index_cast %311 : i32 to index
    %c0_289 = arith.constant 0 : index
    %313 = vector.load %arg6[%c0_288, %312, %c0_289] : memref<4x20x20xf32, #tpu.memory_space<vmem>>, vector<4x1x16xf32>
    %314 = vector.shape_cast %313 : vector<4x1x16xf32> to vector<4x16xf32>
    %c24_290 = arith.constant 24 : index
    %c48_291 = arith.constant 48 : index
    %315 = vector.load %arg7[%c24_290, %c48_291] : memref<36x128xf32, #tpu.memory_space<vmem>>, vector<4x16xf32>
    tpu.vector_store %arg7[%c24_290, %c48_291], %314 {strides = array<i32>} : memref<36x128xf32, #tpu.memory_space<vmem>>, vector<4x16xf32>,
    %c4_i32_292 = arith.constant 4 : i32
    %316 = arith.addi %3, %c4_i32_292 : i32
    %c4_i32_293 = arith.constant 4 : i32
    %317 = arith.addi %316, %c4_i32_293 : i32
    %c0_294 = arith.constant 0 : index
    %318 = arith.index_cast %317 : i32 to index
    %c0_295 = arith.constant 0 : index
    %319 = vector.load %arg6[%c0_294, %318, %c0_295] : memref<4x20x20xf32, #tpu.memory_space<vmem>>, vector<4x1x16xf32>
    %320 = vector.shape_cast %319 : vector<4x1x16xf32> to vector<4x16xf32>
    %c24_296 = arith.constant 24 : index
    %c64_297 = arith.constant 64 : index
    %321 = vector.load %arg7[%c24_296, %c64_297] : memref<36x128xf32, #tpu.memory_space<vmem>>, vector<4x16xf32>
    tpu.vector_store %arg7[%c24_296, %c64_297], %320 {strides = array<i32>} : memref<36x128xf32, #tpu.memory_space<vmem>>, vector<4x16xf32>,
    %c4_i32_298 = arith.constant 4 : i32
    %322 = arith.addi %3, %c4_i32_298 : i32
    %c5_i32_299 = arith.constant 5 : i32
    %323 = arith.addi %322, %c5_i32_299 : i32
    %c0_300 = arith.constant 0 : index
    %324 = arith.index_cast %323 : i32 to index
    %c0_301 = arith.constant 0 : index
    %325 = vector.load %arg6[%c0_300, %324, %c0_301] : memref<4x20x20xf32, #tpu.memory_space<vmem>>, vector<4x1x16xf32>
    %326 = vector.shape_cast %325 : vector<4x1x16xf32> to vector<4x16xf32>
    %c24_302 = arith.constant 24 : index
    %c80_303 = arith.constant 80 : index
    %327 = vector.load %arg7[%c24_302, %c80_303] : memref<36x128xf32, #tpu.memory_space<vmem>>, vector<4x16xf32>
    tpu.vector_store %arg7[%c24_302, %c80_303], %326 {strides = array<i32>} : memref<36x128xf32, #tpu.memory_space<vmem>>, vector<4x16xf32>,
    %c4_i32_304 = arith.constant 4 : i32
    %328 = arith.addi %3, %c4_i32_304 : i32
    %c6_i32_305 = arith.constant 6 : i32
    %329 = arith.addi %328, %c6_i32_305 : i32
    %c0_306 = arith.constant 0 : index
    %330 = arith.index_cast %329 : i32 to index
    %c0_307 = arith.constant 0 : index
    %331 = vector.load %arg6[%c0_306, %330, %c0_307] : memref<4x20x20xf32, #tpu.memory_space<vmem>>, vector<4x1x16xf32>
    %332 = vector.shape_cast %331 : vector<4x1x16xf32> to vector<4x16xf32>
    %c24_308 = arith.constant 24 : index
    %c96_309 = arith.constant 96 : index
    %333 = vector.load %arg7[%c24_308, %c96_309] : memref<36x128xf32, #tpu.memory_space<vmem>>, vector<4x16xf32>
    tpu.vector_store %arg7[%c24_308, %c96_309], %332 {strides = array<i32>} : memref<36x128xf32, #tpu.memory_space<vmem>>, vector<4x16xf32>,
    %c4_i32_310 = arith.constant 4 : i32
    %334 = arith.addi %3, %c4_i32_310 : i32
    %c7_i32_311 = arith.constant 7 : i32
    %335 = arith.addi %334, %c7_i32_311 : i32
    %c0_312 = arith.constant 0 : index
    %336 = arith.index_cast %335 : i32 to index
    %c0_313 = arith.constant 0 : index
    %337 = vector.load %arg6[%c0_312, %336, %c0_313] : memref<4x20x20xf32, #tpu.memory_space<vmem>>, vector<4x1x16xf32>
    %338 = vector.shape_cast %337 : vector<4x1x16xf32> to vector<4x16xf32>
    %c24_314 = arith.constant 24 : index
    %c112_315 = arith.constant 112 : index
    %339 = vector.load %arg7[%c24_314, %c112_315] : memref<36x128xf32, #tpu.memory_space<vmem>>, vector<4x16xf32>
    tpu.vector_store %arg7[%c24_314, %c112_315], %338 {strides = array<i32>} : memref<36x128xf32, #tpu.memory_space<vmem>>, vector<4x16xf32>,
    %c4_i32_316 = arith.constant 4 : i32
    %340 = arith.addi %3, %c4_i32_316 : i32
    %c0_i32_317 = arith.constant 0 : i32
    %341 = arith.addi %340, %c0_i32_317 : i32
    %c0_318 = arith.constant 0 : index
    %342 = arith.index_cast %341 : i32 to index
    %c2_319 = arith.constant 2 : index
    %343 = vector.load %arg6[%c0_318, %342, %c2_319] : memref<4x20x20xf32, #tpu.memory_space<vmem>>, vector<4x1x16xf32>
    %344 = vector.shape_cast %343 : vector<4x1x16xf32> to vector<4x16xf32>
    %c28 = arith.constant 28 : index
    %c0_320 = arith.constant 0 : index
    %345 = vector.load %arg7[%c28, %c0_320] : memref<36x128xf32, #tpu.memory_space<vmem>>, vector<4x16xf32>
    tpu.vector_store %arg7[%c28, %c0_320], %344 {strides = array<i32>} : memref<36x128xf32, #tpu.memory_space<vmem>>, vector<4x16xf32>,
    %c4_i32_321 = arith.constant 4 : i32
    %346 = arith.addi %3, %c4_i32_321 : i32
    %c1_i32_322 = arith.constant 1 : i32
    %347 = arith.addi %346, %c1_i32_322 : i32
    %c0_323 = arith.constant 0 : index
    %348 = arith.index_cast %347 : i32 to index
    %c2_324 = arith.constant 2 : index
    %349 = vector.load %arg6[%c0_323, %348, %c2_324] : memref<4x20x20xf32, #tpu.memory_space<vmem>>, vector<4x1x16xf32>
    %350 = vector.shape_cast %349 : vector<4x1x16xf32> to vector<4x16xf32>
    %c28_325 = arith.constant 28 : index
    %c16_326 = arith.constant 16 : index
    %351 = vector.load %arg7[%c28_325, %c16_326] : memref<36x128xf32, #tpu.memory_space<vmem>>, vector<4x16xf32>
    tpu.vector_store %arg7[%c28_325, %c16_326], %350 {strides = array<i32>} : memref<36x128xf32, #tpu.memory_space<vmem>>, vector<4x16xf32>,
    %c4_i32_327 = arith.constant 4 : i32
    %352 = arith.addi %3, %c4_i32_327 : i32
    %c2_i32_328 = arith.constant 2 : i32
    %353 = arith.addi %352, %c2_i32_328 : i32
    %c0_329 = arith.constant 0 : index
    %354 = arith.index_cast %353 : i32 to index
    %c2_330 = arith.constant 2 : index
    %355 = vector.load %arg6[%c0_329, %354, %c2_330] : memref<4x20x20xf32, #tpu.memory_space<vmem>>, vector<4x1x16xf32>
    %356 = vector.shape_cast %355 : vector<4x1x16xf32> to vector<4x16xf32>
    %c28_331 = arith.constant 28 : index
    %c32_332 = arith.constant 32 : index
    %357 = vector.load %arg7[%c28_331, %c32_332] : memref<36x128xf32, #tpu.memory_space<vmem>>, vector<4x16xf32>
    tpu.vector_store %arg7[%c28_331, %c32_332], %356 {strides = array<i32>} : memref<36x128xf32, #tpu.memory_space<vmem>>, vector<4x16xf32>,
    %c4_i32_333 = arith.constant 4 : i32
    %358 = arith.addi %3, %c4_i32_333 : i32
    %c3_i32_334 = arith.constant 3 : i32
    %359 = arith.addi %358, %c3_i32_334 : i32
    %c0_335 = arith.constant 0 : index
    %360 = arith.index_cast %359 : i32 to index
    %c2_336 = arith.constant 2 : index
    %361 = vector.load %arg6[%c0_335, %360, %c2_336] : memref<4x20x20xf32, #tpu.memory_space<vmem>>, vector<4x1x16xf32>
    %362 = vector.shape_cast %361 : vector<4x1x16xf32> to vector<4x16xf32>
    %c28_337 = arith.constant 28 : index
    %c48_338 = arith.constant 48 : index
    %363 = vector.load %arg7[%c28_337, %c48_338] : memref<36x128xf32, #tpu.memory_space<vmem>>, vector<4x16xf32>
    tpu.vector_store %arg7[%c28_337, %c48_338], %362 {strides = array<i32>} : memref<36x128xf32, #tpu.memory_space<vmem>>, vector<4x16xf32>,
    %c4_i32_339 = arith.constant 4 : i32
    %364 = arith.addi %3, %c4_i32_339 : i32
    %c4_i32_340 = arith.constant 4 : i32
    %365 = arith.addi %364, %c4_i32_340 : i32
    %c0_341 = arith.constant 0 : index
    %366 = arith.index_cast %365 : i32 to index
    %c2_342 = arith.constant 2 : index
    %367 = vector.load %arg6[%c0_341, %366, %c2_342] : memref<4x20x20xf32, #tpu.memory_space<vmem>>, vector<4x1x16xf32>
    %368 = vector.shape_cast %367 : vector<4x1x16xf32> to vector<4x16xf32>
    %c28_343 = arith.constant 28 : index
    %c64_344 = arith.constant 64 : index
    %369 = vector.load %arg7[%c28_343, %c64_344] : memref<36x128xf32, #tpu.memory_space<vmem>>, vector<4x16xf32>
    tpu.vector_store %arg7[%c28_343, %c64_344], %368 {strides = array<i32>} : memref<36x128xf32, #tpu.memory_space<vmem>>, vector<4x16xf32>,
    %c4_i32_345 = arith.constant 4 : i32
    %370 = arith.addi %3, %c4_i32_345 : i32
    %c5_i32_346 = arith.constant 5 : i32
    %371 = arith.addi %370, %c5_i32_346 : i32
    %c0_347 = arith.constant 0 : index
    %372 = arith.index_cast %371 : i32 to index
    %c2_348 = arith.constant 2 : index
    %373 = vector.load %arg6[%c0_347, %372, %c2_348] : memref<4x20x20xf32, #tpu.memory_space<vmem>>, vector<4x1x16xf32>
    %374 = vector.shape_cast %373 : vector<4x1x16xf32> to vector<4x16xf32>
    %c28_349 = arith.constant 28 : index
    %c80_350 = arith.constant 80 : index
    %375 = vector.load %arg7[%c28_349, %c80_350] : memref<36x128xf32, #tpu.memory_space<vmem>>, vector<4x16xf32>
    tpu.vector_store %arg7[%c28_349, %c80_350], %374 {strides = array<i32>} : memref<36x128xf32, #tpu.memory_space<vmem>>, vector<4x16xf32>,
    %c4_i32_351 = arith.constant 4 : i32
    %376 = arith.addi %3, %c4_i32_351 : i32
    %c6_i32_352 = arith.constant 6 : i32
    %377 = arith.addi %376, %c6_i32_352 : i32
    %c0_353 = arith.constant 0 : index
    %378 = arith.index_cast %377 : i32 to index
    %c2_354 = arith.constant 2 : index
    %379 = vector.load %arg6[%c0_353, %378, %c2_354] : memref<4x20x20xf32, #tpu.memory_space<vmem>>, vector<4x1x16xf32>
    %380 = vector.shape_cast %379 : vector<4x1x16xf32> to vector<4x16xf32>
    %c28_355 = arith.constant 28 : index
    %c96_356 = arith.constant 96 : index
    %381 = vector.load %arg7[%c28_355, %c96_356] : memref<36x128xf32, #tpu.memory_space<vmem>>, vector<4x16xf32>
    tpu.vector_store %arg7[%c28_355, %c96_356], %380 {strides = array<i32>} : memref<36x128xf32, #tpu.memory_space<vmem>>, vector<4x16xf32>,
    %c4_i32_357 = arith.constant 4 : i32
    %382 = arith.addi %3, %c4_i32_357 : i32
    %c7_i32_358 = arith.constant 7 : i32
    %383 = arith.addi %382, %c7_i32_358 : i32
    %c0_359 = arith.constant 0 : index
    %384 = arith.index_cast %383 : i32 to index
    %c2_360 = arith.constant 2 : index
    %385 = vector.load %arg6[%c0_359, %384, %c2_360] : memref<4x20x20xf32, #tpu.memory_space<vmem>>, vector<4x1x16xf32>
    %386 = vector.shape_cast %385 : vector<4x1x16xf32> to vector<4x16xf32>
    %c28_361 = arith.constant 28 : index
    %c112_362 = arith.constant 112 : index
    %387 = vector.load %arg7[%c28_361, %c112_362] : memref<36x128xf32, #tpu.memory_space<vmem>>, vector<4x16xf32>
    tpu.vector_store %arg7[%c28_361, %c112_362], %386 {strides = array<i32>} : memref<36x128xf32, #tpu.memory_space<vmem>>, vector<4x16xf32>,
    %c4_i32_363 = arith.constant 4 : i32
    %388 = arith.addi %3, %c4_i32_363 : i32
    %c0_i32_364 = arith.constant 0 : i32
    %389 = arith.addi %388, %c0_i32_364 : i32
    %c0_365 = arith.constant 0 : index
    %390 = arith.index_cast %389 : i32 to index
    %c4_366 = arith.constant 4 : index
    %391 = vector.load %arg6[%c0_365, %390, %c4_366] : memref<4x20x20xf32, #tpu.memory_space<vmem>>, vector<4x1x16xf32>
    %392 = vector.shape_cast %391 : vector<4x1x16xf32> to vector<4x16xf32>
    %c32_367 = arith.constant 32 : index
    %c0_368 = arith.constant 0 : index
    %393 = vector.load %arg7[%c32_367, %c0_368] : memref<36x128xf32, #tpu.memory_space<vmem>>, vector<4x16xf32>
    tpu.vector_store %arg7[%c32_367, %c0_368], %392 {strides = array<i32>} : memref<36x128xf32, #tpu.memory_space<vmem>>, vector<4x16xf32>,
    %c4_i32_369 = arith.constant 4 : i32
    %394 = arith.addi %3, %c4_i32_369 : i32
    %c1_i32_370 = arith.constant 1 : i32
    %395 = arith.addi %394, %c1_i32_370 : i32
    %c0_371 = arith.constant 0 : index
    %396 = arith.index_cast %395 : i32 to index
    %c4_372 = arith.constant 4 : index
    %397 = vector.load %arg6[%c0_371, %396, %c4_372] : memref<4x20x20xf32, #tpu.memory_space<vmem>>, vector<4x1x16xf32>
    %398 = vector.shape_cast %397 : vector<4x1x16xf32> to vector<4x16xf32>
    %c32_373 = arith.constant 32 : index
    %c16_374 = arith.constant 16 : index
    %399 = vector.load %arg7[%c32_373, %c16_374] : memref<36x128xf32, #tpu.memory_space<vmem>>, vector<4x16xf32>
    tpu.vector_store %arg7[%c32_373, %c16_374], %398 {strides = array<i32>} : memref<36x128xf32, #tpu.memory_space<vmem>>, vector<4x16xf32>,
    %c4_i32_375 = arith.constant 4 : i32
    %400 = arith.addi %3, %c4_i32_375 : i32
    %c2_i32_376 = arith.constant 2 : i32
    %401 = arith.addi %400, %c2_i32_376 : i32
    %c0_377 = arith.constant 0 : index
    %402 = arith.index_cast %401 : i32 to index
    %c4_378 = arith.constant 4 : index
    %403 = vector.load %arg6[%c0_377, %402, %c4_378] : memref<4x20x20xf32, #tpu.memory_space<vmem>>, vector<4x1x16xf32>
    %404 = vector.shape_cast %403 : vector<4x1x16xf32> to vector<4x16xf32>
    %c32_379 = arith.constant 32 : index
    %c32_380 = arith.constant 32 : index
    %405 = vector.load %arg7[%c32_379, %c32_380] : memref<36x128xf32, #tpu.memory_space<vmem>>, vector<4x16xf32>
    tpu.vector_store %arg7[%c32_379, %c32_380], %404 {strides = array<i32>} : memref<36x128xf32, #tpu.memory_space<vmem>>, vector<4x16xf32>,
    %c4_i32_381 = arith.constant 4 : i32
    %406 = arith.addi %3, %c4_i32_381 : i32
    %c3_i32_382 = arith.constant 3 : i32
    %407 = arith.addi %406, %c3_i32_382 : i32
    %c0_383 = arith.constant 0 : index
    %408 = arith.index_cast %407 : i32 to index
    %c4_384 = arith.constant 4 : index
    %409 = vector.load %arg6[%c0_383, %408, %c4_384] : memref<4x20x20xf32, #tpu.memory_space<vmem>>, vector<4x1x16xf32>
    %410 = vector.shape_cast %409 : vector<4x1x16xf32> to vector<4x16xf32>
    %c32_385 = arith.constant 32 : index
    %c48_386 = arith.constant 48 : index
    %411 = vector.load %arg7[%c32_385, %c48_386] : memref<36x128xf32, #tpu.memory_space<vmem>>, vector<4x16xf32>
    tpu.vector_store %arg7[%c32_385, %c48_386], %410 {strides = array<i32>} : memref<36x128xf32, #tpu.memory_space<vmem>>, vector<4x16xf32>,
    %c4_i32_387 = arith.constant 4 : i32
    %412 = arith.addi %3, %c4_i32_387 : i32
    %c4_i32_388 = arith.constant 4 : i32
    %413 = arith.addi %412, %c4_i32_388 : i32
    %c0_389 = arith.constant 0 : index
    %414 = arith.index_cast %413 : i32 to index
    %c4_390 = arith.constant 4 : index
    %415 = vector.load %arg6[%c0_389, %414, %c4_390] : memref<4x20x20xf32, #tpu.memory_space<vmem>>, vector<4x1x16xf32>
    %416 = vector.shape_cast %415 : vector<4x1x16xf32> to vector<4x16xf32>
    %c32_391 = arith.constant 32 : index
    %c64_392 = arith.constant 64 : index
    %417 = vector.load %arg7[%c32_391, %c64_392] : memref<36x128xf32, #tpu.memory_space<vmem>>, vector<4x16xf32>
    tpu.vector_store %arg7[%c32_391, %c64_392], %416 {strides = array<i32>} : memref<36x128xf32, #tpu.memory_space<vmem>>, vector<4x16xf32>,
    %c4_i32_393 = arith.constant 4 : i32
    %418 = arith.addi %3, %c4_i32_393 : i32
    %c5_i32_394 = arith.constant 5 : i32
    %419 = arith.addi %418, %c5_i32_394 : i32
    %c0_395 = arith.constant 0 : index
    %420 = arith.index_cast %419 : i32 to index
    %c4_396 = arith.constant 4 : index
    %421 = vector.load %arg6[%c0_395, %420, %c4_396] : memref<4x20x20xf32, #tpu.memory_space<vmem>>, vector<4x1x16xf32>
    %422 = vector.shape_cast %421 : vector<4x1x16xf32> to vector<4x16xf32>
    %c32_397 = arith.constant 32 : index
    %c80_398 = arith.constant 80 : index
    %423 = vector.load %arg7[%c32_397, %c80_398] : memref<36x128xf32, #tpu.memory_space<vmem>>, vector<4x16xf32>
    tpu.vector_store %arg7[%c32_397, %c80_398], %422 {strides = array<i32>} : memref<36x128xf32, #tpu.memory_space<vmem>>, vector<4x16xf32>,
    %c4_i32_399 = arith.constant 4 : i32
    %424 = arith.addi %3, %c4_i32_399 : i32
    %c6_i32_400 = arith.constant 6 : i32
    %425 = arith.addi %424, %c6_i32_400 : i32
    %c0_401 = arith.constant 0 : index
    %426 = arith.index_cast %425 : i32 to index
    %c4_402 = arith.constant 4 : index
    %427 = vector.load %arg6[%c0_401, %426, %c4_402] : memref<4x20x20xf32, #tpu.memory_space<vmem>>, vector<4x1x16xf32>
    %428 = vector.shape_cast %427 : vector<4x1x16xf32> to vector<4x16xf32>
    %c32_403 = arith.constant 32 : index
    %c96_404 = arith.constant 96 : index
    %429 = vector.load %arg7[%c32_403, %c96_404] : memref<36x128xf32, #tpu.memory_space<vmem>>, vector<4x16xf32>
    tpu.vector_store %arg7[%c32_403, %c96_404], %428 {strides = array<i32>} : memref<36x128xf32, #tpu.memory_space<vmem>>, vector<4x16xf32>,
    %c4_i32_405 = arith.constant 4 : i32
    %430 = arith.addi %3, %c4_i32_405 : i32
    %c7_i32_406 = arith.constant 7 : i32
    %431 = arith.addi %430, %c7_i32_406 : i32
    %c0_407 = arith.constant 0 : index
    %432 = arith.index_cast %431 : i32 to index
    %c4_408 = arith.constant 4 : index
    %433 = vector.load %arg6[%c0_407, %432, %c4_408] : memref<4x20x20xf32, #tpu.memory_space<vmem>>, vector<4x1x16xf32>
    %434 = vector.shape_cast %433 : vector<4x1x16xf32> to vector<4x16xf32>
    %c32_409 = arith.constant 32 : index
    %c112_410 = arith.constant 112 : index
    %435 = vector.load %arg7[%c32_409, %c112_410] : memref<36x128xf32, #tpu.memory_space<vmem>>, vector<4x16xf32>
    tpu.vector_store %arg7[%c32_409, %c112_410], %434 {strides = array<i32>} : memref<36x128xf32, #tpu.memory_space<vmem>>, vector<4x16xf32>,
    %c0_411 = arith.constant 0 : index
    %c0_412 = arith.constant 0 : index
    %436 = vector.load %arg3[%c0_411, %c0_412] : memref<8x36xf32, #tpu.memory_space<vmem>>, vector<8x36xf32>
    %c0_413 = arith.constant 0 : index
    %c0_414 = arith.constant 0 : index
    %437 = vector.load %arg7[%c0_413, %c0_414] : memref<36x128xf32, #tpu.memory_space<vmem>>, vector<36x128xf32>
    %cst = arith.constant dense<0.000000e+00> : vector<8x128xf32>
    %438 = tpu.matmul %436, %437, %cst {dimension_numbers = #tpu.dot_dimension_numbers<[1], [0], [0], [1], [0, 0, 1, 1], [], []>} : vector<8x36xf32>, vector<36x128xf32>, vector<8x128xf32> -> vector<8x128xf32>
    %c0_415 = arith.constant 0 : index
    %c0_416 = arith.constant 0 : index
    %439 = vector.load %arg4[%c0_415, %c0_416] : memref<8x1xf32, #tpu.memory_space<vmem>>, vector<8x1xf32>
    %440 = vector.broadcast %439 : vector<8x1xf32> to vector<8x128xf32>
    %441 = arith.addf %438, %440 : vector<8x128xf32>
    %c0_417 = arith.constant 0 : index
    %c0_418 = arith.constant 0 : index
    %c0_419 = arith.constant 0 : index
    %442 = vector.load %arg5[%c0_417, %c0_418, %c0_419] : memref<1x8x128xf32, #tpu.memory_space<vmem>>, vector<1x8x128xf32>
    %443 = vector.shape_cast %442 : vector<1x8x128xf32> to vector<8x128xf32>
    %444 = vector.shape_cast %441 : vector<8x128xf32> to vector<1x8x128xf32>
    tpu.vector_store %arg5[%c0_417, %c0_418, %c0_419], %444 {strides = array<i32>} : memref<1x8x128xf32, #tpu.memory_space<vmem>>, vector<1x8x128xf32>,
    return
  }
  func.func @transform_0(%arg0: i32, %arg1: i32) -> (i32, i32, i32, i32) {
    %c0_i32 = arith.constant 0 : i32
    %c0_i32_0 = arith.constant 0 : i32
    %c0_i32_1 = arith.constant 0 : i32
    %c0_i32_2 = arith.constant 0 : i32
    return %arg0, %c0_i32, %c0_i32_0, %c0_i32_1 : i32, i32, i32, i32
  }
  func.func @transform_1(%arg0: i32, %arg1: i32) -> (i32, i32) {
    %c0_i32 = arith.constant 0 : i32
    %c0_i32_0 = arith.constant 0 : i32
    %c0_i32_1 = arith.constant 0 : i32
    return %c0_i32, %c0_i32_0 : i32, i32
  }
  func.func @transform_2(%arg0: i32, %arg1: i32) -> (i32, i32) {
    %c0_i32 = arith.constant 0 : i32
    %c0_i32_0 = arith.constant 0 : i32
    %c0_i32_1 = arith.constant 0 : i32
    return %c0_i32, %c0_i32_0 : i32, i32
  }
  func.func @transform_3(%arg0: i32, %arg1: i32) -> (i32, i32, i32) {
    %c0_i32 = arith.constant 0 : i32
    %c0_i32_0 = arith.constant 0 : i32
    return %arg0, %c0_i32, %arg1 : i32, i32, i32
  }
}

</mosaic_0001>

<bundles_post_ra>
// kernel: tpu_custom_call.1
= control target key start
LH: loop header
LB: loop body
LE: loop exit
PB: predicated region body
PF: predicated region fallthrough
CT: control target
= control target key end

     0   :  { %8 = vsyncpa [#allocation5], 0  ;;  %s3284_s0 = inlined_call_operand.hbm [shape: f32[2,4,16,16], index: 0, kind: input, shape index: {}]   ;;  %s3285_s1 = inlined_call_operand.vmem [shape: f32[8,36], index: 1, kind: input, shape index: {}]   ;;  %s3286_s2 = inlined_call_operand.vmem [shape: f32[8,1], index: 2, kind: input, shape index: {}]   ;;  %s3287_s3 = inlined_call_operand.hbm [shape: f32[2,8,256], index: 3, kind: output, shape index: {}]  }
   0x1   :  { %10 = vsyncpa [#allocation5 + $0x1], 0 }
   0x2   :  { %11 = vsyncpa [#allocation6], 0 }
   0x3   :  { %13 = vsyncpa [#allocation6 + $0x1], 0  ;;  %s2427_s12 = smov 0   ;;  %s2429_s13 = smov 0  }
   0x4   :  { %s2431_s14 = smov 0   ;;  %s2433_s15 = smov 0  }
   0x5   :  { %s2435_s16 = smov 0   ;;  %s2437_s17 = smov 0  }
   0x6   :  { %s2439_s18 = smov 0   ;;  %s2441_s19 = smov 0  }
   0x7   :  { %s2443_s20 = smov 0   ;;  %s2445_s21 = smov 0  }
   0x8   :  { %s2447_s22 = smov 0  }
   0x9 LB: > { %3299 = sst [smem:[#allocation10_spill]] %s2369_s20  ;;  %s1787_s23 = sadd.s32 4294967295, %s2377_s22   ;;  %s2377_s22 = sphi %s2447_s22, %s19_s22   ;;  %s2373_s21 = sphi %s2445_s21, %s3317_s21   ;;  %s2369_s20 = sphi %s2443_s20, %s3316_s20   ;;  %s2365_s19 = sphi %s2441_s19, %s3315_s19   ;;  %s2361_s18 = sphi %s2439_s18, %s3314_s18   ;;  %s2357_s17 = sphi %s2437_s17, %s3323_s17   ;;  %s2353_s16 = sphi %s2435_s16, %s3322_s16   ;;  %s2349_s15 = sphi %s2433_s15, %s3321_s15   ;;  %s2345_s14 = sphi %s2431_s14, %s3320_s14   ;;  %s2341_s13 = sphi %s2429_s13, %s3319_s13   ;;  %s2337_s12 = sphi %s2427_s12, %s3318_s12  }
   0xa   : > { %3300 = sst [smem:[#allocation11_spill]] %s2373_s21  ;;  %s1788_s24 = sadd.s32 4294967294, %s2377_s22  }
   0xb   : > { %s28_s25 = sadd.s32 1, %s2369_s20  ;;  %s31_s26 = sadd.s32 1, %s2373_s21 }
   0xc   : > { %p29_p0 = scmp.ge.s32.totalorder %s28_s25, 2  ;;  %s38_s27 = sadd.s32 1, %s2357_s17 }
   0xd   : > { %p45_p1 = scmp.ne.s32.totalorder %s2357_s17, %s2353_s16  ;;  %p46_p2 = scmp.eq.s32.totalorder %s2377_s22, 0 }
   0xe   : > { %s3325_s25 = smov (%p29_p0, %s28_s25), 0  ;;  %s3327_s26 = smov (!%p29_p0, %s31_s26), %s2373_s21 }
   0xf   : > { %3301 = sst [smem:[#allocation12_spill]] %s3325_s25  ;;  %p2491_p3 = por %p46_p2, %p45_p1 }
  0x10   : > { %p51_p4 = scmp.ne.s32.totalorder %s2353_s16, %s2349_s15  ;;  %p33_p5 = scmp.ge.s32.totalorder %s3327_s26, 2 }
  0x11   : > { %p52_p6 = scmp.eq.s32.totalorder %s1787_s23, 0  ;;  %s104_s29 = ssub.s32 %s2369_s20, %s3325_s25 }
  0x12   : > { %s108_s30 = sadd.s32 1, %s2345_s14  ;;  %s3329_s26 = smov (%p33_p5, %s3327_s26), 0 }
  0x13   : > { %3303 = sst [smem:[#allocation13_spill]] %s3329_s26  ;;  %p2501_p7 = por %p52_p6, %p51_p4 }
  0x14   : > { %p118_p8 = scmp.ne.s32.totalorder %s2345_s14, %s2341_s13  ;;  %s35_s5 = ssub.s32 %s2373_s21, %s3329_s26 }
  0x15   : > { %p119_p9 = scmp.eq.s32.totalorder %s1787_s23, 3  ;;  %p36_p10 = scmp.eq.s32.totalorder %s35_s5, 0 }
  0x16   : > { %s105_s6 = sor.u32 %s104_s29, %s35_s5  ;;  %p124_p13 = scmp.ne.s32.totalorder %s2341_s13, %s2337_s12 }
  0x17   : > { %p106_p11 = scmp.eq.s32.totalorder %s105_s6, 0  ;;  %p2509_p12 = por %p119_p9, %p118_p8 }
  0x18   : > { %s2514_s8 = scalar_select %p36_p10, %s2357_s17, %s38_s27  }
  0x19   : > { %s2517_s9 = scalar_select %p106_p11, %s2345_s14, %s108_s30  }
  0x1a   : > { %p125_p0 = scmp.eq.s32.totalorder %s1788_s24, 3  ;;  %p2106_p1 = scmp.lt.s32.totalorder %s2377_s22, 4 }
  0x1b   : > { %s151_s11 = sand.u32 1, %s2357_s17   ;;  %s2093_s23 = sshll.u32 %s2373_s21, 6 }
  0x1c   : > { %p2522_p2 = por %p125_p0, %p124_p13  ;;  %s1791_s15 = sshll.u32 %s151_s11, 6 }
  0x1d   : > { %s160_s6 = scalar_lea.hbm %s3284_s0, %s2093_s23  ;;  %s155_s27 = scalar_lea.vmem [#allocation4], %s1791_s15 }
  0x1e   : > { %s163_s26 = sshll.u32 %s155_s27, 4  ;;  %s161_s25 = sshll.u32 %s160_s6, 4  ;;  %s164_s26 = int_to_ptr.vmem [resolvable:$true] %s163_s26  ;;  %s162_s25 = int_to_ptr.hbm [resolvable:$true] %s161_s25 }
  0x1f   : > { %p2099_p4 = pnand %p2106_p1, %p2491_p3  ;;  %p1794_p5 = scmp.ge.s32.totalorder %s2377_s22, 1 }
  0x20   : > { %s152_s24 = scalar_lea.sflag [#allocation5], %s151_s11  ;;  %s2379_s30 = smov 128  }
  0x21   : > { %s2380_s20 = smov 8   ;;  %p171_p6 = scmp.lt.s32.totalorder %s2377_s22, 5 }
  0x22   : > { %2101 = dma.hbm_to_vmem [thread:$0]  (!%p2099_p4), %s162_s25, 1024, %s164_s26, %s152_s24, %s2379_s30, %s2379_s30, %s2380_s20  }
  0x23   : > { %p172_p8 = pnand %p1794_p5, %p171_p6 }
  0x24   : > { %s177_s21 = sand.u32 (!%p172_p8), 1, %s2353_s16  }
  0x25   : > { %175 = sbr.rel (%p172_p8) target bundleno = 631 (0x277), region = 32  ;;  %s1795_s29 = sshll.u32 (!%p172_p8), %s177_s21, 6 }
  0x26   : > { %s178_s23 = scalar_lea.sflag (!%p172_p8), [#allocation5], %s177_s21  ;;  %s181_s15 = scalar_lea.vmem (!%p172_p8), [#allocation4], %s1795_s29 }
  0x2a   : > { %2328 = dma.done.wait (%p2501_p7), %s178_s23, 1024  }
  0x2b   : > { %2330 = vsyncadd (%p2501_p7), %s178_s23, 4294966272  ;;  %s3292_s28 = sand.u32 1, %s2341_s13   ;;  %p1797_p3 = scmp.ne.s32.totalorder %s2361_s18, 0 }
  0x2c   : > { %s2543_s11 = sshll.u32 %s3292_s28, 3  ;;  %s2381_s21 = smov (!%p1797_p3), 2  }
  0x2d   : > { %208 = sbr.rel (%p1797_p3) target bundleno = 184 (0xb8), region = 40 }
  0x32   : > { %v238_v0 = vld [vmem:[%s181_s15 + $0x10] sm:$0xff]  ;;  %v236_v1 = vld [vmem:[%s181_s15] sm:$0xff]  ;;  %v239_v3 = vld [vmem:[%s181_s15 + $0x18] sm:$0xff]  ;;  %vm218_vm0 = vcmask 15360   ;;  %v2382_v8 = vmov 0.0   ;;  %vm227_vm1 = vcmask 162960  }
  0x33   : > { %256 = vrot.lane.b32.xlu1 %v238_v0, %s2381_s21  ;;  %252 = vrot.lane.b32.xlu0 %v236_v1, %s2381_s21  ;;  %v240_v2 = vld [vmem:[%s181_s15 + $0x20] sm:$0xff]  ;;  %v237_v4 = vld [vmem:[%s181_s15 + $0x8] sm:$0xff]  ;;  %221 = vst.msk [vmem:[#allocation2 + $0x1a] sm:$0xff] %vm218_vm0, %v2382_v8  ;;  %vm209_vm2 = vcmask 156672   ;;  %vm276_vm3 = vcmask 146448  }
  0x34   : > { %260 = vrot.lane.b32.xlu2 %v240_v2, %s2381_s21  ;;  %v241_v5 = vld [vmem:[%s181_s15 + $0x28] sm:$0xff]  ;;  %v243_v6 = vld [vmem:[%s181_s15 + $0x38] sm:$0xff]  ;;  %v242_v7 = vld [vmem:[%s181_s15 + $0x30] sm:$0xff]  ;;  %230 = vst.msk [vmem:[#allocation2 + $0x1a] sm:$0xff] %vm227_vm1, %v2382_v8 }
  0x35   : > { %210 = vst.msk [vmem:[#allocation2] sm:$0x3] %vm209_vm2, %v2382_v8 }
  0x36   : > { %211 = vst.msk [vmem:[#allocation2 + $0x18] sm:$0x3] %vm209_vm2, %v2382_v8 }
  0x37   : > { %212 = vst.msk [vmem:[#allocation2 + $0x30] sm:$0x3] %vm209_vm2, %v2382_v8 }
  0x38   : > { %213 = vst.msk [vmem:[#allocation2 + $0x48] sm:$0x3] %vm209_vm2, %v2382_v8 }
  0x39   : > { %214 = vst.msk [vmem:[#allocation2 + $0x12] sm:$0x3] %vm209_vm2, %v2382_v8 }
  0x3a   : > { %215 = vst.msk [vmem:[#allocation2 + $0x2a] sm:$0x3] %vm209_vm2, %v2382_v8 }
  0x3b   : > { %258 = vrot.lane.b32.xlu1 %v239_v3, %s2381_s21  ;;  %254 = vrot.lane.b32.xlu0 %v237_v4, %s2381_s21  ;;  %216 = vst.msk [vmem:[#allocation2 + $0x42] sm:$0x3] %vm209_vm2, %v2382_v8 }
  0x3c   : > { %262 = vrot.lane.b32.xlu2 %v241_v5, %s2381_s21  ;;  %217 = vst.msk [vmem:[#allocation2 + $0x5a] sm:$0x3] %vm209_vm2, %v2382_v8 }
  0x3d   : > { %219 = vst.msk [vmem:[#allocation2 + $0x2] sm:$0xff] %vm218_vm0, %v2382_v8 }
  0x3e   : > { %220 = vst.msk [vmem:[#allocation2 + $0xa] sm:$0xff] %vm218_vm0, %v2382_v8 }
  0x3f   : > { %222 = vst.msk [vmem:[#allocation2 + $0x22] sm:$0xff] %vm218_vm0, %v2382_v8 }
  0x40   : > { %223 = vst.msk [vmem:[#allocation2 + $0x32] sm:$0xff] %vm218_vm0, %v2382_v8 }
  0x41   : > { %224 = vst.msk [vmem:[#allocation2 + $0x3a] sm:$0xff] %vm218_vm0, %v2382_v8 }
  0x42   : > { %225 = vst.msk [vmem:[#allocation2 + $0x4a] sm:$0xff] %vm218_vm0, %v2382_v8 }
  0x43   : > { %266 = vrot.lane.b32.xlu1 %v243_v6, %s2381_s21  ;;  %264 = vrot.lane.b32.xlu0 %v242_v7, %s2381_s21  ;;  %226 = vst.msk [vmem:[#allocation2 + $0x52] sm:$0xff] %vm218_vm0, %v2382_v8 }
  0x44   : > { %228 = vst.msk [vmem:[#allocation2 + $0x2] sm:$0xff] %vm227_vm1, %v2382_v8 }
  0x45   : > { %229 = vst.msk [vmem:[#allocation2 + $0xa] sm:$0xff] %vm227_vm1, %v2382_v8 }
  0x46   : > { %231 = vst.msk [vmem:[#allocation2 + $0x22] sm:$0xff] %vm227_vm1, %v2382_v8 }
  0x47   : > { %232 = vst.msk [vmem:[#allocation2 + $0x32] sm:$0xff] %vm227_vm1, %v2382_v8 }
  0x48   : > { %233 = vst.msk [vmem:[#allocation2 + $0x3a] sm:$0xff] %vm227_vm1, %v2382_v8 }
  0x49   : > { %234 = vst.msk [vmem:[#allocation2 + $0x4a] sm:$0xff] %vm227_vm1, %v2382_v8 }
  0x4a   : > { %235 = vst.msk [vmem:[#allocation2 + $0x52] sm:$0xff] %vm227_vm1, %v2382_v8 }
  0x8e   : > { %v261_v9 = vpop.permute.xlu2 %260 }
  0x8f   : > { %281 = vst.msk [vmem:[#allocation2 + $0x32] sm:$0xff] %vm276_vm3, %v261_v9 }
  0x96   : > { %v263_v10 = vpop.permute.xlu2 %262 }
  0x97   : > { %282 = vst.msk [vmem:[#allocation2 + $0x3a] sm:$0xff] %vm276_vm3, %v263_v10 }
  0xa5   : > { %v257_v11 = vpop.permute.xlu1 %256  ;;  %v253_v12 = vpop.permute.xlu0 %252 }
  0xa6   : > { %279 = vst.msk [vmem:[#allocation2 + $0x1a] sm:$0xff] %vm276_vm3, %v257_v11 }
  0xa7   : > { %277 = vst.msk [vmem:[#allocation2 + $0x2] sm:$0xff] %vm276_vm3, %v253_v12 }
  0xad   : > { %v259_v13 = vpop.permute.xlu1 %258  ;;  %v255_v14 = vpop.permute.xlu0 %254 }
  0xae   : > { %280 = vst.msk [vmem:[#allocation2 + $0x22] sm:$0xff] %vm276_vm3, %v259_v13 }
  0xaf   : > { %278 = vst.msk [vmem:[#allocation2 + $0xa] sm:$0xff] %vm276_vm3, %v255_v14 }
  0xb5   : > { %v267_v15 = vpop.permute.xlu1 %266  ;;  %v265_v16 = vpop.permute.xlu0 %264 }
  0xb6   : > { %284 = vst.msk [vmem:[#allocation2 + $0x52] sm:$0xff] %vm276_vm3, %v267_v15 }
  0xb7   : > { %283 = vst.msk [vmem:[#allocation2 + $0x4a] sm:$0xff] %vm276_vm3, %v265_v16 }
  0xb8 PF: > { %s1798_s25 = sshll.u32 %s2361_s18, 3  ;;  %vm296_vm4 = vcmask 1041409   ;;  %vm299_vm5 = vcmask 1042434   ;;  %vm302_vm6 = vcmask 1043459   ;;  %s2383_s4 = smov 48   ;;  %vm305_vm7 = vcmask 125952  }
  0xb9   : > { %s2564_s26 = scalar_lea.vmem [#allocation2], %s1798_s25  ;;  %s2384_s5 = smov 16   ;;  %vm326_vm8 = vcmask 257152   ;;  %vm347_vm9 = vcmask 388352   ;;  %vm368_vm10 = vcmask 519552   ;;  %vm389_vm11 = vcmask 650752  }
  0xba   : > { %s2385_s6 = smov 64   ;;  %s2386_s27 = smov 32   ;;  %vm410_vm12 = vcmask 781952   ;;  %vm431_vm13 = vcmask 913152   ;;  %vm452_vm14 = vcmask 1044352   ;;  %vm1626_vm15 = vcmask 1043456  }
  0xbb   : > { %s2387_s24 = smov 124   ;;  %s2388_s30 = smov 80   ;;  %vm1622_vm0 = vcmask 293888  }
  0xbc   : > { %s3293_s29 = smov 112   ;;  %s2390_s23 = smov 28  }
  0xbd   : > { %s2391_s15 = smov 96   ;;  %s2392_s21 = smov 126  }
  0xbe   : > { %v1810_v17 = vld [vmem:[%s2564_s26 + $0x3] sm:$0x1]  ;;  %v1811_v18 = vld [vmem:[%s2564_s26 + $0x1b] sm:$0x1]  ;;  %v1812_v19 = vld [vmem:[%s2564_s26 + $0x33] sm:$0x1] }
  0xbf   : > { %v1813_v20 = vld [vmem:[%s2564_s26 + $0x4b] sm:$0x1]  ;;  %v359_v21 = vrot.slane %v1811_v18, 7  ;;  %v361_v22 = vrot.slane %v1812_v19, 6  ;;  %v1800_v23 = vld [vmem:[%s2564_s26 + $0x1] sm:$0x1] }
  0xc0   : > { %v363_v24 = vrot.slane %v1813_v20, 5  ;;  %v1801_v25 = vld [vmem:[%s2564_s26 + $0x19] sm:$0x1]  ;;  %v1802_v26 = vld [vmem:[%s2564_s26 + $0x31] sm:$0x1]  ;;  %s2393_s25 = smov 44  }
  0xc1   : > { %v360_v27 = vsel %vm296_vm4, %v359_v21, %v1810_v17  ;;  %v1803_v28 = vld [vmem:[%s2564_s26 + $0x49] sm:$0x1]  ;;  %v317_v29 = vrot.slane %v1801_v25, 7  ;;  %v319_v30 = vrot.slane %v1802_v26, 6  ;;  %v1815_v31 = vld [vmem:[%s2564_s26 + $0x4] sm:$0x1] }
  0xc2   : > { %v362_v32 = vsel %vm299_vm5, %v361_v22, %v360_v27  ;;  %v321_v33 = vrot.slane %v1803_v28, 5  ;;  %v1816_v34 = vld [vmem:[%s2564_s26 + $0x1c] sm:$0x1]  ;;  %v1817_v35 = vld [vmem:[%s2564_s26 + $0x34] sm:$0x1]  ;;  %s2394_s28 = smov 12  }
  0xc3   : > { %v364_v36 = vsel %vm302_vm6, %v363_v24, %v362_v32  ;;  %v318_v37 = vsel %vm296_vm4, %v317_v29, %v1800_v23  ;;  %v1818_v38 = vld [vmem:[%s2564_s26 + $0x4c] sm:$0x1]  ;;  %v380_v39 = vrot.slane %v1816_v34, 7  ;;  %v382_v40 = vrot.slane %v1817_v35, 6  ;;  %v1805_v41 = vld [vmem:[%s2564_s26 + $0x2] sm:$0x1] }
  0xc4   : > { %365 = vrot.lane.b32.xlu1 %v364_v36, %s2383_s4  ;;  %v320_v42 = vsel %vm299_vm5, %v319_v30, %v318_v37  ;;  %v384_v43 = vrot.slane %v1818_v38, 5  ;;  %v1806_v44 = vld [vmem:[%s2564_s26 + $0x1a] sm:$0x1]  ;;  %v1807_v45 = vld [vmem:[%s2564_s26 + $0x32] sm:$0x1]  ;;  %s3295_s20 = smov 14  }
  0xc5   : > { %v322_v46 = vsel %vm302_vm6, %v321_v33, %v320_v42  ;;  %v381_v47 = vsel %vm296_vm4, %v380_v39, %v1815_v31  ;;  %v1808_v48 = vld [vmem:[%s2564_s26 + $0x4a] sm:$0x1]  ;;  %v338_v49 = vrot.slane %v1806_v44, 7  ;;  %v340_v50 = vrot.slane %v1807_v45, 6  ;;  %v2055_v52 = vld [vmem:[%s2564_s26 + $0x1c] sm:$0x1] }
  0xc6   : > { %323 = vrot.lane.b32.xlu0 %v322_v46, %s2384_s5  ;;  %v383_v51 = vsel %vm299_vm5, %v382_v40, %v381_v47  ;;  %v342_v54 = vrot.slane %v1808_v48, 5  ;;  %v2056_v55 = vld [vmem:[%s2564_s26 + $0x34] sm:$0x1]  ;;  %v1474_v56 = vrot.slane %v2055_v52, 7  ;;  %v2054_v58 = vld [vmem:[%s2564_s26 + $0x4] sm:$0x1] }
  0xc7   : > { %v339_v53 = vsel %vm296_vm4, %v338_v49, %v1805_v41  ;;  %v1831_v59 = vld [vmem:[%s2564_s26 + $0x1f] sm:$0x1]  ;;  %v385_v60 = vsel %vm302_vm6, %v384_v43, %v383_v51  ;;  %v1832_v61 = vld [vmem:[%s2564_s26 + $0x37] sm:$0x1]  ;;  %v2057_v63 = vld [vmem:[%s2564_s26 + $0x4c] sm:$0x1] }
  0xc8   : > { %v341_v57 = vsel %vm299_vm5, %v340_v50, %v339_v53  ;;  %v443_v62 = vrot.slane %v1831_v59, 7  ;;  %v1476_v0 = vrot.slane %v2056_v55, 6  ;;  %v1830_v1 = vld [vmem:[%s2564_s26 + $0x7] sm:$0x1]  ;;  %v1475_v3 = vsel %vm296_vm4, %v1474_v56, %v2054_v58  ;;  %v1833_v4 = vld [vmem:[%s2564_s26 + $0x4f] sm:$0x1] }
  0xc9   : > { %v343_v2 = vsel %vm302_vm6, %v342_v54, %v341_v57  ;;  %v445_v5 = vrot.slane %v1832_v61, 6  ;;  %v2063_v6 = vld [vmem:[%s2564_s26 + $0x1e] sm:$0x1]  ;;  %v1478_v7 = vrot.slane %v2057_v63, 5  ;;  %v2064_v9 = vld [vmem:[%s2564_s26 + $0x36] sm:$0x1] }
  0xca   : > { %v444_v8 = vsel %vm296_vm4, %v443_v62, %v1830_v1  ;;  %v2023_v10 = vld [vmem:[%s2564_s26 + $0x1c] sm:$0x1]  ;;  %v1477_v11 = vsel %vm299_vm5, %v1476_v0, %v1475_v3  ;;  %v1820_v12 = vld [vmem:[%s2564_s26 + $0x5] sm:$0x1]  ;;  %v1821_v13 = vld [vmem:[%s2564_s26 + $0x1d] sm:$0x1] }
  0xcb   : > { %v1822_v14 = vld [vmem:[%s2564_s26 + $0x35] sm:$0x1]  ;;  %v447_v15 = vrot.slane %v1833_v4, 5  ;;  %v1510_v16 = vrot.slane %v2063_v6, 7  ;;  %v1823_v17 = vld [vmem:[%s2564_s26 + $0x4d] sm:$0x1]  ;;  %v446_v20 = vsel %vm299_vm5, %v445_v5, %v444_v8  ;;  %v1479_v23 = vsel %vm302_vm6, %v1478_v7, %v1477_v11 }
  0xcc   : > { %386 = vrot.lane.b32.xlu1 %v385_v60, %s2385_s6  ;;  %v401_v18 = vrot.slane %v1821_v13, 7  ;;  %v403_v19 = vrot.slane %v1822_v14, 6  ;;  %v2062_v21 = vld [vmem:[%s2564_s26 + $0x6] sm:$0x1]  ;;  %v405_v22 = vrot.slane %v1823_v17, 5  ;;  %v1330_v26 = vrot.slane %v2023_v10, 7 }
  0xcd   : > { %v2065_v24 = vld [vmem:[%s2564_s26 + $0x4e] sm:$0x1]  ;;  %v2024_v25 = vld [vmem:[%s2564_s26 + $0x34] sm:$0x1]  ;;  %v1512_v28 = vrot.slane %v2064_v9, 6  ;;  %v448_v31 = vsel %vm302_vm6, %v447_v15, %v446_v20  ;;  %v1511_v32 = vsel %vm296_vm4, %v1510_v16, %v2062_v21 }
  0xce   : > { %344 = vrot.lane.b32.xlu0 %v343_v2, %s2386_s27  ;;  %v402_v27 = vsel %vm296_vm4, %v401_v18, %v1820_v12  ;;  %v2022_v29 = vld [vmem:[%s2564_s26 + $0x4] sm:$0x1]  ;;  %v2025_v33 = vld [vmem:[%s2564_s26 + $0x4c] sm:$0x1]  ;;  %v2067_v35 = vld [vmem:[%s2564_s26 + $0x1f] sm:$0x1] }
  0xcf   : > { %v404_v30 = vsel %vm299_vm5, %v403_v19, %v402_v27  ;;  %v1825_v36 = vld [vmem:[%s2564_s26 + $0x6] sm:$0x1]  ;;  %v1514_v37 = vrot.slane %v2065_v24, 5  ;;  %v1332_v38 = vrot.slane %v2024_v25, 6  ;;  %v1826_v39 = vld [vmem:[%s2564_s26 + $0x1e] sm:$0x1]  ;;  %v1331_v41 = vsel %vm296_vm4, %v1330_v26, %v2022_v29 }
  0xd0   : > { %v406_v34 = vsel %vm302_vm6, %v405_v22, %v404_v30  ;;  %v1827_v40 = vld [vmem:[%s2564_s26 + $0x36] sm:$0x1]  ;;  %v2068_v42 = vld [vmem:[%s2564_s26 + $0x37] sm:$0x1]  ;;  %v1828_v43 = vld [vmem:[%s2564_s26 + $0x4e] sm:$0x1]  ;;  %v1513_v46 = vsel %vm299_vm5, %v1512_v28, %v1511_v32 }
  0xd1   : > { %407 = vrot.lane.b32.xlu2 %v406_v34, %s2388_s30  ;;  %v422_v44 = vrot.slane %v1826_v39, 7  ;;  %v424_v45 = vrot.slane %v1827_v40, 6  ;;  %v2027_v47 = vld [vmem:[%s2564_s26 + $0x1d] sm:$0x1]  ;;  %v426_v48 = vrot.slane %v1828_v43, 5  ;;  %v1334_v49 = vrot.slane %v2025_v33, 5 }
  0xd2   : > { %v1528_v50 = vrot.slane %v2067_v35, 7  ;;  %v1333_v52 = vsel %vm299_vm5, %v1332_v38, %v1331_v41  ;;  %v2066_v53 = vld [vmem:[%s2564_s26 + $0x7] sm:$0x1]  ;;  %v2069_v54 = vld [vmem:[%s2564_s26 + $0x4f] sm:$0x1]  ;;  %v1530_v55 = vrot.slane %v2068_v42, 6  ;;  %v1515_v57 = vsel %vm302_vm6, %v1514_v37, %v1513_v46 }
  0xd3   : > { %v423_v51 = vsel %vm296_vm4, %v422_v44, %v1825_v36  ;;  %v2026_v58 = vld [vmem:[%s2564_s26 + $0x5] sm:$0x1]  ;;  %v2028_v59 = vld [vmem:[%s2564_s26 + $0x35] sm:$0x1]  ;;  %v1348_v60 = vrot.slane %v2027_v47, 7  ;;  %v1335_v1 = vsel %vm302_vm6, %v1334_v49, %v1333_v52  ;;  %v1532_v9 = vrot.slane %v2069_v54, 5 }
  0xd4   : > { %1480 = vrot.lane.b32.xlu1 %v1479_v23, %s2387_s24  ;;  %v425_v56 = vsel %vm299_vm5, %v424_v45, %v423_v51  ;;  %v2058_v62 = vld [vmem:[%s2564_s26 + $0x5] sm:$0x1]  ;;  %v2059_v63 = vld [vmem:[%s2564_s26 + $0x1d] sm:$0x1]  ;;  %v2060_v0 = vld [vmem:[%s2564_s26 + $0x35] sm:$0x1]  ;;  %v1529_v2 = vsel %vm296_vm4, %v1528_v50, %v2066_v53 }
  0xd5   : > { %v427_v61 = vsel %vm302_vm6, %v426_v48, %v425_v56  ;;  %v2029_v3 = vld [vmem:[%s2564_s26 + $0x4d] sm:$0x1]  ;;  %v1492_v5 = vrot.slane %v2059_v63, 7  ;;  %v1494_v6 = vrot.slane %v2060_v0, 6  ;;  %v1350_v7 = vrot.slane %v2028_v59, 6 }
  0xd6   : > { %449 = vrot.lane.b32.xlu0 %v448_v31, %s3293_s29  ;;  %v2061_v4 = vld [vmem:[%s2564_s26 + $0x4d] sm:$0x1]  ;;  %v1997_v8 = vld [vmem:[%s2564_s26 + $0x1e] sm:$0x1]  ;;  %v1349_v10 = vsel %vm296_vm4, %v1348_v60, %v2026_v58  ;;  %v1531_v13 = vsel %vm299_vm5, %v1530_v55, %v1529_v2  ;;  %v1352_v14 = vrot.slane %v2029_v3, 5  ;;  %s3296_s29 = smov 60  }
  0xd7   : > { %v1493_v11 = vsel %vm296_vm4, %v1492_v5, %v2058_v62  ;;  %v1496_v12 = vrot.slane %v2061_v4, 5  ;;  %v1957_v15 = vld [vmem:[%s2564_s26 + $0x1a] sm:$0x1]  ;;  %v1996_v17 = vld [vmem:[%s2564_s26 + $0x6] sm:$0x1]  ;;  %v1218_v19 = vrot.slane %v1997_v8, 7  ;;  %v1351_v20 = vsel %vm299_vm5, %v1350_v7, %v1349_v10 }
  0xd8   : > { %v1495_v16 = vsel %vm299_vm5, %v1494_v6, %v1493_v11  ;;  %v1998_v18 = vld [vmem:[%s2564_s26 + $0x36] sm:$0x1]  ;;  %v1992_v21 = vld [vmem:[%s2564_s26 + $0x5] sm:$0x1]  ;;  %v1993_v22 = vld [vmem:[%s2564_s26 + $0x1d] sm:$0x1]  ;;  %v1533_v24 = vsel %vm302_vm6, %v1532_v9, %v1531_v13  ;;  %v1353_v34 = vsel %vm302_vm6, %v1352_v14, %v1351_v20 }
  0xd9   : > { %428 = vrot.lane.b32.xlu2 %v427_v61, %s2391_s15  ;;  %v1994_v23 = vld [vmem:[%s2564_s26 + $0x35] sm:$0x1]  ;;  %v1999_v25 = vld [vmem:[%s2564_s26 + $0x4e] sm:$0x1]  ;;  %v1958_v26 = vld [vmem:[%s2564_s26 + $0x32] sm:$0x1]  ;;  %v1497_v28 = vsel %vm302_vm6, %v1496_v12, %v1495_v16  ;;  %v1219_v35 = vsel %vm296_vm4, %v1218_v19, %v1996_v17 }
  0xda   : > { %v1040_v27 = vrot.slane %v1957_v15, 7  ;;  %v1200_v29 = vrot.slane %v1993_v22, 7  ;;  %v1220_v30 = vrot.slane %v1998_v18, 6  ;;  %v1956_v31 = vld [vmem:[%s2564_s26 + $0x2] sm:$0x1]  ;;  %v1202_v33 = vrot.slane %v1994_v23, 6 }
  0xdb   : > { %v1995_v32 = vld [vmem:[%s2564_s26 + $0x4d] sm:$0x1]  ;;  %v1959_v36 = vld [vmem:[%s2564_s26 + $0x4a] sm:$0x1]  ;;  %v1042_v38 = vrot.slane %v1958_v26, 6  ;;  %v1222_v40 = vrot.slane %v1999_v25, 5 }
  0xdc   : > { %1516 = vrot.lane.b32.xlu1 %v1515_v57, %s2390_s23  ;;  %v1201_v37 = vsel %vm296_vm4, %v1200_v29, %v1992_v21  ;;  %v1929_v39 = vld [vmem:[%s2564_s26 + $0x1b] sm:$0x1]  ;;  %v1041_v41 = vsel %vm296_vm4, %v1040_v27, %v1956_v31  ;;  %v1204_v42 = vrot.slane %v1995_v32, 5  ;;  %v1221_v43 = vsel %vm299_vm5, %v1220_v30, %v1219_v35  ;;  %v2071_v45 = vld [vmem:[%s2564_s26 + $0x20] sm:$0x1] }
  0xdd   : > { %v1044_v44 = vrot.slane %v1959_v36, 5  ;;  %v1203_v46 = vsel %vm299_vm5, %v1202_v33, %v1201_v37  ;;  %v1925_v47 = vld [vmem:[%s2564_s26 + $0x1a] sm:$0x1]  ;;  %v1930_v48 = vld [vmem:[%s2564_s26 + $0x33] sm:$0x1]  ;;  %v914_v49 = vrot.slane %v1929_v39, 7  ;;  %v1043_v52 = vsel %vm299_vm5, %v1042_v38, %v1041_v41 }
  0xde   : > { %1336 = vrot.lane.b32.xlu0 %v1335_v1, %s2392_s21  ;;  %v1926_v50 = vld [vmem:[%s2564_s26 + $0x32] sm:$0x1]  ;;  %v896_v51 = vrot.slane %v1925_v47, 7  ;;  %v1928_v53 = vld [vmem:[%s2564_s26 + $0x3] sm:$0x1]  ;;  %v1223_v55 = vsel %vm302_vm6, %v1222_v40, %v1221_v43  ;;  %v1546_v58 = vrot.slane %v2071_v45, 7  ;;  %v1205_v59 = vsel %vm302_vm6, %v1204_v42, %v1203_v46 }
  0xdf   : > { %v1924_v54 = vld [vmem:[%s2564_s26 + $0x2] sm:$0x1]  ;;  %v1931_v56 = vld [vmem:[%s2564_s26 + $0x4b] sm:$0x1]  ;;  %v2072_v57 = vld [vmem:[%s2564_s26 + $0x38] sm:$0x1]  ;;  %v1045_v0 = vsel %vm302_vm6, %v1044_v44, %v1043_v52  ;;  %v915_v1 = vsel %vm296_vm4, %v914_v49, %v1928_v53 }
  0xe0   : > { %v916_v60 = vrot.slane %v1930_v48, 6  ;;  %v2070_v61 = vld [vmem:[%s2564_s26 + $0x8] sm:$0x1]  ;;  %v1927_v62 = vld [vmem:[%s2564_s26 + $0x4a] sm:$0x1]  ;;  %v898_v63 = vrot.slane %v1926_v50, 6  ;;  %v897_v3 = vsel %vm296_vm4, %v896_v51, %v1924_v54 }
  0xe1   : > { %1498 = vrot.lane.b32.xlu2 %v1497_v28, %s2394_s28  ;;  %v2073_v2 = vld [vmem:[%s2564_s26 + $0x50] sm:$0x1]  ;;  %v1548_v4 = vrot.slane %v2072_v57, 6  ;;  %v2035_v5 = vld [vmem:[%s2564_s26 + $0x1f] sm:$0x1]  ;;  %v918_v7 = vrot.slane %v1931_v56, 5  ;;  %v1547_v8 = vsel %vm296_vm4, %v1546_v58, %v2070_v61 }
  0xe2   : > { %v2031_v6 = vld [vmem:[%s2564_s26 + $0x1e] sm:$0x1]  ;;  %v900_v9 = vrot.slane %v1927_v62, 5  ;;  %v917_v10 = vsel %vm299_vm5, %v916_v60, %v915_v1  ;;  %v1550_v11 = vrot.slane %v2073_v2, 5  ;;  %v2001_v12 = vld [vmem:[%s2564_s26 + $0x1f] sm:$0x1]  ;;  %v899_v13 = vsel %vm299_vm5, %v898_v63, %v897_v3 }
  0xe3   : > { %v2036_v14 = vld [vmem:[%s2564_s26 + $0x37] sm:$0x1]  ;;  %v1384_v15 = vrot.slane %v2035_v5, 7  ;;  %v2032_v16 = vld [vmem:[%s2564_s26 + $0x36] sm:$0x1]  ;;  %v1366_v17 = vrot.slane %v2031_v6, 7  ;;  %v1549_v18 = vsel %vm299_vm5, %v1548_v4, %v1547_v8  ;;  %v919_v21 = vsel %vm302_vm6, %v918_v7, %v917_v10 }
  0xe4   : > { %1534 = vrot.lane.b32.xlu1 %v1533_v24, %s2393_s25  ;;  %v2034_v19 = vld [vmem:[%s2564_s26 + $0x7] sm:$0x1]  ;;  %v2030_v20 = vld [vmem:[%s2564_s26 + $0x6] sm:$0x1]  ;;  %v2037_v22 = vld [vmem:[%s2564_s26 + $0x4f] sm:$0x1]  ;;  %v901_v25 = vsel %vm302_vm6, %v900_v9, %v899_v13  ;;  %v1551_v30 = vsel %vm302_vm6, %v1550_v11, %v1549_v18 }
  0xe5   : > { %v2002_v23 = vld [vmem:[%s2564_s26 + $0x37] sm:$0x1]  ;;  %v1236_v24 = vrot.slane %v2001_v12, 7  ;;  %v1386_v26 = vrot.slane %v2036_v14, 6  ;;  %v2000_v27 = vld [vmem:[%s2564_s26 + $0x7] sm:$0x1]  ;;  %v1385_v31 = vsel %vm296_vm4, %v1384_v15, %v2034_v19  ;;  %v1367_v33 = vsel %vm296_vm4, %v1366_v17, %v2030_v20 }
  0xe6   : > { %1354 = vrot.lane.b32.xlu0 %v1353_v34, %s3295_s20  ;;  %v2033_v28 = vld [vmem:[%s2564_s26 + $0x4e] sm:$0x1]  ;;  %v1368_v29 = vrot.slane %v2032_v16, 6  ;;  %v2003_v32 = vld [vmem:[%s2564_s26 + $0x4f] sm:$0x1]  ;;  %v1238_v34 = vrot.slane %v2002_v23, 6 }
  0xe7   : > { %v1933_v35 = vld [vmem:[%s2564_s26 + $0x1c] sm:$0x1]  ;;  %v1961_v36 = vld [vmem:[%s2564_s26 + $0x1b] sm:$0x1]  ;;  %v1388_v37 = vrot.slane %v2037_v22, 5  ;;  %v1237_v38 = vsel %vm296_vm4, %v1236_v24, %v2000_v27  ;;  %v1370_v39 = vrot.slane %v2033_v28, 5  ;;  %v1387_v40 = vsel %vm299_vm5, %v1386_v26, %v1385_v31 }
  0xe8   : > { %v1240_v41 = vrot.slane %v2003_v32, 5  ;;  %v599_v42 = vld [vmem:[%s2564_s26 + $0x18] sm:$0x1]  ;;  %v1369_v43 = vsel %vm299_vm5, %v1368_v29, %v1367_v33  ;;  %v1934_v44 = vld [vmem:[%s2564_s26 + $0x34] sm:$0x1]  ;;  %v932_v45 = vrot.slane %v1933_v35, 7  ;;  %v1239_v48 = vsel %vm299_vm5, %v1238_v34, %v1237_v38 }
  0xe9   : > { %1206 = vrot.lane.b32.xlu2 %v1205_v59, %s2384_s5  ;;  %v1962_v46 = vld [vmem:[%s2564_s26 + $0x33] sm:$0x1]  ;;  %v1058_v47 = vrot.slane %v1961_v36, 7  ;;  %v1932_v49 = vld [vmem:[%s2564_s26 + $0x4] sm:$0x1]  ;;  %v1389_v51 = vsel %vm302_vm6, %v1388_v37, %v1387_v40  ;;  %v606_v54 = vrot.slane %v599_v42, 7 }
  0xea   : > { %v1960_v50 = vld [vmem:[%s2564_s26 + $0x3] sm:$0x1]  ;;  %v1935_v52 = vld [vmem:[%s2564_s26 + $0x4c] sm:$0x1]  ;;  %v600_v53 = vld [vmem:[%s2564_s26 + $0x30] sm:$0x1]  ;;  %v1241_v60 = vsel %vm302_vm6, %v1240_v41, %v1239_v48  ;;  %v933_v61 = vsel %vm296_vm4, %v932_v45, %v1932_v49 }
  0xeb   : > { %v934_v56 = vrot.slane %v1934_v44, 6  ;;  %v598_v57 = vld [vmem:[%s2564_s26] sm:$0x1]  ;;  %v1963_v58 = vld [vmem:[%s2564_s26 + $0x4b] sm:$0x1]  ;;  %v1060_v59 = vrot.slane %v1962_v46, 6  ;;  %v1059_v63 = vsel %vm296_vm4, %v1058_v47, %v1960_v50 }
  0xec   : > { %1224 = vrot.lane.b32.xlu1 %v1223_v55, %s2386_s27  ;;  %v1371_v55 = vsel %vm302_vm6, %v1370_v39, %v1369_v43  ;;  %v601_v62 = vld [vmem:[%s2564_s26 + $0x48] sm:$0x1]  ;;  %v2039_v1 = vld [vmem:[%s2564_s26 + $0x20] sm:$0x1]  ;;  %v2075_v2 = vld [vmem:[%s2564_s26 + $0x21] sm:$0x1]  ;;  %v607_v4 = vsel %vm296_vm4, %v606_v54, %v598_v57 }
  0xed   : > { %v936_v3 = vrot.slane %v1935_v52, 5  ;;  %v1062_v5 = vrot.slane %v1963_v58, 5  ;;  %v935_v6 = vsel %vm299_vm5, %v934_v56, %v933_v61  ;;  %v610_v7 = vrot.slane %v601_v62, 5  ;;  %v2005_v8 = vld [vmem:[%s2564_s26 + $0x20] sm:$0x1] }
  0xee   : > { %1046 = vrot.lane.b32.xlu0 %v1045_v0, %s2387_s24  ;;  %v608_v0 = vrot.slane %v600_v53, 6  ;;  %v1061_v9 = vsel %vm299_vm5, %v1060_v59, %v1059_v63  ;;  %v2040_v10 = vld [vmem:[%s2564_s26 + $0x38] sm:$0x1]  ;;  %v1402_v11 = vrot.slane %v2039_v1, 7  ;;  %v2076_v12 = vld [vmem:[%s2564_s26 + $0x39] sm:$0x1] }
  0xef   : > { %v1564_v13 = vrot.slane %v2075_v2, 7  ;;  %v2038_v15 = vld [vmem:[%s2564_s26 + $0x8] sm:$0x1]  ;;  %v2074_v16 = vld [vmem:[%s2564_s26 + $0x9] sm:$0x1]  ;;  %v937_v17 = vsel %vm302_vm6, %v936_v3, %v935_v6  ;;  %v1254_v20 = vrot.slane %v2005_v8, 7 }
  0xf0   : > { %v609_v14 = vsel %vm299_vm5, %v608_v0, %v607_v4  ;;  %v2041_v18 = vld [vmem:[%s2564_s26 + $0x50] sm:$0x1]  ;;  %v2006_v19 = vld [vmem:[%s2564_s26 + $0x38] sm:$0x1]  ;;  %v1404_v22 = vrot.slane %v2040_v10, 6  ;;  %v1403_v27 = vsel %vm296_vm4, %v1402_v11, %v2038_v15 }
  0xf1   : > { %902 = vrot.lane.b32.xlu2 %v901_v25, %s2392_s21  ;;  %v2004_v23 = vld [vmem:[%s2564_s26 + $0x8] sm:$0x1]  ;;  %v2077_v24 = vld [vmem:[%s2564_s26 + $0x51] sm:$0x1]  ;;  %v1566_v25 = vrot.slane %v2076_v12, 6  ;;  %v611_v26 = vsel %vm302_vm6, %v610_v7, %v609_v14  ;;  %v1565_v29 = vsel %vm296_vm4, %v1564_v13, %v2074_v16  ;;  %v1406_v33 = vrot.slane %v2041_v18, 5 }
  0xf2   : > { %v2007_v28 = vld [vmem:[%s2564_s26 + $0x50] sm:$0x1]  ;;  %v1895_v31 = vld [vmem:[%s2564_s26 + $0x1b] sm:$0x1]  ;;  %v1965_v32 = vld [vmem:[%s2564_s26 + $0x1c] sm:$0x1]  ;;  %v1255_v34 = vsel %vm296_vm4, %v1254_v20, %v2004_v23  ;;  %v1405_v36 = vsel %vm299_vm5, %v1404_v22, %v1403_v27 }
  0xf3   : > { %v1568_v35 = vrot.slane %v2077_v24, 5  ;;  %v1258_v37 = vrot.slane %v2007_v28, 5  ;;  %v1863_v38 = vld [vmem:[%s2564_s26 + $0x19] sm:$0x1]  ;;  %v1567_v39 = vsel %vm299_vm5, %v1566_v25, %v1565_v29  ;;  %v1896_v40 = vld [vmem:[%s2564_s26 + $0x33] sm:$0x1]  ;;  %v1407_v47 = vsel %vm302_vm6, %v1406_v33, %v1405_v36 }
  0xf4   : > { %920 = vrot.lane.b32.xlu1 %v919_v21, %s3295_s20  ;;  %s2397_s20 = smov 46   ;;  %v1063_v21 = vsel %vm302_vm6, %v1062_v5, %v1061_v9  ;;  %v766_v41 = vrot.slane %v1895_v31, 7  ;;  %v1966_v42 = vld [vmem:[%s2564_s26 + $0x34] sm:$0x1]  ;;  %v1076_v43 = vrot.slane %v1965_v32, 7  ;;  %v624_v50 = vrot.slane %v1863_v38, 7 }
  0xf5   : > { %v1894_v45 = vld [vmem:[%s2564_s26 + $0x3] sm:$0x1]  ;;  %v1964_v46 = vld [vmem:[%s2564_s26 + $0x4] sm:$0x1]  ;;  %v1897_v48 = vld [vmem:[%s2564_s26 + $0x4b] sm:$0x1] }
  0xf6   : > { %1552 = vrot.lane.b32.xlu0 %v1551_v30, %s3296_s29  ;;  %s3298_s29 = smov 30   ;;  %v1256_v30 = vrot.slane %v2006_v19, 6  ;;  %v1864_v49 = vld [vmem:[%s2564_s26 + $0x31] sm:$0x1]  ;;  %v768_v52 = vrot.slane %v1896_v40, 6  ;;  %v767_v57 = vsel %vm296_vm4, %v766_v41, %v1894_v45  ;;  %v1077_v59 = vsel %vm296_vm4, %v1076_v43, %v1964_v46 }
  0xf7   : > { %v1862_v53 = vld [vmem:[%s2564_s26 + $0x1] sm:$0x1]  ;;  %v1967_v54 = vld [vmem:[%s2564_s26 + $0x4c] sm:$0x1]  ;;  %v1865_v58 = vld [vmem:[%s2564_s26 + $0x49] sm:$0x1] }
  0xf8   : > { %v1257_v44 = vsel %vm299_vm5, %v1256_v30, %v1255_v34  ;;  %v2009_v61 = vld [vmem:[%s2564_s26 + $0x21] sm:$0x1]  ;;  %v2079_v62 = vld [vmem:[%s2564_s26 + $0x22] sm:$0x1]  ;;  %v770_v63 = vrot.slane %v1897_v48, 5  ;;  %v625_v0 = vsel %vm296_vm4, %v624_v50, %v1862_v53  ;;  %v1080_v1 = vrot.slane %v1967_v54, 5 }
  0xf9   : > { %1372 = vrot.lane.b32.xlu2 %v1371_v55, %s3298_s29  ;;  %v1078_v55 = vrot.slane %v1966_v42, 6  ;;  %v1259_v56 = vsel %vm302_vm6, %v1258_v37, %v1257_v44  ;;  %v769_v2 = vsel %vm299_vm5, %v768_v52, %v767_v57  ;;  %v628_v3 = vrot.slane %v1865_v58, 5  ;;  %v1969_v4 = vld [vmem:[%s2564_s26 + $0x1d] sm:$0x1]  ;;  %v2010_v6 = vld [vmem:[%s2564_s26 + $0x39] sm:$0x1] }
  0xfa   : > { %v1272_v7 = vrot.slane %v2009_v61, 7  ;;  %v2080_v8 = vld [vmem:[%s2564_s26 + $0x3a] sm:$0x1]  ;;  %v1582_v9 = vrot.slane %v2079_v62, 7  ;;  %v2008_v11 = vld [vmem:[%s2564_s26 + $0x9] sm:$0x1]  ;;  %v771_v14 = vsel %vm302_vm6, %v770_v63, %v769_v2 }
  0xfb   : > { %v1079_v5 = vsel %vm299_vm5, %v1078_v55, %v1077_v59  ;;  %v2011_v12 = vld [vmem:[%s2564_s26 + $0x51] sm:$0x1]  ;;  %v2078_v13 = vld [vmem:[%s2564_s26 + $0xa] sm:$0x1]  ;;  %v1970_v15 = vld [vmem:[%s2564_s26 + $0x35] sm:$0x1] }
  0xfc   : > { %1390 = vrot.lane.b32.xlu1 %v1389_v51, %s2397_s20  ;;  %v1569_v51 = vsel %vm302_vm6, %v1568_v35, %v1567_v39  ;;  %v1094_v16 = vrot.slane %v1969_v4, 7  ;;  %v2081_v18 = vld [vmem:[%s2564_s26 + $0x52] sm:$0x1]  ;;  %v1274_v19 = vrot.slane %v2010_v6, 6  ;;  %v1968_v20 = vld [vmem:[%s2564_s26 + $0x5] sm:$0x1]  ;;  %v1273_v23 = vsel %vm296_vm4, %v1272_v7, %v2008_v11 }
  0xfd   : > { %v1276_v24 = vrot.slane %v2011_v12, 5  ;;  %v1971_v25 = vld [vmem:[%s2564_s26 + $0x4d] sm:$0x1]  ;;  %v1096_v27 = vrot.slane %v1970_v15, 6  ;;  %v455_v28 = vld [vmem:[%s2564_s26 + $0x18] sm:$0x1] }
  0xfe   : > { %1242 = vrot.lane.b32.xlu0 %v1241_v60, %s2383_s4  ;;  %v626_v60 = vrot.slane %v1864_v49, 6  ;;  %v1586_v29 = vrot.slane %v2081_v18, 5  ;;  %v1937_v30 = vld [vmem:[%s2564_s26 + $0x1d] sm:$0x1]  ;;  %v1095_v31 = vsel %vm296_vm4, %v1094_v16, %v1968_v20  ;;  %v456_v32 = vld [vmem:[%s2564_s26 + $0x30] sm:$0x1]  ;;  %v1275_v36 = vsel %vm299_vm5, %v1274_v19, %v1273_v23 }
  0xff   : > { %v287_v33 = vld [vmem:[%s2564_s26] sm:$0x1]  ;;  %v288_v34 = vld [vmem:[%s2564_s26 + $0x18] sm:$0x1]  ;;  %v289_v35 = vld [vmem:[%s2564_s26 + $0x30] sm:$0x1] }
 0x100   : > { %v627_v10 = vsel %vm299_vm5, %v626_v60, %v625_v0  ;;  %v1098_v37 = vrot.slane %v1971_v25, 5  ;;  %v2083_v38 = vld [vmem:[%s2564_s26 + $0x23] sm:$0x1]  ;;  %v290_v40 = vld [vmem:[%s2564_s26 + $0x48] sm:$0x1]  ;;  %v295_v41 = vrot.slane %v288_v34, 7 }
 0x101   : > { %1064 = vrot.lane.b32.xlu2 %v1063_v21, %s2394_s28  ;;  %v1584_v21 = vrot.slane %v2080_v8, 6  ;;  %v629_v22 = vsel %vm302_vm6, %v628_v3, %v627_v10  ;;  %v462_v42 = vrot.slane %v455_v28, 7  ;;  %v1938_v43 = vld [vmem:[%s2564_s26 + $0x35] sm:$0x1]  ;;  %v950_v44 = vrot.slane %v1937_v30, 7 }
 0x102   : > { %v298_v45 = vrot.slane %v289_v35, 6  ;;  %v301_v46 = vrot.slane %v290_v40, 5  ;;  %v454_v48 = vld [vmem:[%s2564_s26] sm:$0x1]  ;;  %v1936_v49 = vld [vmem:[%s2564_s26 + $0x5] sm:$0x1]  ;;  %v297_v50 = vsel %vm296_vm4, %v295_v41, %v287_v33 }
 0x103   : > { %v457_v52 = vld [vmem:[%s2564_s26 + $0x48] sm:$0x1]  ;;  %v2084_v53 = vld [vmem:[%s2564_s26 + $0x3b] sm:$0x1]  ;;  %v1600_v54 = vrot.slane %v2083_v38, 7  ;;  %v464_v57 = vrot.slane %v456_v32, 6  ;;  %v463_v63 = vsel %vm296_vm4, %v462_v42, %v454_v48 }
 0x104   : > { %938 = vrot.lane.b32.xlu1 %v937_v17, %s3298_s29  ;;  %s2400_s29 = smov 76   ;;  %v1081_v17 = vsel %vm302_vm6, %v1080_v1, %v1079_v5  ;;  %v2082_v58 = vld [vmem:[%s2564_s26 + $0xb] sm:$0x1]  ;;  %v1939_v59 = vld [vmem:[%s2564_s26 + $0x4d] sm:$0x1]  ;;  %v952_v60 = vrot.slane %v1938_v43, 6  ;;  %v951_v1 = vsel %vm296_vm4, %v950_v44, %v1936_v49 }
 0x105   : > { %v2085_v0 = vld [vmem:[%s2564_s26 + $0x53] sm:$0x1]  ;;  %v1602_v2 = vrot.slane %v2084_v53, 6  ;;  %v1941_v3 = vld [vmem:[%s2564_s26 + $0x1e] sm:$0x1]  ;;  %v466_v5 = vrot.slane %v457_v52, 5  ;;  %v1601_v6 = vsel %vm296_vm4, %v1600_v54, %v2082_v58  ;;  %v465_v8 = vsel %vm299_vm5, %v464_v57, %v463_v63 }
 0x106   : > { %612 = vrot.lane.b32.xlu0 %v611_v26, %s2387_s24  ;;  %s2399_s24 = smov 62   ;;  %v1583_v26 = vsel %vm296_vm4, %v1582_v9, %v2078_v13  ;;  %v2043_v4 = vld [vmem:[%s2564_s26 + $0x21] sm:$0x1]  ;;  %v954_v7 = vrot.slane %v1939_v59, 5  ;;  %v1604_v9 = vrot.slane %v2085_v0, 5  ;;  %v953_v11 = vsel %vm299_vm5, %v952_v60, %v951_v1 }
 0x107   : > { %v1585_v39 = vsel %vm299_vm5, %v1584_v21, %v1583_v26  ;;  %v1899_v10 = vld [vmem:[%s2564_s26 + $0x1c] sm:$0x1]  ;;  %v1942_v12 = vld [vmem:[%s2564_s26 + $0x36] sm:$0x1]  ;;  %v968_v13 = vrot.slane %v1941_v3, 7  ;;  %v1420_v15 = vrot.slane %v2043_v4, 7  ;;  %v1603_v16 = vsel %vm299_vm5, %v1602_v2, %v1601_v6 }
 0x108   : > { %v1587_v55 = vsel %vm302_vm6, %v1586_v29, %v1585_v39  ;;  %v2042_v18 = vld [vmem:[%s2564_s26 + $0x9] sm:$0x1]  ;;  %v467_v19 = vsel %vm302_vm6, %v466_v5, %v465_v8  ;;  %v1943_v20 = vld [vmem:[%s2564_s26 + $0x4e] sm:$0x1]  ;;  %v1900_v21 = vld [vmem:[%s2564_s26 + $0x34] sm:$0x1]  ;;  %v955_v23 = vsel %vm302_vm6, %v954_v7, %v953_v11  ;;  %v1605_v28 = vsel %vm302_vm6, %v1604_v9, %v1603_v16 }
 0x109   : > { %1570 = vrot.lane.b32.xlu2 %v1569_v51, %s2400_s29  ;;  %v1277_v51 = vsel %vm302_vm6, %v1276_v24, %v1275_v36  ;;  %v970_v24 = vrot.slane %v1942_v12, 6  ;;  %v1898_v25 = vld [vmem:[%s2564_s26 + $0x4] sm:$0x1]  ;;  %v2045_v26 = vld [vmem:[%s2564_s26 + $0x51] sm:$0x1]  ;;  %v786_v32 = vrot.slane %v1900_v21, 6 }
 0x10a   : > { %v1901_v30 = vld [vmem:[%s2564_s26 + $0x4c] sm:$0x1]  ;;  %v2047_v33 = vld [vmem:[%s2564_s26 + $0x22] sm:$0x1]  ;;  %v1867_v34 = vld [vmem:[%s2564_s26 + $0x1a] sm:$0x1] }
 0x10b   : > { %v972_v35 = vrot.slane %v1943_v20, 5  ;;  %v1424_v38 = vrot.slane %v2045_v26, 5  ;;  %v788_v40 = vrot.slane %v1901_v30, 5  ;;  %v2046_v41 = vld [vmem:[%s2564_s26 + $0xa] sm:$0x1]  ;;  %v1438_v44 = vrot.slane %v2047_v33, 7 }
 0x10c   : > { %1408 = vrot.lane.b32.xlu1 %v1407_v47, %s2399_s24  ;;  %v1097_v47 = vsel %vm299_vm5, %v1096_v27, %v1095_v31  ;;  %v1421_v31 = vsel %vm296_vm4, %v1420_v15, %v2042_v18  ;;  %v2048_v43 = vld [vmem:[%s2564_s26 + $0x3a] sm:$0x1]  ;;  %v2049_v52 = vld [vmem:[%s2564_s26 + $0x52] sm:$0x1]  ;;  %v2013_v53 = vld [vmem:[%s2564_s26 + $0xa] sm:$0x1] }
 0x10d   : > { %v1099_v62 = vsel %vm302_vm6, %v1098_v37, %v1097_v47  ;;  %v2014_v37 = vld [vmem:[%s2564_s26 + $0x22] sm:$0x1]  ;;  %v2015_v48 = vld [vmem:[%s2564_s26 + $0x3a] sm:$0x1]  ;;  %v2016_v54 = vld [vmem:[%s2564_s26 + $0x52] sm:$0x1] }
 0x10e   : > { %1260 = vrot.lane.b32.xlu0 %v1259_v56, %s2385_s6  ;;  %v300_v56 = vsel %vm299_vm5, %v298_v45, %v297_v50  ;;  %v1868_v45 = vld [vmem:[%s2564_s26 + $0x32] sm:$0x1]  ;;  %v1292_v49 = vrot.slane %v2014_v37, 7  ;;  %v1866_v50 = vld [vmem:[%s2564_s26 + $0x2] sm:$0x1]  ;;  %v1442_v0 = vrot.slane %v2049_v52, 5 }
 0x10f   : > { %v303_v61 = vsel %vm302_vm6, %v301_v46, %v300_v56  ;;  %v642_v46 = vrot.slane %v1867_v34, 7  ;;  %v1440_v56 = vrot.slane %v2048_v43, 6  ;;  %v1903_v57 = vld [vmem:[%s2564_s26 + $0x1d] sm:$0x1]  ;;  %v1869_v58 = vld [vmem:[%s2564_s26 + $0x4a] sm:$0x1] }
 0x110   : > { %306 = vst.msk [vmem:[#allocation3] sm:$0xf] %vm305_vm7, %v303_v61  ;;  %v644_v59 = vrot.slane %v1868_v45, 6  ;;  %v1439_v61 = vsel %vm296_vm4, %v1438_v44, %v2046_v41  ;;  %v1293_v1 = vsel %vm296_vm4, %v1292_v49, %v2013_v53  ;;  %v1296_v2 = vrot.slane %v2016_v54, 5  ;;  %v1973_v3 = vld [vmem:[%s2564_s26 + $0x1e] sm:$0x1] }
 0x111   : > { %1082 = vrot.lane.b32.xlu2 %v1081_v17, %s2390_s23  ;;  %v1940_v17 = vld [vmem:[%s2564_s26 + $0x6] sm:$0x1]  ;;  %v643_v63 = vsel %vm296_vm4, %v642_v46, %v1866_v50  ;;  %v1904_v4 = vld [vmem:[%s2564_s26 + $0x35] sm:$0x1]  ;;  %v802_v5 = vrot.slane %v1903_v57, 7  ;;  %v646_v7 = vrot.slane %v1869_v58, 5  ;;  %v1441_v8 = vsel %vm299_vm5, %v1440_v56, %v1439_v61 }
 0x112   : > { %v969_v29 = vsel %vm296_vm4, %v968_v13, %v1940_v17  ;;  %v1871_v6 = vld [vmem:[%s2564_s26 + $0x1b] sm:$0x1]  ;;  %v645_v11 = vsel %vm299_vm5, %v644_v59, %v643_v63  ;;  %v1974_v12 = vld [vmem:[%s2564_s26 + $0x36] sm:$0x1]  ;;  %v1988_v13 = vld [vmem:[%s2564_s26 + $0x4] sm:$0x1] }
 0x113   : > { %v971_v39 = vsel %vm299_vm5, %v970_v24, %v969_v29  ;;  %v1112_v16 = vrot.slane %v1973_v3, 7  ;;  %v1990_v17 = vld [vmem:[%s2564_s26 + $0x34] sm:$0x1]  ;;  %v1991_v18 = vld [vmem:[%s2564_s26 + $0x4c] sm:$0x1]  ;;  %v1443_v24 = vsel %vm302_vm6, %v1442_v0, %v1441_v8  ;;  %v660_v26 = vrot.slane %v1871_v6, 7 }
 0x114   : > { %772 = vrot.lane.b32.xlu1 %v771_v14, %s2384_s5  ;;  %v2044_v14 = vld [vmem:[%s2564_s26 + $0x39] sm:$0x1]  ;;  %s2402_s5 = smov 108   ;;  %v1872_v20 = vld [vmem:[%s2564_s26 + $0x33] sm:$0x1]  ;;  %v804_v30 = vrot.slane %v1904_v4, 6 }
 0x115   : > { %v1422_v27 = vrot.slane %v2044_v14, 6  ;;  %v1989_v14 = vld [vmem:[%s2564_s26 + $0x1c] sm:$0x1]  ;;  %v1972_v21 = vld [vmem:[%s2564_s26 + $0x6] sm:$0x1]  ;;  %v1114_v33 = vrot.slane %v1974_v12, 6 }
 0x116   : > { %630 = vrot.lane.b32.xlu0 %v629_v22, %s2394_s28  ;;  %s2401_s28 = smov 92   ;;  %v784_v22 = vrot.slane %v1899_v10, 7  ;;  %v1902_v10 = vld [vmem:[%s2564_s26 + $0x5] sm:$0x1]  ;;  %v662_v37 = vrot.slane %v1872_v20, 6 }
 0x117   : > { %v1423_v42 = vsel %vm299_vm5, %v1422_v27, %v1421_v31  ;;  %v647_v27 = vsel %vm302_vm6, %v646_v7, %v645_v11  ;;  %v1870_v31 = vld [vmem:[%s2564_s26 + $0x3] sm:$0x1]  ;;  %v1835_v41 = vld [vmem:[%s2564_s26 + $0x19] sm:$0x1]  ;;  %v1977_v44 = vld [vmem:[%s2564_s26 + $0x1f] sm:$0x1] }
 0x118   : > { %v785_v36 = vsel %vm296_vm4, %v784_v22, %v1898_v25  ;;  %v1186_v22 = vrot.slane %v1990_v17, 6  ;;  %v1905_v25 = vld [vmem:[%s2564_s26 + $0x4d] sm:$0x1]  ;;  %v661_v43 = vsel %vm296_vm4, %v660_v26, %v1870_v31  ;;  %v2020_v50 = vld [vmem:[%s2564_s26 + $0x3b] sm:$0x1]  ;;  %v1130_v59 = vrot.slane %v1977_v44, 7 }
 0x119   : > { %1588 = vrot.lane.b32.xlu2 %v1587_v55, %s2401_s28  ;;  %v787_v47 = vsel %vm299_vm5, %v786_v32, %v785_v36  ;;  %v1425_v55 = vsel %vm302_vm6, %v1424_v38, %v1423_v42  ;;  %v1975_v32 = vld [vmem:[%s2564_s26 + $0x4e] sm:$0x1]  ;;  %v1873_v36 = vld [vmem:[%s2564_s26 + $0x4b] sm:$0x1]  ;;  %v1113_v38 = vsel %vm296_vm4, %v1112_v16, %v1972_v21  ;;  %v806_v42 = vrot.slane %v1905_v25, 5 }
 0x11a   : > { %v789_v60 = vsel %vm302_vm6, %v788_v40, %v787_v47  ;;  %v2019_v40 = vld [vmem:[%s2564_s26 + $0x23] sm:$0x1]  ;;  %v1116_v45 = vrot.slane %v1975_v32, 5  ;;  %v1978_v53 = vld [vmem:[%s2564_s26 + $0x37] sm:$0x1]  ;;  %v663_v57 = vsel %vm299_vm5, %v662_v37, %v661_v43 }
 0x11b   : > { %v1312_v52 = vrot.slane %v2019_v40, 7  ;;  %v1836_v54 = vld [vmem:[%s2564_s26 + $0x31] sm:$0x1]  ;;  %v2018_v58 = vld [vmem:[%s2564_s26 + $0xb] sm:$0x1]  ;;  %v1132_v7 = vrot.slane %v1978_v53, 6 }
 0x11c   : > { %1278 = vrot.lane.b32.xlu1 %v1277_v51, %s2388_s30  ;;  %v973_v51 = vsel %vm302_vm6, %v972_v35, %v971_v39  ;;  %v803_v35 = vsel %vm296_vm4, %v802_v5, %v1902_v10  ;;  %v2021_v0 = vld [vmem:[%s2564_s26 + $0x53] sm:$0x1]  ;;  %v482_v3 = vrot.slane %v1836_v54, 6  ;;  %v1979_v6 = vld [vmem:[%s2564_s26 + $0x4f] sm:$0x1] }
 0x11d   : > { %v805_v47 = vsel %vm299_vm5, %v804_v30, %v803_v35  ;;  %v1313_v5 = vsel %vm296_vm4, %v1312_v52, %v2018_v58  ;;  %v1875_v11 = vld [vmem:[%s2564_s26 + $0x1c] sm:$0x1]  ;;  %v1945_v12 = vld [vmem:[%s2564_s26 + $0x1f] sm:$0x1]  ;;  %v1134_v17 = vrot.slane %v1979_v6, 5 }
 0x11e   : > { %1100 = vrot.lane.b32.xlu0 %v1099_v62, %s2393_s25  ;;  %v1294_v62 = vrot.slane %v2015_v48, 6  ;;  %v664_v48 = vrot.slane %v1873_v36, 5  ;;  %v807_v61 = vsel %vm302_vm6, %v806_v42, %v805_v47  ;;  %v1839_v20 = vld [vmem:[%s2564_s26 + $0x1a] sm:$0x1]  ;;  %v1946_v25 = vld [vmem:[%s2564_s26 + $0x37] sm:$0x1] }
 0x11f   : > { %v986_v26 = vrot.slane %v1945_v12, 7  ;;  %v1840_v30 = vld [vmem:[%s2564_s26 + $0x32] sm:$0x1]  ;;  %v1944_v31 = vld [vmem:[%s2564_s26 + $0x7] sm:$0x1] }
 0x120   : > { %v1295_v15 = vsel %vm299_vm5, %v1294_v62, %v1293_v1  ;;  %v1976_v62 = vld [vmem:[%s2564_s26 + $0x7] sm:$0x1]  ;;  %v1314_v1 = vrot.slane %v2020_v50, 6  ;;  %v665_v4 = vsel %vm302_vm6, %v664_v48, %v663_v57  ;;  %v1981_v43 = vld [vmem:[%s2564_s26 + $0x20] sm:$0x1] }
 0x121   : > { %956 = vrot.lane.b32.xlu2 %v955_v23, %s2397_s20  ;;  %v1188_v23 = vrot.slane %v1991_v18, 5  ;;  %v1297_v29 = vsel %vm302_vm6, %v1296_v2, %v1295_v15  ;;  %v1837_v2 = vld [vmem:[%s2564_s26 + $0x49] sm:$0x1]  ;;  %v1131_v10 = vsel %vm296_vm4, %v1130_v59, %v1976_v62  ;;  %v987_v42 = vsel %vm296_vm4, %v986_v26, %v1944_v31  ;;  %v2051_v44 = vld [vmem:[%s2564_s26 + $0x23] sm:$0x1] }
 0x122   : > { %v1315_v16 = vsel %vm299_vm5, %v1314_v1, %v1313_v5  ;;  %v1980_v52 = vld [vmem:[%s2564_s26 + $0x8] sm:$0x1]  ;;  %v1982_v53 = vld [vmem:[%s2564_s26 + $0x38] sm:$0x1]  ;;  %v1949_v54 = vld [vmem:[%s2564_s26 + $0x20] sm:$0x1] }
 0x123   : > { %v1456_v57 = vrot.slane %v2051_v44, 7  ;;  %v1950_v62 = vld [vmem:[%s2564_s26 + $0x38] sm:$0x1]  ;;  %v1951_v1 = vld [vmem:[%s2564_s26 + $0x50] sm:$0x1] }
 0x124   : > { %468 = vrot.lane.b32.xlu1 %v467_v19, %s2392_s21  ;;  %s2403_s21 = smov 78   ;;  %v1184_v19 = vrot.slane %v1989_v14, 7  ;;  %v484_v14 = vrot.slane %v1837_v2, 5  ;;  %v1004_v2 = vrot.slane %v1949_v54, 7  ;;  %v2053_v5 = vld [vmem:[%s2564_s26 + $0x53] sm:$0x1] }
 0x125   : > { %v1911_v12 = vld [vmem:[%s2564_s26 + $0x1f] sm:$0x1]  ;;  %v1908_v26 = vld [vmem:[%s2564_s26 + $0x36] sm:$0x1]  ;;  %v1906_v31 = vld [vmem:[%s2564_s26 + $0x6] sm:$0x1] }
 0x126   : > { %1606 = vrot.lane.b32.xlu0 %v1605_v28, %s2402_s5  ;;  %v1185_v28 = vsel %vm296_vm4, %v1184_v19, %v1988_v13  ;;  %v1316_v13 = vrot.slane %v2021_v0, 5  ;;  %v1874_v19 = vld [vmem:[%s2564_s26 + $0x4] sm:$0x1] }
 0x127   : > { %v1187_v34 = vsel %vm299_vm5, %v1186_v22, %v1185_v28  ;;  %v1133_v22 = vsel %vm299_vm5, %v1132_v7, %v1131_v10  ;;  %v1877_v28 = vld [vmem:[%s2564_s26 + $0x4c] sm:$0x1] }
 0x128   : > { %v1189_v39 = vsel %vm302_vm6, %v1188_v23, %v1187_v34  ;;  %v1876_v23 = vld [vmem:[%s2564_s26 + $0x34] sm:$0x1]  ;;  %v1317_v32 = vsel %vm302_vm6, %v1316_v13, %v1315_v16  ;;  %v498_v34 = vrot.slane %v1839_v20, 7  ;;  %v1135_v36 = vsel %vm302_vm6, %v1134_v17, %v1133_v22  ;;  %v1907_v13 = vld [vmem:[%s2564_s26 + $0x1e] sm:$0x1] }
 0x129   : > { %1426 = vrot.lane.b32.xlu2 %v1425_v55, %s2403_s21  ;;  %1191 = vst.msk [vmem:[#allocation3 + $0x18] sm:$0xf] %vm305_vm7, %v1189_v39  ;;  %v480_v55 = vrot.slane %v1835_v41, 7  ;;  %v680_v37 = vrot.slane %v1876_v23, 6  ;;  %v988_v39 = vrot.slane %v1946_v25, 6  ;;  %v500_v41 = vrot.slane %v1840_v30, 6 }
 0x12a   : > { %v1008_v16 = vrot.slane %v1951_v1, 5  ;;  %v1460_v17 = vrot.slane %v2053_v5, 5  ;;  %v1912_v22 = vld [vmem:[%s2564_s26 + $0x37] sm:$0x1]  ;;  %v1879_v23 = vld [vmem:[%s2564_s26 + $0x1d] sm:$0x1] }
 0x12b   : > { %v2914_v9 = vpop.permute.xlu2 %407  ;;  %v838_v25 = vrot.slane %v1911_v12, 7  ;;  %v1913_v30 = vld [vmem:[%s2564_s26 + $0x4f] sm:$0x1]  ;;  %v1842_v1 = vld [vmem:[%s2564_s26 + $0x3] sm:$0x1] }
 0x12c   : > { %974 = vrot.lane.b32.xlu1 %v973_v51, %s2399_s24  ;;  %v1115_v51 = vsel %vm299_vm5, %v1114_v33, %v1113_v38  ;;  %v1841_v33 = vld [vmem:[%s2564_s26 + $0x4a] sm:$0x1]  ;;  %v1947_v38 = vld [vmem:[%s2564_s26 + $0x4f] sm:$0x1] }
 0x12d   : > { %v1117_v63 = vsel %vm302_vm6, %v1116_v45, %v1115_v51  ;;  %v682_v45 = vrot.slane %v1877_v28, 5  ;;  %v502_v47 = vrot.slane %v1841_v33, 5  ;;  %v990_v48 = vrot.slane %v1947_v38, 5  ;;  %v1880_v33 = vld [vmem:[%s2564_s26 + $0x35] sm:$0x1] }
 0x12e   : > { %790 = vrot.lane.b32.xlu0 %v789_v60, %s2386_s27  ;;  %s2404_s27 = smov 94   ;;  %v1834_v60 = vld [vmem:[%s2564_s26 + $0x1] sm:$0x1]  ;;  %v1909_v38 = vld [vmem:[%s2564_s26 + $0x4e] sm:$0x1]  ;;  %v698_v44 = vrot.slane %v1880_v33, 6 }
 0x12f   : > { %v481_v8 = vsel %vm296_vm4, %v480_v55, %v1834_v60  ;;  %v1148_v55 = vrot.slane %v1981_v43, 7  ;;  %v1983_v60 = vld [vmem:[%s2564_s26 + $0x50] sm:$0x1]  ;;  %v1915_v33 = vld [vmem:[%s2564_s26 + $0x8] sm:$0x1] }
 0x130   : > { %v483_v21 = vsel %vm299_vm5, %v482_v3, %v481_v8 }
 0x131   : > { %648 = vrot.lane.b32.xlu2 %v647_v27, %s2390_s23  ;;  %s3307_s23 = smov 60   ;;  %v485_v35 = vsel %vm302_vm6, %v484_v14, %v483_v21  ;;  %v1149_v8 = vsel %vm296_vm4, %v1148_v55, %v1980_v52  ;;  %v1152_v14 = vrot.slane %v1983_v60, 5  ;;  %v1910_v21 = vld [vmem:[%s2564_s26 + $0x7] sm:$0x1]  ;;  %v1848_v55 = vld [vmem:[%s2564_s26 + $0x34] sm:$0x1] }
 0x133   : > { %v2949_v49 = vpop.permute.xlu2 %428 }
 0x134   : > { %1444 = vrot.lane.b32.xlu1 %v1443_v24, %s2404_s27  ;;  %v678_v24 = vrot.slane %v1875_v11, 7  ;;  %v1006_v11 = vrot.slane %v1950_v62, 6  ;;  %v1849_v62 = vld [vmem:[%s2564_s26 + $0x4c] sm:$0x1] }
 0x136   : > { %1298 = vrot.lane.b32.xlu0 %v1297_v29, %s2391_s15  ;;  %v2946_v46 = vpop.permute.xlu1 %365  ;;  %v1838_v29 = vld [vmem:[%s2564_s26 + $0x2] sm:$0x1]  ;;  %v679_v40 = vsel %vm296_vm4, %v678_v24, %v1874_v19 }
 0x137   : > { %v681_v50 = vsel %vm299_vm5, %v680_v37, %v679_v40  ;;  %v1878_v37 = vld [vmem:[%s2564_s26 + $0x5] sm:$0x1] }
 0x138   : > { %v324_v56 = vpop.permute.xlu0 %323  ;;  %v683_v0 = vsel %vm302_vm6, %v682_v45, %v681_v50  ;;  %v1847_v45 = vld [vmem:[%s2564_s26 + $0x1c] sm:$0x1]  ;;  %v824_v50 = vrot.slane %v1909_v38, 5 }
 0x139   : > { %327 = vst.msk [vmem:[#allocation3] sm:$0xf] %vm326_vm8, %v324_v56  ;;  %1118 = vrot.lane.b32.xlu2 %v1117_v63, %s3307_s23  ;;  %v2052_v56 = vld [vmem:[%s2564_s26 + $0x3b] sm:$0x1]  ;;  %v2050_v63 = vld [vmem:[%s2564_s26 + $0xb] sm:$0x1] }
 0x13a   : > { %v1458_v6 = vrot.slane %v2052_v56, 6  ;;  %v1457_v10 = vsel %vm296_vm4, %v1456_v57, %v2050_v63  ;;  %v534_v57 = vrot.slane %v1847_v45, 7  ;;  %v1984_v63 = vld [vmem:[%s2564_s26 + $0x9] sm:$0x1]  ;;  %v1855_v45 = vld [vmem:[%s2564_s26 + $0x1e] sm:$0x1] }
 0x13b   : > { %v1499_v18 = vpop.permute.xlu2 %1498 }
 0x13c   : > { %808 = vrot.lane.b32.xlu1 %v807_v61, %s2383_s4  ;;  %s3308_s4 = smov 112   ;;  %v1948_v61 = vld [vmem:[%s2564_s26 + $0x8] sm:$0x1]  ;;  %v1459_v24 = vsel %vm299_vm5, %v1458_v6, %v1457_v10  ;;  %v536_v6 = vrot.slane %v1848_v55, 6  ;;  %v1893_v55 = vld [vmem:[%s2564_s26 + $0x4a] sm:$0x1] }
 0x13e   : > { %666 = vrot.lane.b32.xlu0 %v665_v4, %s2393_s25  ;;  %v387_v15 = vpop.permute.xlu1 %386  ;;  %s3309_s25 = smov 14   ;;  %v1150_v4 = vrot.slane %v1982_v53, 6 }
 0x140   : > { %v345_v27 = vpop.permute.xlu0 %344  ;;  %v1151_v19 = vsel %vm299_vm5, %v1150_v4, %v1149_v8  ;;  %v1987_v4 = vld [vmem:[%s2564_s26 + $0x51] sm:$0x1] }
 0x141   : > { %348 = vst.msk [vmem:[#allocation3] sm:$0xf] %vm347_vm9, %v345_v27  ;;  %486 = vrot.lane.b32.xlu2 %v485_v35, %s3309_s25  ;;  %s3310_s25 = smov 30   ;;  %v820_v27 = vrot.slane %v1907_v13, 7  ;;  %v1461_v35 = vsel %vm302_vm6, %v1460_v17, %v1459_v24  ;;  %v1852_v24 = vld [vmem:[%s2564_s26 + $0x35] sm:$0x1] }
 0x142   : > { %369 = vst.msk [vmem:[#allocation3] sm:$0xf] %vm368_vm10, %v2946_v46  ;;  %v499_v46 = vsel %vm296_vm4, %v498_v34, %v1838_v29  ;;  %v696_v34 = vrot.slane %v1879_v23, 7  ;;  %v1850_v23 = vld [vmem:[%s2564_s26 + $0x5] sm:$0x1] }
 0x143   : > { %390 = vst.msk [vmem:[#allocation3] sm:$0xf] %vm389_vm11, %v387_v15  ;;  %v1207_v51 = vpop.permute.xlu2 %1206  ;;  %v501_v59 = vsel %vm299_vm5, %v500_v41, %v499_v46  ;;  %v1005_v15 = vsel %vm296_vm4, %v1004_v2, %v1948_v61  ;;  %v839_v41 = vsel %vm296_vm4, %v838_v25, %v1910_v21  ;;  %v821_v43 = vsel %vm296_vm4, %v820_v27, %v1906_v31  ;;  %v1843_v46 = vld [vmem:[%s2564_s26 + $0x1b] sm:$0x1]  ;;  %v1916_v25 = vld [vmem:[%s2564_s26 + $0x20] sm:$0x1] }
 0x144   : > { %411 = vst.msk [vmem:[#allocation3] sm:$0xf] %vm410_vm12, %v2914_v9  ;;  %1318 = vrot.lane.b32.xlu1 %v1317_v32, %s3308_s4  ;;  %v503_v7 = vsel %vm302_vm6, %v502_v47, %v501_v59  ;;  %v1007_v29 = vsel %vm299_vm5, %v1006_v11, %v1005_v15  ;;  %v1153_v32 = vsel %vm302_vm6, %v1152_v14, %v1151_v19  ;;  %v842_v47 = vrot.slane %v1913_v30, 5  ;;  %v1851_v14 = vld [vmem:[%s2564_s26 + $0x1d] sm:$0x1] }
 0x145   : > { %432 = vst.msk [vmem:[#allocation3] sm:$0xf] %vm431_vm13, %v2949_v49  ;;  %v989_v49 = vsel %vm299_vm5, %v988_v39, %v987_v42  ;;  %v822_v39 = vrot.slane %v1908_v26, 6  ;;  %v1009_v40 = vsel %vm302_vm6, %v1008_v16, %v1007_v29  ;;  %v1881_v42 = vld [vmem:[%s2564_s26 + $0x4d] sm:$0x1]  ;;  %v516_v59 = vrot.slane %v1843_v46, 7 }
 0x146   : > { %1136 = vrot.lane.b32.xlu0 %v1135_v36, %s2400_s29  ;;  %v1481_v9 = vpop.permute.xlu1 %1480  ;;  %v991_v3 = vsel %vm302_vm6, %v990_v48, %v989_v49  ;;  %1209 = vst.msk [vmem:[#allocation3 + $0x18] sm:$0xf] %vm326_vm8, %v1207_v51  ;;  %v840_v36 = vrot.slane %v1912_v22, 6  ;;  %v697_v48 = vsel %vm296_vm4, %v696_v34, %v1878_v37  ;;  %v700_v53 = vrot.slane %v1881_v42, 5  ;;  %v1846_v49 = vld [vmem:[%s2564_s26 + $0x4] sm:$0x1] }
 0x147   : > { %1483 = vst.msk [vmem:[#allocation3 + $0x20] sm:$0xf] %vm305_vm7, %v1481_v9  ;;  %v1985_v9 = vld [vmem:[%s2564_s26 + $0x21] sm:$0x1]  ;;  %v823_v56 = vsel %vm299_vm5, %v822_v39, %v821_v43  ;;  %v699_v61 = vsel %vm299_vm5, %v698_v44, %v697_v48  ;;  %v535_v11 = vsel %vm296_vm4, %v534_v57, %v1846_v49  ;;  %v517_v12 = vsel %vm296_vm4, %v516_v59, %v1842_v1  ;;  %v1853_v27 = vld [vmem:[%s2564_s26 + $0x4d] sm:$0x1] }
 0x148   : > { %v450_v58 = vpop.permute.xlu0 %449  ;;  %1501 = vst.msk [vmem:[#allocation3 + $0x20] sm:$0xf] %vm326_vm8, %v1499_v18  ;;  %v841_v52 = vsel %vm299_vm5, %v840_v36, %v839_v41  ;;  %v825_v5 = vsel %vm302_vm6, %v824_v50, %v823_v56  ;;  %v701_v10 = vsel %vm302_vm6, %v700_v53, %v699_v61  ;;  %v1953_v15 = vld [vmem:[%s2564_s26 + $0x21] sm:$0x1]  ;;  %v538_v16 = vrot.slane %v1849_v62, 5 }
 0x149   : > { %453 = vst.msk [vmem:[#allocation3] sm:$0xf] %vm452_vm14, %v450_v58  ;;  %992 = vrot.lane.b32.xlu2 %v991_v3, %s2403_s21  ;;  %v1844_v58 = vld [vmem:[%s2564_s26 + $0x33] sm:$0x1]  ;;  %v843_v2 = vsel %vm302_vm6, %v842_v47, %v841_v52  ;;  %v1986_v3 = vld [vmem:[%s2564_s26 + $0x39] sm:$0x1]  ;;  %v537_v21 = vsel %vm299_vm5, %v536_v6, %v535_v11 }
 0x14a   : > { %v518_v8 = vrot.slane %v1844_v58, 6  ;;  %v1168_v13 = vrot.slane %v1986_v3, 6  ;;  %v1954_v29 = vld [vmem:[%s2564_s26 + $0x39] sm:$0x1]  ;;  %v1022_v30 = vrot.slane %v1953_v15, 7  ;;  %v539_v36 = vsel %vm302_vm6, %v538_v16, %v537_v21 }
 0x14b   : > { %v903_v20 = vpop.permute.xlu2 %902  ;;  %v1917_v34 = vld [vmem:[%s2564_s26 + $0x38] sm:$0x1]  ;;  %v1918_v37 = vld [vmem:[%s2564_s26 + $0x50] sm:$0x1]  ;;  %v858_v38 = vrot.slane %v1916_v25, 7  ;;  %v1024_v42 = vrot.slane %v1954_v29, 6 }
 0x14c   : > { %684 = vrot.lane.b32.xlu1 %v683_v0, %s3307_s23  ;;  %905 = vst.msk [vmem:[#allocation3 + $0x10] sm:$0xf] %vm305_vm7, %v903_v20  ;;  %s2405_s23 = smov 110   ;;  %v1166_v0 = vrot.slane %v1985_v9, 7  ;;  %v519_v26 = vsel %vm299_vm5, %v518_v8, %v517_v12  ;;  %v1955_v41 = vld [vmem:[%s2564_s26 + $0x51] sm:$0x1] }
 0x14d   : > { %v1883_v47 = vld [vmem:[%s2564_s26 + $0x1e] sm:$0x1]  ;;  %v1890_v48 = vld [vmem:[%s2564_s26 + $0x2] sm:$0x1]  ;;  %v556_v9 = vrot.slane %v1853_v27, 5  ;;  %v860_v50 = vrot.slane %v1917_v34, 6 }
 0x14e   : > { %504 = vrot.lane.b32.xlu0 %v503_v7, %s3310_s25  ;;  %v1517_v18 = vpop.permute.xlu1 %1516  ;;  %v1845_v7 = vld [vmem:[%s2564_s26 + $0x4b] sm:$0x1]  ;;  %v1167_v17 = vsel %vm296_vm4, %v1166_v0, %v1984_v63  ;;  %v1891_v52 = vld [vmem:[%s2564_s26 + $0x1a] sm:$0x1]  ;;  %v1892_v53 = vld [vmem:[%s2564_s26 + $0x32] sm:$0x1] }
 0x14f   : > { %1519 = vst.msk [vmem:[#allocation3 + $0x20] sm:$0xf] %vm347_vm9, %v1517_v18  ;;  %v1170_v18 = vrot.slane %v1987_v4, 5  ;;  %v520_v19 = vrot.slane %v1845_v7, 5  ;;  %v1026_v49 = vrot.slane %v1955_v41, 5  ;;  %v750_v56 = vrot.slane %v1891_v52, 7 }
 0x150   : > { %v1337_v28 = vpop.permute.xlu0 %1336  ;;  %v752_v57 = vrot.slane %v1892_v53, 6  ;;  %v1854_v62 = vld [vmem:[%s2564_s26 + $0x6] sm:$0x1]  ;;  %v1856_v63 = vld [vmem:[%s2564_s26 + $0x36] sm:$0x1]  ;;  %v754_v1 = vrot.slane %v1893_v55, 5 }
 0x151   : > { %1339 = vst.msk [vmem:[#allocation3 + $0x1c] sm:$0xf] %vm305_vm7, %v1337_v28  ;;  %1462 = vrot.lane.b32.xlu2 %v1461_v35, %s2405_s23  ;;  %v552_v28 = vrot.slane %v1851_v14, 7  ;;  %v1952_v35 = vld [vmem:[%s2564_s26 + $0x9] sm:$0x1]  ;;  %v521_v39 = vsel %vm302_vm6, %v520_v19, %v519_v26  ;;  %v714_v4 = vrot.slane %v1883_v47, 7 }
 0x152   : > { %v1023_v46 = vsel %vm296_vm4, %v1022_v30, %v1952_v35  ;;  %v1884_v3 = vld [vmem:[%s2564_s26 + $0x36] sm:$0x1]  ;;  %v1857_v8 = vld [vmem:[%s2564_s26 + $0x4e] sm:$0x1]  ;;  %v1882_v11 = vld [vmem:[%s2564_s26 + $0x6] sm:$0x1] }
 0x153   : > { %v1373_v54 = vpop.permute.xlu2 %1372  ;;  %v553_v44 = vsel %vm296_vm4, %v552_v28, %v1850_v23  ;;  %v1025_v0 = vsel %vm299_vm5, %v1024_v42, %v1023_v46  ;;  %v1922_v14 = vld [vmem:[%s2564_s26 + $0x39] sm:$0x1]  ;;  %v1885_v19 = vld [vmem:[%s2564_s26 + $0x4e] sm:$0x1]  ;;  %v715_v23 = vsel %vm296_vm4, %v714_v4, %v1882_v11  ;;  %v1887_v26 = vld [vmem:[%s2564_s26 + $0x1f] sm:$0x1] }
 0x154   : > { %1154 = vrot.lane.b32.xlu1 %v1153_v32, %s2401_s28  ;;  %v1169_v32 = vsel %vm299_vm5, %v1168_v13, %v1167_v17  ;;  %v1027_v16 = vsel %vm302_vm6, %v1026_v49, %v1025_v0  ;;  %v880_v25 = vrot.slane %v1922_v14, 6  ;;  %v574_v27 = vrot.slane %v1857_v8, 5  ;;  %v1888_v35 = vld [vmem:[%s2564_s26 + $0x37] sm:$0x1]  ;;  %v1889_v42 = vld [vmem:[%s2564_s26 + $0x4f] sm:$0x1] }
 0x155   : > { %v1171_v43 = vsel %vm302_vm6, %v1170_v18, %v1169_v32  ;;  %v572_v18 = vrot.slane %v1856_v63, 6  ;;  %v718_v29 = vrot.slane %v1885_v19, 5  ;;  %v1859_v46 = vld [vmem:[%s2564_s26 + $0x1f] sm:$0x1]  ;;  %v736_v47 = vrot.slane %v1889_v42, 5 }
 0x156   : > { %1010 = vrot.lane.b32.xlu0 %v1009_v40, %s2404_s27  ;;  %v1535_v51 = vpop.permute.xlu1 %1534  ;;  %v554_v40 = vrot.slane %v1852_v24, 6  ;;  %v1923_v24 = vld [vmem:[%s2564_s26 + $0x51] sm:$0x1]  ;;  %v588_v52 = vrot.slane %v1859_v46, 7  ;;  %v1861_v55 = vld [vmem:[%s2564_s26 + $0x4f] sm:$0x1] }
 0x157   : > { %1537 = vst.msk [vmem:[#allocation3 + $0x20] sm:$0xf] %vm368_vm10, %v1535_v51  ;;  %v1921_v51 = vld [vmem:[%s2564_s26 + $0x21] sm:$0x1]  ;;  %v882_v34 = vrot.slane %v1923_v24, 5 }
 0x158   : > { %v1355_v60 = vpop.permute.xlu0 %1354  ;;  %v555_v59 = vsel %vm299_vm5, %v554_v40, %v553_v44  ;;  %v878_v15 = vrot.slane %v1921_v51, 7  ;;  %v1860_v51 = vld [vmem:[%s2564_s26 + $0x37] sm:$0x1]  ;;  %v1610_v46 = vld [vmem:[%s3285_s1] sm:$0xff] }
 0x159   : > { %1357 = vst.msk [vmem:[#allocation3 + $0x1c] sm:$0xf] %vm326_vm8, %v1355_v60  ;;  %826 = vrot.lane.b32.xlu2 %v825_v5, %s2385_s6  ;;  %v862_v60 = vrot.slane %v1918_v37, 5  ;;  %v751_v5 = vsel %vm296_vm4, %v750_v56, %v1890_v48  ;;  %v557_v13 = vsel %vm302_vm6, %v556_v9, %v555_v59  ;;  %v590_v56 = vrot.slane %v1860_v51, 6 }
 0x15a   : > { %1375 = vst.msk [vmem:[#allocation3 + $0x1c] sm:$0xf] %vm347_vm9, %v1373_v54  ;;  %v859_v54 = vsel %vm296_vm4, %v858_v38, %v1915_v33  ;;  %v753_v12 = vsel %vm299_vm5, %v752_v57, %v751_v5 }
 0x15b   : > { %v1065_v22 = vpop.permute.xlu2 %1064  ;;  %v861_v7 = vsel %vm299_vm5, %v860_v50, %v859_v54  ;;  %v755_v17 = vsel %vm302_vm6, %v754_v1, %v753_v12  ;;  %v1858_v54 = vld [vmem:[%s2564_s26 + $0x7] sm:$0x1] }
 0x15c   : > { %844 = vrot.lane.b32.xlu1 %v843_v2, %s2388_s30  ;;  %v570_v2 = vrot.slane %v1855_v45, 7  ;;  %v863_v21 = vsel %vm302_vm6, %v862_v60, %v861_v7  ;;  %757 = vst.msk [vmem:[#allocation3 + $0xc] sm:$0xf] %vm305_vm7, %v755_v17  ;;  %v589_v57 = vsel %vm296_vm4, %v588_v52, %v1858_v54 }
 0x15e   : > { %702 = vrot.lane.b32.xlu0 %v701_v10, %s2400_s29  ;;  %v1225_v20 = vpop.permute.xlu1 %1224  ;;  %v1920_v10 = vld [vmem:[%s2564_s26 + $0x9] sm:$0x1]  ;;  %s2089_s29 = sshll.u32 %s2365_s19, 1 }
 0x15f   : > { %1227 = vst.msk [vmem:[#allocation3 + $0x18] sm:$0xf] %vm347_vm9, %v1225_v20  ;;  %v716_v20 = vrot.slane %v1884_v3, 6  ;;  %v879_v28 = vsel %vm296_vm4, %v878_v15, %v1920_v10 }
 0x160   : > { %v1047_v31 = vpop.permute.xlu0 %1046  ;;  %v881_v38 = vsel %vm299_vm5, %v880_v25, %v879_v28 }
 0x161   : > { %1049 = vst.msk [vmem:[#allocation3 + $0x14] sm:$0xf] %vm305_vm7, %v1047_v31  ;;  %522 = vrot.lane.b32.xlu2 %v521_v39, %s2397_s20  ;;  %v717_v33 = vsel %vm299_vm5, %v716_v20, %v715_v23  ;;  %v1886_v39 = vld [vmem:[%s2564_s26 + $0x7] sm:$0x1]  ;;  %v883_v44 = vsel %vm302_vm6, %v882_v34, %v881_v38  ;;  %v2406_v34 = vmov 0   ;;  %s3313_s20 = sand.u32 1, %s2341_s13  }
 0x162   : > { %1067 = vst.msk [vmem:[#allocation3 + $0x14] sm:$0xf] %vm326_vm8, %v1065_v22  ;;  %v571_v22 = vsel %vm296_vm4, %v570_v2, %v1854_v62  ;;  %v719_v41 = vsel %vm302_vm6, %v718_v29, %v717_v33  ;;  %v1616_v33 = vld [vmem:[%s3286_s2] sm:$0xff]  ;;  %2224 = vset.pattern.permute.xlu0 %v2406_v34  ;;  %s1652_s26 = scalar_lea.sflag [#allocation6], %s3313_s20 }
 0x163   : > { %v1571_v61 = vpop.permute.xlu2 %1570  ;;  %v573_v31 = vsel %vm299_vm5, %v572_v18, %v571_v22 }
 0x164   : > { %540 = vrot.lane.b32.xlu1 %v539_v36, %s2399_s24  ;;  %v732_v36 = vrot.slane %v1887_v26, 7  ;;  %v575_v40 = vsel %vm302_vm6, %v574_v27, %v573_v31 }
 0x166   : > { %1172 = vrot.lane.b32.xlu0 %v1171_v43, %s2402_s5  ;;  %v921_v58 = vpop.permute.xlu1 %920  ;;  %v734_v43 = vrot.slane %v1888_v35, 6  ;;  %v733_v45 = vsel %vm296_vm4, %v732_v36, %v1886_v39 }
 0x167   : > { %923 = vst.msk [vmem:[#allocation3 + $0x10] sm:$0xf] %vm326_vm8, %v921_v58  ;;  %v592_v58 = vrot.slane %v1861_v55, 5 }
 0x168   : > { %v1553_v6 = vpop.permute.xlu0 %1552  ;;  %v735_v50 = vsel %vm299_vm5, %v734_v43, %v733_v45 }
 0x169   : > { %1555 = vst.msk [vmem:[#allocation3 + $0x20] sm:$0xf] %vm389_vm11, %v1553_v6  ;;  %1028 = vrot.lane.b32.xlu2 %v1027_v16, %s2405_s23  ;;  %v737_v49 = vsel %vm302_vm6, %v736_v47, %v735_v50 }
 0x16a   : > { %1573 = vst.msk [vmem:[#allocation3 + $0x20] sm:$0xf] %vm410_vm12, %v1571_v61  ;;  %v591_v61 = vsel %vm299_vm5, %v590_v56, %v589_v57 }
 0x16b   : > { %v1083_v32 = vpop.permute.xlu2 %1082  ;;  %v593_v63 = vsel %vm302_vm6, %v592_v58, %v591_v61 }
 0x16c   : > { %558 = vrot.lane.b32.xlu1 %v557_v13, %s2403_s21  ;;  %1085 = vst.msk [vmem:[#allocation3 + $0x14] sm:$0xf] %vm347_vm9, %v1083_v32 }
 0x16e   : > { %864 = vrot.lane.b32.xlu0 %v863_v21, %s2391_s15  ;;  %v1391_v30 = vpop.permute.xlu1 %1390  ;;  %s1662_s15 = sadd.s32 %s2361_s18, %s2089_s29  ;;  %s2275_s29 = scalar_lea.hbm %s3287_s3, 32 }
 0x16f   : > { %1393 = vst.msk [vmem:[#allocation3 + $0x1c] sm:$0xf] %vm368_vm10, %v1391_v30  ;;  %s2090_s24 = sshll.u32 %s1662_s15, 3 }
 0x170   : > { %v1243_v37 = vpop.permute.xlu0 %1242  ;;  %s1664_s21 = scalar_lea.hbm %s3287_s3, %s2090_s24 }
 0x171   : > { %1245 = vst.msk [vmem:[#allocation3 + $0x18] sm:$0xf] %vm368_vm10, %v1243_v37  ;;  %720 = vrot.lane.b32.xlu2 %v719_v41, %s2401_s28  ;;  %s1668_s25 = sshll.u32 %s1664_s21, 4  ;;  %s1669_s25 = int_to_ptr.hbm [resolvable:$true] %s1668_s25 }
 0x172   : > { %s2269_s19 = sshra.s32 %s1669_s25, 4  ;;  %s2270_s19 = int_to_ptr.hbm [resolvable:$true] %s2269_s19 }
 0x173   : > { %v1589_v9 = vpop.permute.xlu2 %1588  ;;  %s2271_s18 = scalar_lea.hbm %s2270_s19, 8  ;;  %p2276_p11 = scmp.lt.s32.totalorder %s2270_s19, %s3287_s3 }
 0x174   : > { %576 = vrot.lane.b32.xlu1 %v575_v40, %s2404_s27  ;;  %1591 = vst.msk [vmem:[#allocation3 + $0x20] sm:$0xf] %vm431_vm13, %v1589_v9  ;;  %s3311_s27 = scalar_lea.vmem [#allocation7], %s2543_s11  ;;  %p2272_p7 = scmp.ne.s32.totalorder %s2270_s19, %s2271_s18 }
 0x175   : > { %p2277_p13 = scmp.lt.s32.totalorder %s2275_s29, %s2271_s18 }
 0x176   : > { %884 = vrot.lane.b32.xlu0 %v883_v44, %s3308_s4  ;;  %v939_v48 = vpop.permute.xlu1 %938  ;;  %s1666_s4 = sshll.u32 %s3311_s27, 4  ;;  %p2273_p9 = pnand %p2272_p7, %p2509_p12  ;;  %s1667_s4 = int_to_ptr.vmem [resolvable:$true] %s1666_s4 }
 0x177   : > { %941 = vst.msk [vmem:[#allocation3 + $0x10] sm:$0xf] %vm347_vm9, %v939_v48  ;;  %p2278_p0 = por %p2277_p13, %p2276_p11 }
 0x178   : > { %v613_v53 = vpop.permute.xlu0 %612  ;;  %p2274_p10 = pneg %p2273_p9 }
 0x179   : > { %615 = vst.msk [vmem:[#allocation3 + $0x8] sm:$0xf] %vm305_vm7, %v613_v53  ;;  %738 = vrot.lane.b32.xlu2 %v737_v49, %s2402_s5 }
 0x17a   : > { %p2279_p1 = pnand %p2278_p0, %p2274_p10 }
 0x17b   : > { %v957_v60 = vpop.permute.xlu2 %956 }
 0x17c   : > { %959 = vst.msk [vmem:[#allocation3 + $0x10] sm:$0xf] %vm368_vm10, %v957_v60 }
 0x17e   : > { %v1409_v59 = vpop.permute.xlu1 %1408  ;;  %1619 = vperm.xlu0 %2224, %v1616_v33  }
 0x17f   : > { %1411 = vst.msk [vmem:[#allocation3 + $0x1c] sm:$0xf] %vm389_vm11, %v1409_v59 }
 0x180   : > { %v1261_v62 = vpop.permute.xlu0 %1260 }
 0x181   : > { %1263 = vst.msk [vmem:[#allocation3 + $0x18] sm:$0xf] %vm389_vm11, %v1261_v62  ;;  %594 = vrot.lane.b32.xlu2 %v593_v63, %s2405_s23  ;;  %s3312_s23 = smov %s3311_s27 }
 0x183   : > { %v1427_v1 = vpop.permute.xlu2 %1426 }
 0x184   : > { %1429 = vst.msk [vmem:[#allocation3 + $0x1c] sm:$0xf] %vm410_vm12, %v1427_v1 }
 0x186   : > { %v773_v0 = vpop.permute.xlu1 %772 }
 0x187   : > { %775 = vst.msk [vmem:[#allocation3 + $0xc] sm:$0xf] %vm326_vm8, %v773_v0 }
 0x188   : > { %v631_v2 = vpop.permute.xlu0 %630 }
 0x189   : > { %633 = vst.msk [vmem:[#allocation3 + $0x8] sm:$0xf] %vm326_vm8, %v631_v2 }
 0x18b   : > { %v649_v4 = vpop.permute.xlu2 %648 }
 0x18c   : > { %651 = vst.msk [vmem:[#allocation3 + $0x8] sm:$0xf] %vm347_vm9, %v649_v4 }
 0x18e   : > { %v1279_v3 = vpop.permute.xlu1 %1278 }
 0x18f   : > { %1281 = vst.msk [vmem:[#allocation3 + $0x18] sm:$0xf] %vm410_vm12, %v1279_v3 }
 0x190   : > { %v1101_v5 = vpop.permute.xlu0 %1100 }
 0x191   : > { %1103 = vst.msk [vmem:[#allocation3 + $0x14] sm:$0xf] %vm368_vm10, %v1101_v5 }
 0x193   : > { %v1119_v7 = vpop.permute.xlu2 %1118 }
 0x194   : > { %1121 = vst.msk [vmem:[#allocation3 + $0x14] sm:$0xf] %vm389_vm11, %v1119_v7 }
 0x196   : > { %v469_v6 = vpop.permute.xlu1 %468 }
 0x197   : > { %471 = vst.msk [vmem:[#allocation3 + $0x4] sm:$0xf] %vm305_vm7, %v469_v6 }
 0x198   : > { %v1607_v8 = vpop.permute.xlu0 %1606 }
 0x199   : > { %1609 = vst.msk [vmem:[#allocation3 + $0x20] sm:$0xf] %vm452_vm14, %v1607_v8 }
 0x19b   : > { %v487_v11 = vpop.permute.xlu2 %486 }
 0x19c   : > { %489 = vst.msk [vmem:[#allocation3 + $0x4] sm:$0xf] %vm326_vm8, %v487_v11 }
 0x19e   : > { %v975_v10 = vpop.permute.xlu1 %974 }
 0x19f   : > { %977 = vst.msk [vmem:[#allocation3 + $0x10] sm:$0xf] %vm389_vm11, %v975_v10 }
 0x1a0   : > { %v791_v12 = vpop.permute.xlu0 %790  ;;  %v1615_v13 = vld [vmem:[#allocation3 + $0x20] sm:$0xf] }
 0x1a1   : > { %793 = vst.msk [vmem:[#allocation3 + $0xc] sm:$0xf] %vm347_vm9, %v791_v12  ;;  %2086 = vmatpush.msk.msra.mxu0 %vm1626_vm15, %v1615_v13 }
 0x1a3   : > { %v993_v15 = vpop.permute.xlu2 %992 }
 0x1a4   : > { %995 = vst.msk [vmem:[#allocation3 + $0x10] sm:$0xf] %vm410_vm12, %v993_v15 }
 0x1a6   : > { %v1445_v14 = vpop.permute.xlu1 %1444 }
 0x1a7   : > { %1447 = vst.msk [vmem:[#allocation3 + $0x1c] sm:$0xf] %vm431_vm13, %v1445_v14 }
 0x1a8   : > { %v1299_v16 = vpop.permute.xlu0 %1298 }
 0x1a9   : > { %1301 = vst.msk [vmem:[#allocation3 + $0x18] sm:$0xf] %vm431_vm13, %v1299_v16 }
 0x1ab   : > { %v1463_v18 = vpop.permute.xlu2 %1462 }
 0x1ac   : > { %1465 = vst.msk [vmem:[#allocation3 + $0x1c] sm:$0xf] %vm452_vm14, %v1463_v18 }
 0x1ae   : > { %v809_v17 = vpop.permute.xlu1 %808 }
 0x1af   : > { %811 = vst.msk [vmem:[#allocation3 + $0xc] sm:$0xf] %vm368_vm10, %v809_v17 }
 0x1b0   : > { %v667_v19 = vpop.permute.xlu0 %666 }
 0x1b1   : > { %669 = vst.msk [vmem:[#allocation3 + $0x8] sm:$0xf] %vm368_vm10, %v667_v19 }
 0x1b3   : > { %v827_v21 = vpop.permute.xlu2 %826 }
 0x1b4   : > { %829 = vst.msk [vmem:[#allocation3 + $0xc] sm:$0xf] %vm389_vm11, %v827_v21 }
 0x1b6   : > { %v1319_v20 = vpop.permute.xlu1 %1318 }
 0x1b7   : > { %1321 = vst.msk [vmem:[#allocation3 + $0x18] sm:$0xf] %vm452_vm14, %v1319_v20 }
 0x1b8   : > { %v1137_v22 = vpop.permute.xlu0 %1136 }
 0x1b9   : > { %1139 = vst.msk [vmem:[#allocation3 + $0x14] sm:$0xf] %vm410_vm12, %v1137_v22 }
 0x1bb   : > { %v523_v25 = vpop.permute.xlu2 %522 }
 0x1be   : > { %v685_v23 = vpop.permute.xlu1 %684  ;;  %v1614_v24 = vld [vmem:[#allocation3 + $0x18] sm:$0xff] }
 0x1bf   : > { %687 = vst.msk [vmem:[#allocation3 + $0x8] sm:$0xf] %vm389_vm11, %v685_v23  ;;  %1642 = vmatpush.msra.mxu0 %v1614_v24 }
 0x1c0   : > { %v505_v26 = vpop.permute.xlu0 %504 }
 0x1c1   : > { %507 = vst.msk [vmem:[#allocation3 + $0x4] sm:$0xf] %vm347_vm9, %v505_v26 }
 0x1c2   : > { %525 = vst.msk [vmem:[#allocation3 + $0x4] sm:$0xf] %vm368_vm10, %v523_v25 }
 0x1c3   : > { %v1029_v28 = vpop.permute.xlu2 %1028 }
 0x1c6   : > { %v1155_v27 = vpop.permute.xlu1 %1154 }
 0x1c7   : > { %1157 = vst.msk [vmem:[#allocation3 + $0x14] sm:$0xf] %vm431_vm13, %v1155_v27 }
 0x1c8   : > { %v1011_v29 = vpop.permute.xlu0 %1010 }
 0x1c9   : > { %1013 = vst.msk [vmem:[#allocation3 + $0x10] sm:$0xf] %vm431_vm13, %v1011_v29 }
 0x1ca   : > { %1031 = vst.msk [vmem:[#allocation3 + $0x10] sm:$0xf] %vm452_vm14, %v1029_v28 }
 0x1cb   : > { %v721_v31 = vpop.permute.xlu2 %720 }
 0x1ce   : > { %v845_v30 = vpop.permute.xlu1 %844 }
 0x1cf   : > { %847 = vst.msk [vmem:[#allocation3 + $0xc] sm:$0xf] %vm410_vm12, %v845_v30 }
 0x1d0   : > { %v703_v32 = vpop.permute.xlu0 %702 }
 0x1d1   : > { %705 = vst.msk [vmem:[#allocation3 + $0x8] sm:$0xf] %vm410_vm12, %v703_v32 }
 0x1d2   : > { %723 = vst.msk [vmem:[#allocation3 + $0x8] sm:$0xf] %vm431_vm13, %v721_v31 }
 0x1d3   : > { %v739_v36 = vpop.permute.xlu2 %738 }
 0x1d4   : > { %741 = vst.msk [vmem:[#allocation3 + $0x8] sm:$0xf] %vm452_vm14, %v739_v36 }
 0x1d6   : > { %v541_v35 = vpop.permute.xlu1 %540 }
 0x1d7   : > { %543 = vst.msk [vmem:[#allocation3 + $0x4] sm:$0xf] %vm389_vm11, %v541_v35 }
 0x1d8   : > { %v1173_v37 = vpop.permute.xlu0 %1172 }
 0x1d9   : > { %1175 = vst.msk [vmem:[#allocation3 + $0x14] sm:$0xf] %vm452_vm14, %v1173_v37 }
 0x1db   : > { %v595_v41 = vpop.permute.xlu2 %594 }
 0x1de   : > { %v559_v38 = vpop.permute.xlu1 %558 }
 0x1df   : > { %561 = vst.msk [vmem:[#allocation3 + $0x4] sm:$0xf] %vm410_vm12, %v559_v38 }
 0x1e0   : > { %v865_v39 = vpop.permute.xlu0 %864  ;;  %v1613_v40 = vld [vmem:[#allocation3 + $0x10] sm:$0xff] }
 0x1e1   : > { %867 = vst.msk [vmem:[#allocation3 + $0xc] sm:$0xf] %vm431_vm13, %v865_v39  ;;  %1643 = vmatpush.msra.mxu0 %v1613_v40 }
 0x1e6   : > { %v577_v42 = vpop.permute.xlu1 %576 }
 0x1e7   : > { %579 = vst.msk [vmem:[#allocation3 + $0x4] sm:$0xf] %vm431_vm13, %v577_v42 }
 0x1e8   : > { %v885_v43 = vpop.permute.xlu0 %884  ;;  %597 = vst.msk [vmem:[#allocation3 + $0x4] sm:$0xf] %vm452_vm14, %v595_v41 }
 0x1e9   : > { %887 = vst.msk [vmem:[#allocation3 + $0xc] sm:$0xf] %vm452_vm14, %v885_v43 }
 0x1ef   : > { %v1611_v45 = vld [vmem:[#allocation3] sm:$0xff] }
 0x1f0   : > { %v1612_v44 = vld [vmem:[#allocation3 + $0x8] sm:$0xff]  ;;  %v1620_v47 = vpop.permute.xlu0 %1619 }
 0x1f1   : > { %1644 = vmatpush.msra.mxu0 %v1612_v44 }
 0x1f3   : > { %1645 = vmatpush.msra.mxu0 %v1611_v45 }
 0x1f4   : > { %2087 = vmatmul.msk.f32.vlgmr.msra.gmra.mxu0 %vm1622_vm0, %v1610_v46 }
 0x271   : > { %v1647_v48 = vpop.f32.mrf.mxu0 }
 0x272   : > { %v1648_v9 = vadd.f32 %v1647_v48, %v1620_v47 }
 0x274   : > { %1650 = vst [vmem:[%s3312_s23] sm:$0xff] %v1648_v9 }
 0x275   : > { %2282 = shalt.err (!%p2279_p1)
}
 0x276   : > { %2096 = dma.vmem_to_hbm [thread:$0]  (%p2509_p12), %s1667_s4, 128, %s1669_s25, %s1652_s26  }
 0x277 PF: > { %p2107_p4 = scmp.ge.s32.totalorder %s2377_s22, 2  ;;  %s1680_s11 = sand.u32 1, %s2337_s12  }
 0x278   : > { %s1681_s28 = scalar_lea.sflag [#allocation6], %s1680_s11 }
 0x279   : > { %p2103_p5 = pnand %p2107_p4, %p2522_p2 }
 0x27b   : > { %p2104_p6 = pneg %p2103_p5 }
 0x27d   : > { %2332 = dma.done.wait (%p2104_p6), %s1681_s28, 128  }
 0x27e   : > { %2334 = vsyncadd (%p2104_p6), %s1681_s28, 4294967168  ;;  %s19_s22 = sadd.s32 1, %s2377_s22   ;;  %s3314_s18 = sld [smem:[#allocation10_spill]] }
 0x27f   : > { %p16_p8 = scmp.ge.s32.totalorder %s19_s22, 6   ;;  %s3315_s19 = sld [smem:[#allocation11_spill]] }
 0x280   : > { %s3316_s20 = sld [smem:[#allocation12_spill]]  ;;  %s3318_s12 = smov %s2341_s13 }
 0x281   : > { %s3317_s21 = sld [smem:[#allocation13_spill]]  ;;  %s3319_s13 = smov %s2345_s14 }
 0x282   : > { %s3320_s14 = smov %s2517_s9  ;;  %s3321_s15 = smov %s2353_s16 }
 0x283   : > { %s3322_s16 = smov %s2357_s17  ;;  %s3323_s17 = smov %s2514_s8 }
 0x284   :  { %18 = sbr.rel (!%p16_p8) target bundleno = 9 (0x9), region = 93 }
 0x289   :  { %1687 = vsyncpa [#allocation5], 1 }
 0x28a   :  { %1689 = vsyncpa [#allocation5 + $0x1], 1 }
 0x28b   :  { %1690 = vsyncpa [#allocation6], 1 }
 0x28c   :  { %1692 = vsyncpa [#allocation6 + $0x1], 1 }

</bundles_post_ra>
